<compile_context>
chip_gen: v7x
topology: tpu7x:2x2x1
jax: 0.10.0
libtpu: 0.0.40
codegen_flags: <defaults>
</compile_context>

<pallas_src>
import numpy as np
import jax
import jax.numpy as jnp
from jax.experimental import pallas as pl
from jax.experimental.pallas import tpu as pltpu

BN_EPS = 1e-5
IMAGE_SIZE = 16          # small synthetic size (PyTorch default was 100); 16*8 = 128 lanes
BATCH = 2
NUM_CLASSES = 5
HIDDEN_PAD = 512         # 500 -> 512
OUT_PAD = 128            # 5   -> 128

_VMEM = pl.BlockSpec(memory_space=pltpu.MemorySpace.VMEM)


# ----------------------------------------------------------------------------
# Fused Pallas kernel
# ----------------------------------------------------------------------------
def _siamese_kernel(x1_ref, x2_ref,
                    m1_ref, p1_ref, m2_ref, p2_ref, m3_ref, p3_ref,
                    fw1_ref, fb1_ref, fw2_ref, fb2_ref, fw3_ref, fb3_ref,
                    o_ref):
    """Fused forward for both siamese branches.

    x1_ref, x2_ref : (B, H, W) f32 inputs (channel dim already squeezed)
    m{l}_ref       : (3, W*Cin, W*Cout) f32 folded conv matrices (one per kernel
                     row; 3x3 taps, Cin contraction and column reflection folded)
    p{l}_ref       : (3, W*Cout) f32 rows = [conv bias, bn scale, bn shift]
    fw1_ref        : (H, W*8, 512) bf16  fc1 weight permuted per spatial row
    fw2_ref        : (512, 512) bf16,  fw3_ref: (512, 128) bf16
    fb*_ref        : (1, 512) / (1, 512) / (1, 128) f32
    o_ref          : (2B, 128) f32 (first NUM_CLASSES columns are real outputs)
    """
    H = x1_ref.shape[1]

    # Stack both branches on the batch axis -> (2B, H, W*Cin) with Cin = 1.
    x = jnp.concatenate([x1_ref[...], x2_ref[...]], axis=0).astype(jnp.float32)

    def conv_bn_relu(xin, m_ref, p_ref):
        # xin: (2B, H, W*Cin) -> (2B, H, W*Cout)
        b2, _, wcin = xin.shape
        wcout = m_ref.shape[2]
        # ReflectionPad2d(1): rows here, column reflection is folded into m_ref.
        xp = jnp.concatenate([xin[:, 1:2, :], xin, xin[:, H - 2:H - 1, :]],
                             axis=1)                              # (2B, H+2, W*Cin)
        acc = jnp.zeros((b2 * H, wcout), jnp.float32)
        for dy in range(3):                                        # 3 MXU matmuls
            lhs = xp[:, dy:dy + H, :].reshape(b2 * H, wcin)
            acc = acc + jnp.dot(lhs, m_ref[dy],
                                preferred_element_type=jnp.float32)
        bias, scale, shift = p_ref[0:1, :], p_ref[1:2, :], p_ref[2:3, :]
        # TODO(synk): Dropout(p=0.2) is identity in eval mode; training-mode RNG drop not implemented.
        y = jnp.maximum(acc + bias, 0.0) * scale + shift           # ReLU -> BatchNorm(eval)
        return y.reshape(b2, H, wcout)

    a = conv_bn_relu(x, m1_ref, p1_ref)       # (2B, H, W*4)
    a = conv_bn_relu(a, m2_ref, p2_ref)       # (2B, H, W*8)
    a = conv_bn_relu(a, m3_ref, p3_ref)       # (2B, H, W*8) == (4, 16, 128)

    # fc1: contract over (c, h, w); accumulate one 128-wide matmul per spatial
    # row so activations never need a lane-axis reshape.  bf16 weights, f32 acc.
    a_bf = a.astype(jnp.bfloat16)
    b2 = a.shape[0]
    h1 = jnp.zeros((b2, fb1_ref.shape[1]), jnp.float32)
    for h in range(H):
        h1 = h1 + jnp.dot(a_bf[:, h, :], fw1_ref[h],
                          preferred_element_type=jnp.float32)
    h1 = jnp.maximum(h1 + fb1_ref[...], 0.0)

    h2 = jnp.dot(h1.astype(jnp.bfloat16), fw2_ref[...],
                 preferred_element_type=jnp.float32) + fb2_ref[...]
    h2 = jnp.maximum(h2, 0.0)

    out = jnp.dot(h2.astype(jnp.bfloat16), fw3_ref[...],
                  preferred_element_type=jnp.float32) + fb3_ref[...]
    o_ref[...] = out.astype(o_ref.dtype)


# ----------------------------------------------------------------------------
# Parameter init (PyTorch-module-shaped, deterministic)
# ----------------------------------------------------------------------------
def init_params(key, image_size=IMAGE_SIZE):
    def conv_p(k, cin, cout):
        kw, kb = jax.random.split(k)
        bound = 1.0 / (cin * 9) ** 0.5
        w = jax.random.uniform(kw, (3, 3, cin, cout), jnp.float32, -bound, bound)
        b = jax.random.uniform(kb, (cout,), jnp.float32, -bound, bound)
        return w, b

    def bn_p(k, c):
        k1, k2, k3 = jax.random.split(k, 3)
        gamma = jax.random.uniform(k1, (c,), jnp.float32, 0.5, 1.5)
        beta = jax.random.uniform(k2, (c,), jnp.float32, -0.5, 0.5)
        mean = jax.random.uniform(k3, (c,), jnp.float32, -0.1, 0.1)
        var = jnp.ones((c,), jnp.float32)
        return gamma, beta, mean, var

    def lin_p(k, din, dout):
        kw, kb = jax.random.split(k)
        bound = 1.0 / din ** 0.5
        w = jax.random.uniform(kw, (din, dout), jnp.float32, -bound, bound)
        b = jax.random.uniform(kb, (dout,), jnp.float32, -bound, bound)
        return w, b

    ks = jax.random.split(key, 9)
    feat = 8 * image_size * image_size
    return {
        "conv1": conv_p(ks[0], 1, 4), "bn1": bn_p(ks[1], 4),
        "conv2": conv_p(ks[2], 4, 8), "bn2": bn_p(ks[3], 8),
        "conv3": conv_p(ks[4], 8, 8), "bn3": bn_p(ks[5], 8),
        "fc1": lin_p(ks[6], feat, 500),
        "fc2": lin_p(ks[7], 500, 500),
        "fc3": lin_p(ks[8], 500, NUM_CLASSES),
    }


# ----------------------------------------------------------------------------
# One-time host-side parameter preparation (kernel-friendly layout)
# ----------------------------------------------------------------------------
def _fold_conv_layer(conv, bn, width):
    """Fold the 3x3 conv (incl. column reflection pad), bias and eval-BatchNorm
    into 3 dense (W*Cin, W*Cout) matrices + a (3, W*Cout) [bias;scale;shift]."""
    w, b = (np.asarray(a, np.float64) for a in conv)
    gamma, beta, mean, var = (np.asarray(a, np.float64) for a in bn)
    _, _, cin, cout = w.shape

    def reflect(i):                 # padded column index -> source column index
        j = i - 1
        if j < 0:
            j = -j
        if j > width - 1:
            j = 2 * (width - 1) - j
        return j

    m = np.zeros((3, width * cin, width * cout), np.float64)
    for dy in range(3):
        for dx in range(3):
            for wo in range(width):
                wi = reflect(wo + dx)
                m[dy, wi * cin:(wi + 1) * cin, wo * cout:(wo + 1) * cout] += w[dy, dx]

    scale = gamma / np.sqrt(var + BN_EPS)
    shift = beta - mean * scale
    p = np.stack([np.tile(b, width), np.tile(scale, width), np.tile(shift, width)])
    return jnp.asarray(m, jnp.float32), jnp.asarray(p, jnp.float32)


def prepare_params(params, image_size=IMAGE_SIZE):
    w_ = image_size
    m1, p1 = _fold_conv_layer(params["conv1"], params["bn1"], w_)
    m2, p2 = _fold_conv_layer(params["conv2"], params["bn2"], w_)
    m3, p3 = _fold_conv_layer(params["conv3"], params["bn3"], w_)

    w1, b1 = (np.asarray(a, np.float32) for a in params["fc1"])
    w2, b2 = (np.asarray(a, np.float32) for a in params["fc2"])
    w3, b3 = (np.asarray(a, np.float32) for a in params["fc3"])

    # fc1 rows follow PyTorch's NCHW flatten (c*H*W + h*W + w); re-order to the
    # kernel's (h, w, c) activation layout and split per spatial row h.
    fw1 = w1.reshape(8, w_, w_, 500).transpose(1, 2, 0, 3).reshape(w_, w_ * 8, 500)
    fw1 = np.pad(fw1, ((0, 0), (0, 0), (0, HIDDEN_PAD - 500)))
    fb1 = np.pad(b1, (0, HIDDEN_PAD - 500))[None, :]

    fw2 = np.pad(w2, ((0, HIDDEN_PAD - 500), (0, HIDDEN_PAD - 500)))
    fb2 = np.pad(b2, (0, HIDDEN_PAD - 500))[None, :]

    fw3 = np.pad(w3, ((0, HIDDEN_PAD - 500), (0, OUT_PAD - NUM_CLASSES)))
    fb3 = np.pad(b3, (0, OUT_PAD - NUM_CLASSES))[None, :]

    return {
        "m1": m1, "p1": p1, "m2": m2, "p2": p2, "m3": m3, "p3": p3,
        "fw1": jnp.asarray(fw1, jnp.bfloat16), "fb1": jnp.asarray(fb1, jnp.float32),
        "fw2": jnp.asarray(fw2, jnp.bfloat16), "fb2": jnp.asarray(fb2, jnp.float32),
        "fw3": jnp.asarray(fw3, jnp.bfloat16), "fb3": jnp.asarray(fb3, jnp.float32),
    }


# ----------------------------------------------------------------------------
# Forward (single fused pallas_call for both branches)
# ----------------------------------------------------------------------------
@jax.jit
def siamese_forward(x1, x2, kp):
    b = x1.shape[0]
    out = pl.pallas_call(
        _siamese_kernel,
        out_shape=jax.ShapeDtypeStruct((2 * b, OUT_PAD), jnp.float32),
        in_specs=[_VMEM] * 14,
        out_specs=_VMEM,
    )(x1[:, 0], x2[:, 0],
      kp["m1"], kp["p1"], kp["m2"], kp["p2"], kp["m3"], kp["p3"],
      kp["fw1"], kp["fb1"], kp["fw2"], kp["fb2"], kp["fw3"], kp["fb3"])
    return out[:b, :NUM_CLASSES], out[b:, :NUM_CLASSES]


# ----------------------------------------------------------------------------
# Pure-JAX (XLA) reference for validation
# ----------------------------------------------------------------------------
def _reference_forward_once(x, params):
    def conv_block(h, conv, bn):
        w, b = conv
        gamma, beta, mean, var = bn
        hp = jnp.pad(h, ((0, 0), (0, 0), (1, 1), (1, 1)), mode="reflect")
        wk = jnp.transpose(w, (3, 2, 0, 1))           # (Cout, Cin, kh, kw)
        y = jax.lax.conv_general_dilated(
            hp, wk, (1, 1), "VALID",
            dimension_numbers=("NCHW", "OIHW", "NCHW"))
        y = jnp.maximum(y + b[None, :, None, None], 0.0)
        scale = gamma * jax.lax.rsqrt(var + BN_EPS)
        shift = beta - mean * scale
        return y * scale[None, :, None, None] + shift[None, :, None, None]

    h = conv_block(x, params["conv1"], params["bn1"])
    h = conv_block(h, params["conv2"], params["bn2"])
    h = conv_block(h, params["conv3"], params["bn3"])
    f = h.reshape(h.shape[0], -1)                     # PyTorch NCHW flatten
    w1, b1 = params["fc1"]
    w2, b2 = params["fc2"]
    w3, b3 = params["fc3"]
    f = jnp.maximum(f @ w1 + b1, 0.0)
    f = jnp.maximum(f @ w2 + b2, 0.0)
    return f @ w3 + b3


# ----------------------------------------------------------------------------
if __name__ == "__main__":
    key = jax.random.PRNGKey(0)
    k_params, k_x1, k_x2 = jax.random.split(key, 3)

    params = init_params(k_params, IMAGE_SIZE)
    kparams = prepare_params(params, IMAGE_SIZE)

    x1 = jax.random.normal(k_x1, (BATCH, 1, IMAGE_SIZE, IMAGE_SIZE), jnp.float32)
    x2 = jax.random.normal(k_x2, (BATCH, 1, IMAGE_SIZE, IMAGE_SIZE), jnp.float32)

    out1, out2 = siamese_forward(x1, x2, kparams)
    out1, out2 = jax.block_until_ready((out1, out2))

    assert out1.shape == (BATCH, NUM_CLASSES) and out2.shape == (BATCH, NUM_CLASSES)
    assert bool(jnp.all(jnp.isfinite(out1))) and bool(jnp.all(jnp.isfinite(out2)))

    # Validate against the XLA reference (FC weights are bf16 in the kernel,
    # hence the loose tolerance).
    ref1 = _reference_forward_once(x1, params)
    ref2 = _reference_forward_once(x2, params)
    np.testing.assert_allclose(np.asarray(out1), np.asarray(ref1), rtol=1e-1, atol=1e-1)
    np.testing.assert_allclose(np.asarray(out2), np.asarray(ref2), rtol=1e-1, atol=1e-1)

    print("KERNEL_OK")
</pallas_src>

<mosaic_0001>
module attributes {stable_mosaic.version = 11 : i64} {
  func.func @_siamese_kernel(%arg0: memref<2x16x16xf32, #tpu.memory_space<vmem>>, %arg1: memref<2x16x16xf32, #tpu.memory_space<vmem>>, %arg2: memref<3x16x64xf32, #tpu.memory_space<vmem>>, %arg3: memref<3x64xf32, #tpu.memory_space<vmem>>, %arg4: memref<3x64x128xf32, #tpu.memory_space<vmem>>, %arg5: memref<3x128xf32, #tpu.memory_space<vmem>>, %arg6: memref<3x128x128xf32, #tpu.memory_space<vmem>>, %arg7: memref<3x128xf32, #tpu.memory_space<vmem>>, %arg8: memref<16x128x512xbf16, #tpu.memory_space<vmem>>, %arg9: memref<1x512xf32, #tpu.memory_space<vmem>>, %arg10: memref<512x512xbf16, #tpu.memory_space<vmem>>, %arg11: memref<1x512xf32, #tpu.memory_space<vmem>>, %arg12: memref<512x128xbf16, #tpu.memory_space<vmem>>, %arg13: memref<1x128xf32, #tpu.memory_space<vmem>>, %arg14: memref<4x128xf32, #tpu.memory_space<vmem>>) attributes {dimension_semantics = [], scalar_prefetch = 0 : i64, scratch_operands = 0 : i64, tpu.core_type = #tpu.core_type<tc>} {
    %c0 = arith.constant 0 : index
    %c0_0 = arith.constant 0 : index
    %c0_1 = arith.constant 0 : index
    %0 = vector.load %arg0[%c0, %c0_0, %c0_1] : memref<2x16x16xf32, #tpu.memory_space<vmem>>, vector<2x16x16xf32>
    %c0_2 = arith.constant 0 : index
    %c0_3 = arith.constant 0 : index
    %c0_4 = arith.constant 0 : index
    %1 = vector.load %arg1[%c0_2, %c0_3, %c0_4] : memref<2x16x16xf32, #tpu.memory_space<vmem>>, vector<2x16x16xf32>
    %2 = tpu.concatenate %0, %1 in 0 : vector<2x16x16xf32>, vector<2x16x16xf32> -> vector<4x16x16xf32>
    %3 = vector.extract_strided_slice %2 {offsets = [0, 1, 0], sizes = [4, 1, 16], strides = [1, 1, 1]} : vector<4x16x16xf32> to vector<4x1x16xf32>
    %4 = vector.extract_strided_slice %2 {offsets = [0, 14, 0], sizes = [4, 1, 16], strides = [1, 1, 1]} : vector<4x16x16xf32> to vector<4x1x16xf32>
    %5 = tpu.concatenate %3, %2, %4 in 1 : vector<4x1x16xf32>, vector<4x16x16xf32>, vector<4x1x16xf32> -> vector<4x18x16xf32>
    %cst = arith.constant 0.000000e+00 : f32
    %6 = vector.broadcast %cst : f32 to vector<64x64xf32>
    %7 = vector.extract_strided_slice %5 {offsets = [0, 0, 0], sizes = [4, 16, 16], strides = [1, 1, 1]} : vector<4x18x16xf32> to vector<4x16x16xf32>
    %8 = vector.shape_cast %7 : vector<4x16x16xf32> to vector<64x16xf32>
    %c0_5 = arith.constant 0 : index
    %c0_6 = arith.constant 0 : index
    %c0_7 = arith.constant 0 : index
    %9 = vector.load %arg2[%c0_5, %c0_6, %c0_7] : memref<3x16x64xf32, #tpu.memory_space<vmem>>, vector<1x16x64xf32>
    %10 = vector.shape_cast %9 : vector<1x16x64xf32> to vector<16x64xf32>
    %cst_8 = arith.constant dense<0.000000e+00> : vector<64x64xf32>
    %11 = tpu.matmul %8, %10, %cst_8 {dimension_numbers = #tpu.dot_dimension_numbers<[1], [0], [0], [1], [0, 0, 1, 1], [], []>} : vector<64x16xf32>, vector<16x64xf32>, vector<64x64xf32> -> vector<64x64xf32>
    %12 = arith.addf %6, %11 : vector<64x64xf32>
    %13 = vector.extract_strided_slice %5 {offsets = [0, 1, 0], sizes = [4, 16, 16], strides = [1, 1, 1]} : vector<4x18x16xf32> to vector<4x16x16xf32>
    %14 = vector.shape_cast %13 : vector<4x16x16xf32> to vector<64x16xf32>
    %c1 = arith.constant 1 : index
    %c0_9 = arith.constant 0 : index
    %c0_10 = arith.constant 0 : index
    %15 = vector.load %arg2[%c1, %c0_9, %c0_10] : memref<3x16x64xf32, #tpu.memory_space<vmem>>, vector<1x16x64xf32>
    %16 = vector.shape_cast %15 : vector<1x16x64xf32> to vector<16x64xf32>
    %cst_11 = arith.constant dense<0.000000e+00> : vector<64x64xf32>
    %17 = tpu.matmul %14, %16, %cst_11 {dimension_numbers = #tpu.dot_dimension_numbers<[1], [0], [0], [1], [0, 0, 1, 1], [], []>} : vector<64x16xf32>, vector<16x64xf32>, vector<64x64xf32> -> vector<64x64xf32>
    %18 = arith.addf %12, %17 : vector<64x64xf32>
    %19 = vector.extract_strided_slice %5 {offsets = [0, 2, 0], sizes = [4, 16, 16], strides = [1, 1, 1]} : vector<4x18x16xf32> to vector<4x16x16xf32>
    %20 = vector.shape_cast %19 : vector<4x16x16xf32> to vector<64x16xf32>
    %c2 = arith.constant 2 : index
    %c0_12 = arith.constant 0 : index
    %c0_13 = arith.constant 0 : index
    %21 = vector.load %arg2[%c2, %c0_12, %c0_13] : memref<3x16x64xf32, #tpu.memory_space<vmem>>, vector<1x16x64xf32>
    %22 = vector.shape_cast %21 : vector<1x16x64xf32> to vector<16x64xf32>
    %cst_14 = arith.constant dense<0.000000e+00> : vector<64x64xf32>
    %23 = tpu.matmul %20, %22, %cst_14 {dimension_numbers = #tpu.dot_dimension_numbers<[1], [0], [0], [1], [0, 0, 1, 1], [], []>} : vector<64x16xf32>, vector<16x64xf32>, vector<64x64xf32> -> vector<64x64xf32>
    %24 = arith.addf %18, %23 : vector<64x64xf32>
    %c0_15 = arith.constant 0 : index
    %c0_16 = arith.constant 0 : index
    %25 = vector.load %arg3[%c0_15, %c0_16] : memref<3x64xf32, #tpu.memory_space<vmem>>, vector<1x64xf32>
    %c1_17 = arith.constant 1 : index
    %c0_18 = arith.constant 0 : index
    %26 = vector.load %arg3[%c1_17, %c0_18] : memref<3x64xf32, #tpu.memory_space<vmem>>, vector<1x64xf32>
    %c2_19 = arith.constant 2 : index
    %c0_20 = arith.constant 0 : index
    %27 = vector.load %arg3[%c2_19, %c0_20] : memref<3x64xf32, #tpu.memory_space<vmem>>, vector<1x64xf32>
    %28 = vector.broadcast %25 : vector<1x64xf32> to vector<64x64xf32>
    %29 = arith.addf %24, %28 : vector<64x64xf32>
    %cst_21 = arith.constant 0.000000e+00 : f32
    %30 = vector.broadcast %cst_21 : f32 to vector<64x64xf32>
    %31 = arith.maximumf %29, %30 : vector<64x64xf32>
    %32 = vector.broadcast %26 : vector<1x64xf32> to vector<64x64xf32>
    %33 = arith.mulf %31, %32 : vector<64x64xf32>
    %34 = vector.broadcast %27 : vector<1x64xf32> to vector<64x64xf32>
    %35 = arith.addf %33, %34 : vector<64x64xf32>
    %36 = vector.shape_cast %35 : vector<64x64xf32> to vector<4x16x64xf32>
    %37 = vector.extract_strided_slice %36 {offsets = [0, 1, 0], sizes = [4, 1, 64], strides = [1, 1, 1]} : vector<4x16x64xf32> to vector<4x1x64xf32>
    %38 = vector.extract_strided_slice %36 {offsets = [0, 14, 0], sizes = [4, 1, 64], strides = [1, 1, 1]} : vector<4x16x64xf32> to vector<4x1x64xf32>
    %39 = tpu.concatenate %37, %36, %38 in 1 : vector<4x1x64xf32>, vector<4x16x64xf32>, vector<4x1x64xf32> -> vector<4x18x64xf32>
    %cst_22 = arith.constant 0.000000e+00 : f32
    %40 = vector.broadcast %cst_22 : f32 to vector<64x128xf32>
    %41 = vector.extract_strided_slice %39 {offsets = [0, 0, 0], sizes = [4, 16, 64], strides = [1, 1, 1]} : vector<4x18x64xf32> to vector<4x16x64xf32>
    %42 = vector.shape_cast %41 : vector<4x16x64xf32> to vector<64x64xf32>
    %c0_23 = arith.constant 0 : index
    %c0_24 = arith.constant 0 : index
    %c0_25 = arith.constant 0 : index
    %43 = vector.load %arg4[%c0_23, %c0_24, %c0_25] : memref<3x64x128xf32, #tpu.memory_space<vmem>>, vector<1x64x128xf32>
    %44 = vector.shape_cast %43 : vector<1x64x128xf32> to vector<64x128xf32>
    %cst_26 = arith.constant dense<0.000000e+00> : vector<64x128xf32>
    %45 = tpu.matmul %42, %44, %cst_26 {dimension_numbers = #tpu.dot_dimension_numbers<[1], [0], [0], [1], [0, 0, 1, 1], [], []>} : vector<64x64xf32>, vector<64x128xf32>, vector<64x128xf32> -> vector<64x128xf32>
    %46 = arith.addf %40, %45 : vector<64x128xf32>
    %47 = vector.extract_strided_slice %39 {offsets = [0, 1, 0], sizes = [4, 16, 64], strides = [1, 1, 1]} : vector<4x18x64xf32> to vector<4x16x64xf32>
    %48 = vector.shape_cast %47 : vector<4x16x64xf32> to vector<64x64xf32>
    %c1_27 = arith.constant 1 : index
    %c0_28 = arith.constant 0 : index
    %c0_29 = arith.constant 0 : index
    %49 = vector.load %arg4[%c1_27, %c0_28, %c0_29] : memref<3x64x128xf32, #tpu.memory_space<vmem>>, vector<1x64x128xf32>
    %50 = vector.shape_cast %49 : vector<1x64x128xf32> to vector<64x128xf32>
    %cst_30 = arith.constant dense<0.000000e+00> : vector<64x128xf32>
    %51 = tpu.matmul %48, %50, %cst_30 {dimension_numbers = #tpu.dot_dimension_numbers<[1], [0], [0], [1], [0, 0, 1, 1], [], []>} : vector<64x64xf32>, vector<64x128xf32>, vector<64x128xf32> -> vector<64x128xf32>
    %52 = arith.addf %46, %51 : vector<64x128xf32>
    %53 = vector.extract_strided_slice %39 {offsets = [0, 2, 0], sizes = [4, 16, 64], strides = [1, 1, 1]} : vector<4x18x64xf32> to vector<4x16x64xf32>
    %54 = vector.shape_cast %53 : vector<4x16x64xf32> to vector<64x64xf32>
    %c2_31 = arith.constant 2 : index
    %c0_32 = arith.constant 0 : index
    %c0_33 = arith.constant 0 : index
    %55 = vector.load %arg4[%c2_31, %c0_32, %c0_33] : memref<3x64x128xf32, #tpu.memory_space<vmem>>, vector<1x64x128xf32>
    %56 = vector.shape_cast %55 : vector<1x64x128xf32> to vector<64x128xf32>
    %cst_34 = arith.constant dense<0.000000e+00> : vector<64x128xf32>
    %57 = tpu.matmul %54, %56, %cst_34 {dimension_numbers = #tpu.dot_dimension_numbers<[1], [0], [0], [1], [0, 0, 1, 1], [], []>} : vector<64x64xf32>, vector<64x128xf32>, vector<64x128xf32> -> vector<64x128xf32>
    %58 = arith.addf %52, %57 : vector<64x128xf32>
    %c0_35 = arith.constant 0 : index
    %c0_36 = arith.constant 0 : index
    %59 = vector.load %arg5[%c0_35, %c0_36] : memref<3x128xf32, #tpu.memory_space<vmem>>, vector<1x128xf32>
    %c1_37 = arith.constant 1 : index
    %c0_38 = arith.constant 0 : index
    %60 = vector.load %arg5[%c1_37, %c0_38] : memref<3x128xf32, #tpu.memory_space<vmem>>, vector<1x128xf32>
    %c2_39 = arith.constant 2 : index
    %c0_40 = arith.constant 0 : index
    %61 = vector.load %arg5[%c2_39, %c0_40] : memref<3x128xf32, #tpu.memory_space<vmem>>, vector<1x128xf32>
    %62 = vector.broadcast %59 : vector<1x128xf32> to vector<64x128xf32>
    %63 = arith.addf %58, %62 : vector<64x128xf32>
    %cst_41 = arith.constant 0.000000e+00 : f32
    %64 = vector.broadcast %cst_41 : f32 to vector<64x128xf32>
    %65 = arith.maximumf %63, %64 : vector<64x128xf32>
    %66 = vector.broadcast %60 : vector<1x128xf32> to vector<64x128xf32>
    %67 = arith.mulf %65, %66 : vector<64x128xf32>
    %68 = vector.broadcast %61 : vector<1x128xf32> to vector<64x128xf32>
    %69 = arith.addf %67, %68 : vector<64x128xf32>
    %70 = vector.shape_cast %69 : vector<64x128xf32> to vector<4x16x128xf32>
    %71 = vector.extract_strided_slice %70 {offsets = [0, 1, 0], sizes = [4, 1, 128], strides = [1, 1, 1]} : vector<4x16x128xf32> to vector<4x1x128xf32>
    %72 = vector.extract_strided_slice %70 {offsets = [0, 14, 0], sizes = [4, 1, 128], strides = [1, 1, 1]} : vector<4x16x128xf32> to vector<4x1x128xf32>
    %73 = tpu.concatenate %71, %70, %72 in 1 : vector<4x1x128xf32>, vector<4x16x128xf32>, vector<4x1x128xf32> -> vector<4x18x128xf32>
    %cst_42 = arith.constant 0.000000e+00 : f32
    %74 = vector.broadcast %cst_42 : f32 to vector<64x128xf32>
    %75 = vector.extract_strided_slice %73 {offsets = [0, 0, 0], sizes = [4, 16, 128], strides = [1, 1, 1]} : vector<4x18x128xf32> to vector<4x16x128xf32>
    %76 = vector.shape_cast %75 : vector<4x16x128xf32> to vector<64x128xf32>
    %c0_43 = arith.constant 0 : index
    %c0_44 = arith.constant 0 : index
    %c0_45 = arith.constant 0 : index
    %77 = vector.load %arg6[%c0_43, %c0_44, %c0_45] : memref<3x128x128xf32, #tpu.memory_space<vmem>>, vector<1x128x128xf32>
    %78 = vector.shape_cast %77 : vector<1x128x128xf32> to vector<128x128xf32>
    %cst_46 = arith.constant dense<0.000000e+00> : vector<64x128xf32>
    %79 = tpu.matmul %76, %78, %cst_46 {dimension_numbers = #tpu.dot_dimension_numbers<[1], [0], [0], [1], [0, 0, 1, 1], [], []>} : vector<64x128xf32>, vector<128x128xf32>, vector<64x128xf32> -> vector<64x128xf32>
    %80 = arith.addf %74, %79 : vector<64x128xf32>
    %81 = vector.extract_strided_slice %73 {offsets = [0, 1, 0], sizes = [4, 16, 128], strides = [1, 1, 1]} : vector<4x18x128xf32> to vector<4x16x128xf32>
    %82 = vector.shape_cast %81 : vector<4x16x128xf32> to vector<64x128xf32>
    %c1_47 = arith.constant 1 : index
    %c0_48 = arith.constant 0 : index
    %c0_49 = arith.constant 0 : index
    %83 = vector.load %arg6[%c1_47, %c0_48, %c0_49] : memref<3x128x128xf32, #tpu.memory_space<vmem>>, vector<1x128x128xf32>
    %84 = vector.shape_cast %83 : vector<1x128x128xf32> to vector<128x128xf32>
    %cst_50 = arith.constant dense<0.000000e+00> : vector<64x128xf32>
    %85 = tpu.matmul %82, %84, %cst_50 {dimension_numbers = #tpu.dot_dimension_numbers<[1], [0], [0], [1], [0, 0, 1, 1], [], []>} : vector<64x128xf32>, vector<128x128xf32>, vector<64x128xf32> -> vector<64x128xf32>
    %86 = arith.addf %80, %85 : vector<64x128xf32>
    %87 = vector.extract_strided_slice %73 {offsets = [0, 2, 0], sizes = [4, 16, 128], strides = [1, 1, 1]} : vector<4x18x128xf32> to vector<4x16x128xf32>
    %88 = vector.shape_cast %87 : vector<4x16x128xf32> to vector<64x128xf32>
    %c2_51 = arith.constant 2 : index
    %c0_52 = arith.constant 0 : index
    %c0_53 = arith.constant 0 : index
    %89 = vector.load %arg6[%c2_51, %c0_52, %c0_53] : memref<3x128x128xf32, #tpu.memory_space<vmem>>, vector<1x128x128xf32>
    %90 = vector.shape_cast %89 : vector<1x128x128xf32> to vector<128x128xf32>
    %cst_54 = arith.constant dense<0.000000e+00> : vector<64x128xf32>
    %91 = tpu.matmul %88, %90, %cst_54 {dimension_numbers = #tpu.dot_dimension_numbers<[1], [0], [0], [1], [0, 0, 1, 1], [], []>} : vector<64x128xf32>, vector<128x128xf32>, vector<64x128xf32> -> vector<64x128xf32>
    %92 = arith.addf %86, %91 : vector<64x128xf32>
    %c0_55 = arith.constant 0 : index
    %c0_56 = arith.constant 0 : index
    %93 = vector.load %arg7[%c0_55, %c0_56] : memref<3x128xf32, #tpu.memory_space<vmem>>, vector<1x128xf32>
    %c1_57 = arith.constant 1 : index
    %c0_58 = arith.constant 0 : index
    %94 = vector.load %arg7[%c1_57, %c0_58] : memref<3x128xf32, #tpu.memory_space<vmem>>, vector<1x128xf32>
    %c2_59 = arith.constant 2 : index
    %c0_60 = arith.constant 0 : index
    %95 = vector.load %arg7[%c2_59, %c0_60] : memref<3x128xf32, #tpu.memory_space<vmem>>, vector<1x128xf32>
    %96 = vector.broadcast %93 : vector<1x128xf32> to vector<64x128xf32>
    %97 = arith.addf %92, %96 : vector<64x128xf32>
    %cst_61 = arith.constant 0.000000e+00 : f32
    %98 = vector.broadcast %cst_61 : f32 to vector<64x128xf32>
    %99 = arith.maximumf %97, %98 : vector<64x128xf32>
    %100 = vector.broadcast %94 : vector<1x128xf32> to vector<64x128xf32>
    %101 = arith.mulf %99, %100 : vector<64x128xf32>
    %102 = vector.broadcast %95 : vector<1x128xf32> to vector<64x128xf32>
    %103 = arith.addf %101, %102 : vector<64x128xf32>
    %104 = vector.shape_cast %103 : vector<64x128xf32> to vector<4x16x128xf32>
    %105 = arith.truncf %104 : vector<4x16x128xf32> to vector<4x16x128xbf16>
    %cst_62 = arith.constant 0.000000e+00 : f32
    %106 = vector.broadcast %cst_62 : f32 to vector<4x512xf32>
    %107 = vector.extract_strided_slice %105 {offsets = [0, 0, 0], sizes = [4, 1, 128], strides = [1, 1, 1]} : vector<4x16x128xbf16> to vector<4x1x128xbf16>
    %108 = vector.shape_cast %107 : vector<4x1x128xbf16> to vector<4x128xbf16>
    %c0_63 = arith.constant 0 : index
    %c0_64 = arith.constant 0 : index
    %c0_65 = arith.constant 0 : index
    %109 = vector.load %arg8[%c0_63, %c0_64, %c0_65] : memref<16x128x512xbf16, #tpu.memory_space<vmem>>, vector<1x128x512xbf16>
    %110 = vector.shape_cast %109 : vector<1x128x512xbf16> to vector<128x512xbf16>
    %cst_66 = arith.constant dense<0.000000e+00> : vector<4x512xf32>
    %111 = tpu.matmul %108, %110, %cst_66 {dimension_numbers = #tpu.dot_dimension_numbers<[1], [0], [0], [1], [0, 0, 1, 1], [], []>} : vector<4x128xbf16>, vector<128x512xbf16>, vector<4x512xf32> -> vector<4x512xf32>
    %112 = arith.addf %106, %111 : vector<4x512xf32>
    %113 = vector.extract_strided_slice %105 {offsets = [0, 1, 0], sizes = [4, 1, 128], strides = [1, 1, 1]} : vector<4x16x128xbf16> to vector<4x1x128xbf16>
    %114 = vector.shape_cast %113 : vector<4x1x128xbf16> to vector<4x128xbf16>
    %c1_67 = arith.constant 1 : index
    %c0_68 = arith.constant 0 : index
    %c0_69 = arith.constant 0 : index
    %115 = vector.load %arg8[%c1_67, %c0_68, %c0_69] : memref<16x128x512xbf16, #tpu.memory_space<vmem>>, vector<1x128x512xbf16>
    %116 = vector.shape_cast %115 : vector<1x128x512xbf16> to vector<128x512xbf16>
    %cst_70 = arith.constant dense<0.000000e+00> : vector<4x512xf32>
    %117 = tpu.matmul %114, %116, %cst_70 {dimension_numbers = #tpu.dot_dimension_numbers<[1], [0], [0], [1], [0, 0, 1, 1], [], []>} : vector<4x128xbf16>, vector<128x512xbf16>, vector<4x512xf32> -> vector<4x512xf32>
    %118 = arith.addf %112, %117 : vector<4x512xf32>
    %119 = vector.extract_strided_slice %105 {offsets = [0, 2, 0], sizes = [4, 1, 128], strides = [1, 1, 1]} : vector<4x16x128xbf16> to vector<4x1x128xbf16>
    %120 = vector.shape_cast %119 : vector<4x1x128xbf16> to vector<4x128xbf16>
    %c2_71 = arith.constant 2 : index
    %c0_72 = arith.constant 0 : index
    %c0_73 = arith.constant 0 : index
    %121 = vector.load %arg8[%c2_71, %c0_72, %c0_73] : memref<16x128x512xbf16, #tpu.memory_space<vmem>>, vector<1x128x512xbf16>
    %122 = vector.shape_cast %121 : vector<1x128x512xbf16> to vector<128x512xbf16>
    %cst_74 = arith.constant dense<0.000000e+00> : vector<4x512xf32>
    %123 = tpu.matmul %120, %122, %cst_74 {dimension_numbers = #tpu.dot_dimension_numbers<[1], [0], [0], [1], [0, 0, 1, 1], [], []>} : vector<4x128xbf16>, vector<128x512xbf16>, vector<4x512xf32> -> vector<4x512xf32>
    %124 = arith.addf %118, %123 : vector<4x512xf32>
    %125 = vector.extract_strided_slice %105 {offsets = [0, 3, 0], sizes = [4, 1, 128], strides = [1, 1, 1]} : vector<4x16x128xbf16> to vector<4x1x128xbf16>
    %126 = vector.shape_cast %125 : vector<4x1x128xbf16> to vector<4x128xbf16>
    %c3 = arith.constant 3 : index
    %c0_75 = arith.constant 0 : index
    %c0_76 = arith.constant 0 : index
    %127 = vector.load %arg8[%c3, %c0_75, %c0_76] : memref<16x128x512xbf16, #tpu.memory_space<vmem>>, vector<1x128x512xbf16>
    %128 = vector.shape_cast %127 : vector<1x128x512xbf16> to vector<128x512xbf16>
    %cst_77 = arith.constant dense<0.000000e+00> : vector<4x512xf32>
    %129 = tpu.matmul %126, %128, %cst_77 {dimension_numbers = #tpu.dot_dimension_numbers<[1], [0], [0], [1], [0, 0, 1, 1], [], []>} : vector<4x128xbf16>, vector<128x512xbf16>, vector<4x512xf32> -> vector<4x512xf32>
    %130 = arith.addf %124, %129 : vector<4x512xf32>
    %131 = vector.extract_strided_slice %105 {offsets = [0, 4, 0], sizes = [4, 1, 128], strides = [1, 1, 1]} : vector<4x16x128xbf16> to vector<4x1x128xbf16>
    %132 = vector.shape_cast %131 : vector<4x1x128xbf16> to vector<4x128xbf16>
    %c4 = arith.constant 4 : index
    %c0_78 = arith.constant 0 : index
    %c0_79 = arith.constant 0 : index
    %133 = vector.load %arg8[%c4, %c0_78, %c0_79] : memref<16x128x512xbf16, #tpu.memory_space<vmem>>, vector<1x128x512xbf16>
    %134 = vector.shape_cast %133 : vector<1x128x512xbf16> to vector<128x512xbf16>
    %cst_80 = arith.constant dense<0.000000e+00> : vector<4x512xf32>
    %135 = tpu.matmul %132, %134, %cst_80 {dimension_numbers = #tpu.dot_dimension_numbers<[1], [0], [0], [1], [0, 0, 1, 1], [], []>} : vector<4x128xbf16>, vector<128x512xbf16>, vector<4x512xf32> -> vector<4x512xf32>
    %136 = arith.addf %130, %135 : vector<4x512xf32>
    %137 = vector.extract_strided_slice %105 {offsets = [0, 5, 0], sizes = [4, 1, 128], strides = [1, 1, 1]} : vector<4x16x128xbf16> to vector<4x1x128xbf16>
    %138 = vector.shape_cast %137 : vector<4x1x128xbf16> to vector<4x128xbf16>
    %c5 = arith.constant 5 : index
    %c0_81 = arith.constant 0 : index
    %c0_82 = arith.constant 0 : index
    %139 = vector.load %arg8[%c5, %c0_81, %c0_82] : memref<16x128x512xbf16, #tpu.memory_space<vmem>>, vector<1x128x512xbf16>
    %140 = vector.shape_cast %139 : vector<1x128x512xbf16> to vector<128x512xbf16>
    %cst_83 = arith.constant dense<0.000000e+00> : vector<4x512xf32>
    %141 = tpu.matmul %138, %140, %cst_83 {dimension_numbers = #tpu.dot_dimension_numbers<[1], [0], [0], [1], [0, 0, 1, 1], [], []>} : vector<4x128xbf16>, vector<128x512xbf16>, vector<4x512xf32> -> vector<4x512xf32>
    %142 = arith.addf %136, %141 : vector<4x512xf32>
    %143 = vector.extract_strided_slice %105 {offsets = [0, 6, 0], sizes = [4, 1, 128], strides = [1, 1, 1]} : vector<4x16x128xbf16> to vector<4x1x128xbf16>
    %144 = vector.shape_cast %143 : vector<4x1x128xbf16> to vector<4x128xbf16>
    %c6 = arith.constant 6 : index
    %c0_84 = arith.constant 0 : index
    %c0_85 = arith.constant 0 : index
    %145 = vector.load %arg8[%c6, %c0_84, %c0_85] : memref<16x128x512xbf16, #tpu.memory_space<vmem>>, vector<1x128x512xbf16>
    %146 = vector.shape_cast %145 : vector<1x128x512xbf16> to vector<128x512xbf16>
    %cst_86 = arith.constant dense<0.000000e+00> : vector<4x512xf32>
    %147 = tpu.matmul %144, %146, %cst_86 {dimension_numbers = #tpu.dot_dimension_numbers<[1], [0], [0], [1], [0, 0, 1, 1], [], []>} : vector<4x128xbf16>, vector<128x512xbf16>, vector<4x512xf32> -> vector<4x512xf32>
    %148 = arith.addf %142, %147 : vector<4x512xf32>
    %149 = vector.extract_strided_slice %105 {offsets = [0, 7, 0], sizes = [4, 1, 128], strides = [1, 1, 1]} : vector<4x16x128xbf16> to vector<4x1x128xbf16>
    %150 = vector.shape_cast %149 : vector<4x1x128xbf16> to vector<4x128xbf16>
    %c7 = arith.constant 7 : index
    %c0_87 = arith.constant 0 : index
    %c0_88 = arith.constant 0 : index
    %151 = vector.load %arg8[%c7, %c0_87, %c0_88] : memref<16x128x512xbf16, #tpu.memory_space<vmem>>, vector<1x128x512xbf16>
    %152 = vector.shape_cast %151 : vector<1x128x512xbf16> to vector<128x512xbf16>
    %cst_89 = arith.constant dense<0.000000e+00> : vector<4x512xf32>
    %153 = tpu.matmul %150, %152, %cst_89 {dimension_numbers = #tpu.dot_dimension_numbers<[1], [0], [0], [1], [0, 0, 1, 1], [], []>} : vector<4x128xbf16>, vector<128x512xbf16>, vector<4x512xf32> -> vector<4x512xf32>
    %154 = arith.addf %148, %153 : vector<4x512xf32>
    %155 = vector.extract_strided_slice %105 {offsets = [0, 8, 0], sizes = [4, 1, 128], strides = [1, 1, 1]} : vector<4x16x128xbf16> to vector<4x1x128xbf16>
    %156 = vector.shape_cast %155 : vector<4x1x128xbf16> to vector<4x128xbf16>
    %c8 = arith.constant 8 : index
    %c0_90 = arith.constant 0 : index
    %c0_91 = arith.constant 0 : index
    %157 = vector.load %arg8[%c8, %c0_90, %c0_91] : memref<16x128x512xbf16, #tpu.memory_space<vmem>>, vector<1x128x512xbf16>
    %158 = vector.shape_cast %157 : vector<1x128x512xbf16> to vector<128x512xbf16>
    %cst_92 = arith.constant dense<0.000000e+00> : vector<4x512xf32>
    %159 = tpu.matmul %156, %158, %cst_92 {dimension_numbers = #tpu.dot_dimension_numbers<[1], [0], [0], [1], [0, 0, 1, 1], [], []>} : vector<4x128xbf16>, vector<128x512xbf16>, vector<4x512xf32> -> vector<4x512xf32>
    %160 = arith.addf %154, %159 : vector<4x512xf32>
    %161 = vector.extract_strided_slice %105 {offsets = [0, 9, 0], sizes = [4, 1, 128], strides = [1, 1, 1]} : vector<4x16x128xbf16> to vector<4x1x128xbf16>
    %162 = vector.shape_cast %161 : vector<4x1x128xbf16> to vector<4x128xbf16>
    %c9 = arith.constant 9 : index
    %c0_93 = arith.constant 0 : index
    %c0_94 = arith.constant 0 : index
    %163 = vector.load %arg8[%c9, %c0_93, %c0_94] : memref<16x128x512xbf16, #tpu.memory_space<vmem>>, vector<1x128x512xbf16>
    %164 = vector.shape_cast %163 : vector<1x128x512xbf16> to vector<128x512xbf16>
    %cst_95 = arith.constant dense<0.000000e+00> : vector<4x512xf32>
    %165 = tpu.matmul %162, %164, %cst_95 {dimension_numbers = #tpu.dot_dimension_numbers<[1], [0], [0], [1], [0, 0, 1, 1], [], []>} : vector<4x128xbf16>, vector<128x512xbf16>, vector<4x512xf32> -> vector<4x512xf32>
    %166 = arith.addf %160, %165 : vector<4x512xf32>
    %167 = vector.extract_strided_slice %105 {offsets = [0, 10, 0], sizes = [4, 1, 128], strides = [1, 1, 1]} : vector<4x16x128xbf16> to vector<4x1x128xbf16>
    %168 = vector.shape_cast %167 : vector<4x1x128xbf16> to vector<4x128xbf16>
    %c10 = arith.constant 10 : index
    %c0_96 = arith.constant 0 : index
    %c0_97 = arith.constant 0 : index
    %169 = vector.load %arg8[%c10, %c0_96, %c0_97] : memref<16x128x512xbf16, #tpu.memory_space<vmem>>, vector<1x128x512xbf16>
    %170 = vector.shape_cast %169 : vector<1x128x512xbf16> to vector<128x512xbf16>
    %cst_98 = arith.constant dense<0.000000e+00> : vector<4x512xf32>
    %171 = tpu.matmul %168, %170, %cst_98 {dimension_numbers = #tpu.dot_dimension_numbers<[1], [0], [0], [1], [0, 0, 1, 1], [], []>} : vector<4x128xbf16>, vector<128x512xbf16>, vector<4x512xf32> -> vector<4x512xf32>
    %172 = arith.addf %166, %171 : vector<4x512xf32>
    %173 = vector.extract_strided_slice %105 {offsets = [0, 11, 0], sizes = [4, 1, 128], strides = [1, 1, 1]} : vector<4x16x128xbf16> to vector<4x1x128xbf16>
    %174 = vector.shape_cast %173 : vector<4x1x128xbf16> to vector<4x128xbf16>
    %c11 = arith.constant 11 : index
    %c0_99 = arith.constant 0 : index
    %c0_100 = arith.constant 0 : index
    %175 = vector.load %arg8[%c11, %c0_99, %c0_100] : memref<16x128x512xbf16, #tpu.memory_space<vmem>>, vector<1x128x512xbf16>
    %176 = vector.shape_cast %175 : vector<1x128x512xbf16> to vector<128x512xbf16>
    %cst_101 = arith.constant dense<0.000000e+00> : vector<4x512xf32>
    %177 = tpu.matmul %174, %176, %cst_101 {dimension_numbers = #tpu.dot_dimension_numbers<[1], [0], [0], [1], [0, 0, 1, 1], [], []>} : vector<4x128xbf16>, vector<128x512xbf16>, vector<4x512xf32> -> vector<4x512xf32>
    %178 = arith.addf %172, %177 : vector<4x512xf32>
    %179 = vector.extract_strided_slice %105 {offsets = [0, 12, 0], sizes = [4, 1, 128], strides = [1, 1, 1]} : vector<4x16x128xbf16> to vector<4x1x128xbf16>
    %180 = vector.shape_cast %179 : vector<4x1x128xbf16> to vector<4x128xbf16>
    %c12 = arith.constant 12 : index
    %c0_102 = arith.constant 0 : index
    %c0_103 = arith.constant 0 : index
    %181 = vector.load %arg8[%c12, %c0_102, %c0_103] : memref<16x128x512xbf16, #tpu.memory_space<vmem>>, vector<1x128x512xbf16>
    %182 = vector.shape_cast %181 : vector<1x128x512xbf16> to vector<128x512xbf16>
    %cst_104 = arith.constant dense<0.000000e+00> : vector<4x512xf32>
    %183 = tpu.matmul %180, %182, %cst_104 {dimension_numbers = #tpu.dot_dimension_numbers<[1], [0], [0], [1], [0, 0, 1, 1], [], []>} : vector<4x128xbf16>, vector<128x512xbf16>, vector<4x512xf32> -> vector<4x512xf32>
    %184 = arith.addf %178, %183 : vector<4x512xf32>
    %185 = vector.extract_strided_slice %105 {offsets = [0, 13, 0], sizes = [4, 1, 128], strides = [1, 1, 1]} : vector<4x16x128xbf16> to vector<4x1x128xbf16>
    %186 = vector.shape_cast %185 : vector<4x1x128xbf16> to vector<4x128xbf16>
    %c13 = arith.constant 13 : index
    %c0_105 = arith.constant 0 : index
    %c0_106 = arith.constant 0 : index
    %187 = vector.load %arg8[%c13, %c0_105, %c0_106] : memref<16x128x512xbf16, #tpu.memory_space<vmem>>, vector<1x128x512xbf16>
    %188 = vector.shape_cast %187 : vector<1x128x512xbf16> to vector<128x512xbf16>
    %cst_107 = arith.constant dense<0.000000e+00> : vector<4x512xf32>
    %189 = tpu.matmul %186, %188, %cst_107 {dimension_numbers = #tpu.dot_dimension_numbers<[1], [0], [0], [1], [0, 0, 1, 1], [], []>} : vector<4x128xbf16>, vector<128x512xbf16>, vector<4x512xf32> -> vector<4x512xf32>
    %190 = arith.addf %184, %189 : vector<4x512xf32>
    %191 = vector.extract_strided_slice %105 {offsets = [0, 14, 0], sizes = [4, 1, 128], strides = [1, 1, 1]} : vector<4x16x128xbf16> to vector<4x1x128xbf16>
    %192 = vector.shape_cast %191 : vector<4x1x128xbf16> to vector<4x128xbf16>
    %c14 = arith.constant 14 : index
    %c0_108 = arith.constant 0 : index
    %c0_109 = arith.constant 0 : index
    %193 = vector.load %arg8[%c14, %c0_108, %c0_109] : memref<16x128x512xbf16, #tpu.memory_space<vmem>>, vector<1x128x512xbf16>
    %194 = vector.shape_cast %193 : vector<1x128x512xbf16> to vector<128x512xbf16>
    %cst_110 = arith.constant dense<0.000000e+00> : vector<4x512xf32>
    %195 = tpu.matmul %192, %194, %cst_110 {dimension_numbers = #tpu.dot_dimension_numbers<[1], [0], [0], [1], [0, 0, 1, 1], [], []>} : vector<4x128xbf16>, vector<128x512xbf16>, vector<4x512xf32> -> vector<4x512xf32>
    %196 = arith.addf %190, %195 : vector<4x512xf32>
    %197 = vector.extract_strided_slice %105 {offsets = [0, 15, 0], sizes = [4, 1, 128], strides = [1, 1, 1]} : vector<4x16x128xbf16> to vector<4x1x128xbf16>
    %198 = vector.shape_cast %197 : vector<4x1x128xbf16> to vector<4x128xbf16>
    %c15 = arith.constant 15 : index
    %c0_111 = arith.constant 0 : index
    %c0_112 = arith.constant 0 : index
    %199 = vector.load %arg8[%c15, %c0_111, %c0_112] : memref<16x128x512xbf16, #tpu.memory_space<vmem>>, vector<1x128x512xbf16>
    %200 = vector.shape_cast %199 : vector<1x128x512xbf16> to vector<128x512xbf16>
    %cst_113 = arith.constant dense<0.000000e+00> : vector<4x512xf32>
    %201 = tpu.matmul %198, %200, %cst_113 {dimension_numbers = #tpu.dot_dimension_numbers<[1], [0], [0], [1], [0, 0, 1, 1], [], []>} : vector<4x128xbf16>, vector<128x512xbf16>, vector<4x512xf32> -> vector<4x512xf32>
    %202 = arith.addf %196, %201 : vector<4x512xf32>
    %c0_114 = arith.constant 0 : index
    %c0_115 = arith.constant 0 : index
    %203 = vector.load %arg9[%c0_114, %c0_115] : memref<1x512xf32, #tpu.memory_space<vmem>>, vector<1x512xf32>
    %204 = vector.broadcast %203 : vector<1x512xf32> to vector<4x512xf32>
    %205 = arith.addf %202, %204 : vector<4x512xf32>
    %cst_116 = arith.constant 0.000000e+00 : f32
    %206 = vector.broadcast %cst_116 : f32 to vector<4x512xf32>
    %207 = arith.maximumf %205, %206 : vector<4x512xf32>
    %208 = arith.truncf %207 : vector<4x512xf32> to vector<4x512xbf16>
    %c0_117 = arith.constant 0 : index
    %c0_118 = arith.constant 0 : index
    %209 = vector.load %arg10[%c0_117, %c0_118] : memref<512x512xbf16, #tpu.memory_space<vmem>>, vector<512x512xbf16>
    %cst_119 = arith.constant dense<0.000000e+00> : vector<4x512xf32>
    %210 = tpu.matmul %208, %209, %cst_119 {dimension_numbers = #tpu.dot_dimension_numbers<[1], [0], [0], [1], [0, 0, 1, 1], [], []>} : vector<4x512xbf16>, vector<512x512xbf16>, vector<4x512xf32> -> vector<4x512xf32>
    %c0_120 = arith.constant 0 : index
    %c0_121 = arith.constant 0 : index
    %211 = vector.load %arg11[%c0_120, %c0_121] : memref<1x512xf32, #tpu.memory_space<vmem>>, vector<1x512xf32>
    %212 = vector.broadcast %211 : vector<1x512xf32> to vector<4x512xf32>
    %213 = arith.addf %210, %212 : vector<4x512xf32>
    %cst_122 = arith.constant 0.000000e+00 : f32
    %214 = vector.broadcast %cst_122 : f32 to vector<4x512xf32>
    %215 = arith.maximumf %213, %214 : vector<4x512xf32>
    %216 = arith.truncf %215 : vector<4x512xf32> to vector<4x512xbf16>
    %c0_123 = arith.constant 0 : index
    %c0_124 = arith.constant 0 : index
    %217 = vector.load %arg12[%c0_123, %c0_124] : memref<512x128xbf16, #tpu.memory_space<vmem>>, vector<512x128xbf16>
    %cst_125 = arith.constant dense<0.000000e+00> : vector<4x128xf32>
    %218 = tpu.matmul %216, %217, %cst_125 {dimension_numbers = #tpu.dot_dimension_numbers<[1], [0], [0], [1], [0, 0, 1, 1], [], []>} : vector<4x512xbf16>, vector<512x128xbf16>, vector<4x128xf32> -> vector<4x128xf32>
    %c0_126 = arith.constant 0 : index
    %c0_127 = arith.constant 0 : index
    %219 = vector.load %arg13[%c0_126, %c0_127] : memref<1x128xf32, #tpu.memory_space<vmem>>, vector<1x128xf32>
    %220 = vector.broadcast %219 : vector<1x128xf32> to vector<4x128xf32>
    %221 = arith.addf %218, %220 : vector<4x128xf32>
    %c0_128 = arith.constant 0 : index
    %c0_129 = arith.constant 0 : index
    %222 = vector.load %arg14[%c0_128, %c0_129] : memref<4x128xf32, #tpu.memory_space<vmem>>, vector<4x128xf32>
    tpu.vector_store %arg14[%c0_128, %c0_129], %221 {strides = array<i32>} : memref<4x128xf32, #tpu.memory_space<vmem>>, vector<4x128xf32>,
    return
  }
}

</mosaic_0001>

<bundles_post_ra>
// kernel: siamese_forward.1
= control target key start
LH: loop header
LB: loop body
LE: loop exit
PB: predicated region body
PF: predicated region fallthrough
CT: control target
= control target key end

     0   :  { %19 = vsyncpa [#allocation3], 0  ;;  %s11599_s0 = inlined_call_operand.hbm [shape: f32[2,16,16], index: 0, kind: input, shape index: {}]   ;;  %s11600_s1 = inlined_call_operand.hbm [shape: f32[2,16,16], index: 1, kind: input, shape index: {}]   ;;  %s11601_s2 = inlined_call_operand.hbm [shape: f32[3,16,64], index: 2, kind: input, shape index: {}]   ;;  %s11602_s3 = inlined_call_operand.hbm [shape: f32[3,64], index: 3, kind: input, shape index: {}]   ;;  %s11603_s4 = inlined_call_operand.hbm [shape: f32[3,64,128], index: 4, kind: input, shape index: {}]   ;;  %s11604_s5 = inlined_call_operand.hbm [shape: f32[3,128], index: 5, kind: input, shape index: {}]   ;;  %s11605_s6 = inlined_call_operand.hbm [shape: f32[3,128,128], index: 6, kind: input, shape index: {}]   ;;  %s11606_s7 = inlined_call_operand.hbm [shape: f32[3,128], index: 7, kind: input, shape index: {}]   ;;  %s11607_s8 = inlined_call_operand.hbm [shape: bf16[16,128,512], index: 8, kind: input, shape index: {}]   ;;  %s11608_s9 = inlined_call_operand.hbm [shape: f32[1,512], index: 9, kind: input, shape index: {}]   ;;  %s11609_s10 = inlined_call_operand.hbm [shape: bf16[512,512], index: 10, kind: input, shape index: {}]   ;;  %s11610_s11 = inlined_call_operand.hbm [shape: f32[1,512], index: 11, kind: input, shape index: {}]   ;;  %s11611_s12 = inlined_call_operand.hbm [shape: bf16[512,128], index: 12, kind: input, shape index: {}]   ;;  %s11612_s13 = inlined_call_operand.hbm [shape: f32[1,128], index: 13, kind: input, shape index: {}]   ;;  %s11613_s14 = inlined_call_operand.vmem [shape: f32[4,128], index: 14, kind: output, shape index: {}]  }
   0x1   :  { %20 = vsyncpa [#allocation5], 0 }
   0x2   :  { %21 = vsyncpa [#allocation8], 0 }
   0x3   :  { %22 = vsyncpa [#allocation11], 0 }
   0x4   :  { %23 = vsyncpa [#allocation14], 0 }
   0x5   :  { %24 = vsyncpa [#allocation17], 0 }
   0x6   :  { %25 = vsyncpa [#allocation20], 0 }
   0x7   :  { %26 = vsyncpa [#allocation23], 0  ;;  %s10552_s29 = smov [#allocation4]   ;;  %s10553_s15 = smov [#allocation7]  }
   0x8   :  { %s44_s30 = sshll.u32 %s10552_s29, 4  ;;  %s69_s16 = sshll.u32 %s10553_s15, 4  ;;  %s45_s30 = int_to_ptr.vmem [resolvable:$true] %s44_s30  ;;  %s70_s16 = int_to_ptr.vmem [resolvable:$true] %s69_s16 }
   0x9   :  { %s10228_s19 = scalar_lea.hbm %s11600_s1, 512 }
   0xa   :  { %p10229_p0 = scmp.ne.s32.totalorder %s11600_s1, %s10228_s19  ;;  %p10232_p1 = scmp.lt.u32.totalorder %s10228_s19, %s11600_s1 }
   0xc   :  { %p10234_p2 = pnand %p10232_p1, %p10229_p0 }
   0xe   :  { %10237 = shalt.err (!%p10234_p2)
}
   0xf   :  { %s10238_s24 = scalar_lea.vmem %s45_s30, 512  ;;  %p10243_p4 = scmp.lt.s32.totalorder %s45_s30, %s45_s30 }
  0x10   :  { %p10239_p3 = scmp.ne.s32.totalorder %s45_s30, %s10238_s24  ;;  %p10244_p5 = scmp.lt.s32.totalorder %s10238_s24, %s10238_s24 }
  0x12   :  { %p10245_p6 = por %p10244_p5, %p10243_p4 }
  0x14   :  { %p10246_p7 = pnand %p10245_p6, %p10239_p3 }
  0x16   :  { %10249 = shalt.err (!%p10246_p7)
}
  0x17   :  { %s10554_s25 = smov 128   ;;  %s10555_s26 = smov 8  }
  0x18   :  { %50 = dma.hbm_to_vmem [thread:$0]  %s11600_s1, 512, %s45_s30, [#allocation5], %s10554_s25, %s10554_s25, %s10555_s26  }
  0x19   :  { %s10250_s17 = scalar_lea.hbm %s11602_s3, 64 }
  0x1a   :  { %p10251_p8 = scmp.ne.s32.totalorder %s11602_s3, %s10250_s17  ;;  %p10254_p9 = scmp.lt.u32.totalorder %s10250_s17, %s11602_s3 }
  0x1c   :  { %p10256_p10 = pnand %p10254_p9, %p10251_p8 }
  0x1e   :  { %10259 = shalt.err (!%p10256_p10)
}
  0x1f   :  { %s10260_s22 = scalar_lea.vmem %s70_s16, 64  ;;  %p10265_p12 = scmp.lt.s32.totalorder %s70_s16, %s70_s16 }
  0x20   :  { %p10261_p11 = scmp.ne.s32.totalorder %s70_s16, %s10260_s22  ;;  %p10266_p13 = scmp.lt.s32.totalorder %s10260_s22, %s10260_s22 }
  0x22   :  { %p10267_p0 = por %p10266_p13, %p10265_p12 }
  0x24   :  { %p10268_p1 = pnand %p10267_p0, %p10261_p11 }
  0x26   :  { %10271 = shalt.err (!%p10268_p1)
}
  0x27   :  { %72 = dma.hbm_to_vmem [thread:$0]  %s11602_s3, 64, %s70_s16, [#allocation8]  }
  0x28   :  { %s10556_s23 = smov [#allocation10]   ;;  %s10557_s27 = smov [#allocation13]  }
  0x29   :  { %s91_s24 = sshll.u32 %s10556_s23, 4  ;;  %s113_s28 = sshll.u32 %s10557_s27, 4  ;;  %s92_s24 = int_to_ptr.vmem [resolvable:$true] %s91_s24  ;;  %s114_s28 = int_to_ptr.vmem [resolvable:$true] %s113_s28 }
  0x2a   :  { %s10272_s17 = scalar_lea.hbm %s11604_s5, 64 }
  0x2b   :  { %p10273_p2 = scmp.ne.s32.totalorder %s11604_s5, %s10272_s17  ;;  %p10276_p3 = scmp.lt.u32.totalorder %s10272_s17, %s11604_s5 }
  0x2d   :  { %p10278_p4 = pnand %p10276_p3, %p10273_p2 }
  0x2f   :  { %10281 = shalt.err (!%p10278_p4)
}
  0x30   :  { %s10282_s3 = scalar_lea.vmem %s92_s24, 64  ;;  %p10287_p6 = scmp.lt.s32.totalorder %s92_s24, %s92_s24 }
  0x31   :  { %p10283_p5 = scmp.ne.s32.totalorder %s92_s24, %s10282_s3  ;;  %p10288_p7 = scmp.lt.s32.totalorder %s10282_s3, %s10282_s3 }
  0x33   :  { %p10289_p8 = por %p10288_p7, %p10287_p6 }
  0x35   :  { %p10290_p9 = pnand %p10289_p8, %p10283_p5 }
  0x37   :  { %10293 = shalt.err (!%p10290_p9)
}
  0x38   :  { %94 = dma.hbm_to_vmem [thread:$0]  %s11604_s5, 64, %s92_s24, [#allocation11]  }
  0x39   :  { %s10294_s23 = scalar_lea.hbm %s11606_s7, 64 }
  0x3a   :  { %p10295_p10 = scmp.ne.s32.totalorder %s11606_s7, %s10294_s23  ;;  %p10298_p11 = scmp.lt.u32.totalorder %s10294_s23, %s11606_s7 }
  0x3c   :  { %p10300_p12 = pnand %p10298_p11, %p10295_p10 }
  0x3e   :  { %10303 = shalt.err (!%p10300_p12)
}
  0x3f   :  { %s10304_s18 = scalar_lea.vmem %s114_s28, 64  ;;  %p10309_p0 = scmp.lt.s32.totalorder %s114_s28, %s114_s28 }
  0x40   :  { %p10305_p13 = scmp.ne.s32.totalorder %s114_s28, %s10304_s18  ;;  %p10310_p1 = scmp.lt.s32.totalorder %s10304_s18, %s10304_s18 }
  0x42   :  { %p10311_p2 = por %p10310_p1, %p10309_p0 }
  0x44   :  { %p10312_p3 = pnand %p10311_p2, %p10305_p13 }
  0x46   :  { %10315 = shalt.err (!%p10312_p3)
}
  0x47   :  { %116 = dma.hbm_to_vmem [thread:$0]  %s11606_s7, 64, %s114_s28, [#allocation14]  }
  0x48   :  { %s10558_s19 = smov [#allocation16]   ;;  %s10559_s21 = smov [#allocation19]  }
  0x49   :  { %s135_s20 = sshll.u32 %s10558_s19, 4  ;;  %s157_s3 = sshll.u32 %s10559_s21, 4  ;;  %s136_s20 = int_to_ptr.vmem [resolvable:$true] %s135_s20  ;;  %s158_s3 = int_to_ptr.vmem [resolvable:$true] %s157_s3 }
  0x4a   :  { %s10316_s1 = scalar_lea.hbm %s11608_s9, 64 }
  0x4b   :  { %p10317_p4 = scmp.ne.s32.totalorder %s11608_s9, %s10316_s1  ;;  %p10320_p5 = scmp.lt.u32.totalorder %s10316_s1, %s11608_s9 }
  0x4d   :  { %p10322_p6 = pnand %p10320_p5, %p10317_p4 }
  0x4f   :  { %10325 = shalt.err (!%p10322_p6)
}
  0x50   :  { %s10326_s7 = scalar_lea.vmem %s136_s20, 64  ;;  %p10331_p8 = scmp.lt.s32.totalorder %s136_s20, %s136_s20 }
  0x51   :  { %p10327_p7 = scmp.ne.s32.totalorder %s136_s20, %s10326_s7  ;;  %p10332_p9 = scmp.lt.s32.totalorder %s10326_s7, %s10326_s7 }
  0x53   :  { %p10333_p10 = por %p10332_p9, %p10331_p8 }
  0x55   :  { %p10334_p11 = pnand %p10333_p10, %p10327_p7 }
  0x57   :  { %10337 = shalt.err (!%p10334_p11)
}
  0x58   :  { %138 = dma.hbm_to_vmem [thread:$0]  %s11608_s9, 64, %s136_s20, [#allocation17]  }
  0x59   :  { %s10338_s5 = scalar_lea.hbm %s11610_s11, 64 }
  0x5a   :  { %p10339_p12 = scmp.ne.s32.totalorder %s11610_s11, %s10338_s5  ;;  %p10342_p13 = scmp.lt.u32.totalorder %s10338_s5, %s11610_s11 }
  0x5c   :  { %p10344_p0 = pnand %p10342_p13, %p10339_p12 }
  0x5e   :  { %10347 = shalt.err (!%p10344_p0)
}
  0x5f   :  { %s10348_s22 = scalar_lea.vmem %s158_s3, 64  ;;  %p10353_p2 = scmp.lt.s32.totalorder %s158_s3, %s158_s3 }
  0x60   :  { %p10349_p1 = scmp.ne.s32.totalorder %s158_s3, %s10348_s22  ;;  %p10354_p3 = scmp.lt.s32.totalorder %s10348_s22, %s10348_s22 }
  0x62   :  { %p10355_p4 = por %p10354_p3, %p10353_p2 }
  0x64   :  { %p10356_p5 = pnand %p10355_p4, %p10349_p1 }
  0x66   :  { %10359 = shalt.err (!%p10356_p5)
}
  0x67   :  { %160 = dma.hbm_to_vmem [thread:$0]  %s11610_s11, 64, %s158_s3, [#allocation20]  }
  0x68   :  { %s10560_s1 = smov [#allocation2]   ;;  %s10561_s23 = smov [#allocation6]  }
  0x69   :  { %s32_s30 = sshll.u32 %s10560_s1, 4  ;;  %s56_s27 = sshll.u32 %s10561_s23, 4  ;;  %s33_s30 = int_to_ptr.vmem [resolvable:$true] %s32_s30  ;;  %s10723_s27 = int_to_ptr.vmem [resolvable:$true] %s56_s27 }
  0x6a   :  { %s10360_s28 = scalar_lea.hbm %s11599_s0, 512 }
  0x6b   :  { %p10361_p6 = scmp.ne.s32.totalorder %s11599_s0, %s10360_s28  ;;  %p10364_p7 = scmp.lt.u32.totalorder %s10360_s28, %s11599_s0 }
  0x6d   :  { %p10366_p8 = pnand %p10364_p7, %p10361_p6 }
  0x6f   :  { %10369 = shalt.err (!%p10366_p8)
}
  0x70   :  { %s10370_s11 = scalar_lea.vmem %s33_s30, 512  ;;  %p10375_p10 = scmp.lt.s32.totalorder %s33_s30, %s33_s30 }
  0x71   :  { %p10371_p9 = scmp.ne.s32.totalorder %s33_s30, %s10370_s11  ;;  %p10376_p11 = scmp.lt.s32.totalorder %s10370_s11, %s10370_s11 }
  0x73   :  { %p10377_p12 = por %p10376_p11, %p10375_p10 }
  0x75   :  { %p10378_p13 = pnand %p10377_p12, %p10371_p9 }
  0x77   :  { %10381 = shalt.err (!%p10378_p13)
}
  0x78   :  { %38 = dma.hbm_to_vmem [thread:$0]  %s11599_s0, 512, %s33_s30, [#allocation3], %s10554_s25, %s10554_s25, %s10555_s26  }
  0x79   :  { %s10382_s16 = scalar_lea.hbm %s11601_s2, 768 }
  0x7a   :  { %p10383_p0 = scmp.ne.s32.totalorder %s11601_s2, %s10382_s16  ;;  %p10386_p1 = scmp.lt.u32.totalorder %s10382_s16, %s11601_s2 }
  0x7c   :  { %p10388_p2 = pnand %p10386_p1, %p10383_p0 }
  0x7e   :  { %10391 = shalt.err (!%p10388_p2)
}
  0x7f   :  { %s10392_s23 = scalar_lea.vmem %s10723_s27, 768  ;;  %p10397_p4 = scmp.lt.s32.totalorder %s10723_s27, %s10723_s27 }
  0x80   :  { %p10393_p3 = scmp.ne.s32.totalorder %s10723_s27, %s10392_s23  ;;  %p10398_p5 = scmp.lt.s32.totalorder %s10392_s23, %s10392_s23 }
  0x82   :  { %p10399_p6 = por %p10398_p5, %p10397_p4 }
  0x84   :  { %p10400_p7 = pnand %p10399_p6, %p10393_p3 }
  0x86   :  { %10403 = shalt.err (!%p10400_p7)
}
  0x87   :  { %62 = dma.hbm_to_vmem [thread:$0]  %s11601_s2, 768, %s10723_s27, [#allocation5], %s10554_s25, %s10554_s25, %s10555_s26  }
  0x88   :  { %s10562_s29 = smov [#allocation9]   ;;  %s10563_s28 = smov [#allocation12]  }
  0x89   :  { %s78_s7 = sshll.u32 %s10562_s29, 4  ;;  %s100_s15 = sshll.u32 %s10563_s28, 4  ;;  %s79_s7 = int_to_ptr.vmem [resolvable:$true] %s78_s7  ;;  %s10760_s15 = int_to_ptr.vmem [resolvable:$true] %s100_s15 }
  0x8a   :  { %s10404_s5 = scalar_lea.hbm %s11603_s4, 3072 }
  0x8b   :  { %p10405_p8 = scmp.ne.s32.totalorder %s11603_s4, %s10404_s5  ;;  %p10408_p9 = scmp.lt.u32.totalorder %s10404_s5, %s11603_s4 }
  0x8d   :  { %p10410_p10 = pnand %p10408_p9, %p10405_p8 }
  0x8f   :  { %10413 = shalt.err (!%p10410_p10)
}
  0x90   :  { %s10414_s2 = scalar_lea.vmem %s79_s7, 3072  ;;  %p10419_p12 = scmp.lt.s32.totalorder %s79_s7, %s79_s7 }
  0x91   :  { %p10415_p11 = scmp.ne.s32.totalorder %s79_s7, %s10414_s2  ;;  %p10420_p13 = scmp.lt.s32.totalorder %s10414_s2, %s10414_s2 }
  0x93   :  { %p10421_p0 = por %p10420_p13, %p10419_p12 }
  0x95   :  { %p10422_p1 = pnand %p10421_p0, %p10415_p11 }
  0x97   :  { %10425 = shalt.err (!%p10422_p1)
}
  0x98   :  { %84 = dma.hbm_to_vmem [thread:$0]  %s11603_s4, 3072, %s79_s7, [#allocation8], %s10554_s25, %s10554_s25, %s10555_s26  }
  0x99   :  { %s10426_s9 = scalar_lea.hbm %s11605_s6, 6144 }
  0x9a   :  { %p10427_p2 = scmp.ne.s32.totalorder %s11605_s6, %s10426_s9  ;;  %p10430_p3 = scmp.lt.u32.totalorder %s10426_s9, %s11605_s6 }
  0x9c   :  { %p10432_p4 = pnand %p10430_p3, %p10427_p2 }
  0x9e   :  { %10435 = shalt.err (!%p10432_p4)
}
  0x9f   :  { %s10436_s30 = scalar_lea.vmem %s10760_s15, 6144  ;;  %p10441_p6 = scmp.lt.s32.totalorder %s10760_s15, %s10760_s15 }
  0xa0   :  { %p10437_p5 = scmp.ne.s32.totalorder %s10760_s15, %s10436_s30  ;;  %p10442_p7 = scmp.lt.s32.totalorder %s10436_s30, %s10436_s30 }
  0xa2   :  { %p10443_p8 = por %p10442_p7, %p10441_p6 }
  0xa4   :  { %p10444_p9 = pnand %p10443_p8, %p10437_p5 }
  0xa6   :  { %10447 = shalt.err (!%p10444_p9)
}
  0xa7   :  { %106 = dma.hbm_to_vmem [thread:$0]  %s11605_s6, 6144, %s10760_s15, [#allocation11], %s10554_s25, %s10554_s25, %s10555_s26  }
  0xa8   :  { %s10564_s7 = smov [#allocation15]   ;;  %s10448_s5 = scalar_lea.hbm %s11607_s8, 65536 }
  0xa9   :  { %s122_s28 = sshll.u32 %s10564_s7, 4  ;;  %p10449_p10 = scmp.ne.s32.totalorder %s11607_s8, %s10448_s5  ;;  %s123_s28 = int_to_ptr.vmem [resolvable:$true] %s122_s28 }
  0xaa   :  { %p10452_p11 = scmp.lt.u32.totalorder %s10448_s5, %s11607_s8 }
  0xac   :  { %p10454_p12 = pnand %p10452_p11, %p10449_p10 }
  0xae   :  { %10457 = shalt.err (!%p10454_p12)
}
  0xaf   :  { %s10458_s2 = scalar_lea.vmem %s123_s28, 65536  ;;  %p10463_p0 = scmp.lt.s32.totalorder %s123_s28, %s123_s28 }
  0xb0   :  { %p10459_p13 = scmp.ne.s32.totalorder %s123_s28, %s10458_s2  ;;  %p10464_p1 = scmp.lt.s32.totalorder %s10458_s2, %s10458_s2 }
  0xb2   :  { %p10465_p2 = por %p10464_p1, %p10463_p0 }
  0xb4   :  { %p10466_p3 = pnand %p10465_p2, %p10459_p13 }
  0xb6   :  { %10469 = shalt.err (!%p10466_p3)
}
  0xb7   :  { %s10565_s6 = smov 256   ;;  %s10566_s25 = smov 16  }
  0xb8   :  { %128 = dma.hbm_to_vmem [thread:$0]  %s11607_s8, 65536, %s123_s28, [#allocation14], %s10565_s6, %s10565_s6, %s10566_s25  }
  0xb9   :  { %s10567_s27 = smov [#allocation18]   ;;  %s10568_s16 = smov [#allocation21]  }
  0xba   :  { %s144_s21 = sshll.u32 %s10567_s27, 4  ;;  %s166_s22 = sshll.u32 %s10568_s16, 4  ;;  %s145_s21 = int_to_ptr.vmem [resolvable:$true] %s144_s21  ;;  %s167_s22 = int_to_ptr.vmem [resolvable:$true] %s166_s22 }
  0xbb   :  { %s10470_s1 = scalar_lea.hbm %s11609_s10, 16384 }
  0xbc   :  { %p10471_p4 = scmp.ne.s32.totalorder %s11609_s10, %s10470_s1  ;;  %p10474_p5 = scmp.lt.u32.totalorder %s10470_s1, %s11609_s10 }
  0xbe   :  { %p10476_p6 = pnand %p10474_p5, %p10471_p4 }
  0xc0   :  { %10479 = shalt.err (!%p10476_p6)
}
  0xc1   :  { %s10480_s8 = scalar_lea.vmem %s145_s21, 16384  ;;  %p10485_p8 = scmp.lt.s32.totalorder %s145_s21, %s145_s21 }
  0xc2   :  { %p10481_p7 = scmp.ne.s32.totalorder %s145_s21, %s10480_s8  ;;  %p10486_p9 = scmp.lt.s32.totalorder %s10480_s8, %s10480_s8 }
  0xc4   :  { %p10487_p10 = por %p10486_p9, %p10485_p8 }
  0xc6   :  { %p10488_p11 = pnand %p10487_p10, %p10481_p7 }
  0xc8   :  { %10491 = shalt.err (!%p10488_p11)
}
  0xc9   :  { %150 = dma.hbm_to_vmem [thread:$0]  %s11609_s10, 16384, %s145_s21, [#allocation17], %s10565_s6, %s10565_s6, %s10566_s25  }
  0xca   :  { %s10492_s18 = scalar_lea.hbm %s11611_s12, 4096 }
  0xcb   :  { %p10493_p12 = scmp.ne.s32.totalorder %s11611_s12, %s10492_s18  ;;  %p10496_p13 = scmp.lt.u32.totalorder %s10492_s18, %s11611_s12 }
  0xcd   :  { %p10498_p0 = pnand %p10496_p13, %p10493_p12 }
  0xcf   :  { %10501 = shalt.err (!%p10498_p0)
}
  0xd0   :  { %s10502_s19 = scalar_lea.vmem %s167_s22, 4096  ;;  %p10507_p2 = scmp.lt.s32.totalorder %s167_s22, %s167_s22 }
  0xd1   :  { %p10503_p1 = scmp.ne.s32.totalorder %s167_s22, %s10502_s19  ;;  %p10508_p3 = scmp.lt.s32.totalorder %s10502_s19, %s10502_s19 }
  0xd3   :  { %p10509_p4 = por %p10508_p3, %p10507_p2 }
  0xd5   :  { %p10510_p5 = pnand %p10509_p4, %p10503_p1 }
  0xd7   :  { %10513 = shalt.err (!%p10510_p5)
}
  0xd8   :  { %s10569_s10 = smov 64   ;;  %s10570_s2 = smov 4  }
  0xd9   :  { %172 = dma.hbm_to_vmem [thread:$0]  %s11611_s12, 4096, %s167_s22, [#allocation20], %s10569_s10, %s10569_s10, %s10570_s2  }
  0xda   :  { %s10571_s26 = smov [#allocation22]   ;;  %s10514_s16 = scalar_lea.hbm %s11612_s13, 16 }
  0xdb   :  { %s179_s15 = sshll.u32 %s10571_s26, 4  ;;  %p10515_p6 = scmp.ne.s32.totalorder %s11612_s13, %s10514_s16  ;;  %s180_s15 = int_to_ptr.vmem [resolvable:$true] %s179_s15 }
  0xdc   :  { %p10518_p7 = scmp.lt.u32.totalorder %s10514_s16, %s11612_s13 }
  0xde   :  { %p10520_p8 = pnand %p10518_p7, %p10515_p6 }
  0xe0   :  { %10523 = shalt.err (!%p10520_p8)
}
  0xe1   :  { %s10524_s0 = scalar_lea.vmem %s180_s15, 16  ;;  %s10528_s12 = scalar_lea.vmem %s180_s15, 32 }
  0xe2   :  { %p10525_p9 = scmp.ne.s32.totalorder %s180_s15, %s10524_s0  ;;  %p10529_p10 = scmp.lt.s32.totalorder %s180_s15, %s180_s15 }
  0xe3   :  { %p10530_p11 = scmp.lt.s32.totalorder %s10528_s12, %s10524_s0 }
  0xe5   :  { %p10531_p12 = por %p10530_p11, %p10529_p10 }
  0xe7   :  { %p10532_p13 = pnand %p10531_p12, %p10525_p9 }
  0xe9   :  { %10535 = shalt.err (!%p10532_p13)
}
  0xea   :  { %182 = dma.hbm_to_vmem [thread:$0]  %s11612_s13, 16, %s180_s15, [#allocation23]  }
  0xeb   :  { %10536 = dma.done.wait [#allocation3], 512  }
  0xec   :  { %10537 = vsyncadd [#allocation3], 4294966784 }
  0xed   :  { %10538 = dma.done.wait [#allocation5], 1280  }
  0xee   :  { %10539 = vsyncadd [#allocation5], 4294966016 }
  0xef   :  { %10540 = dma.done.wait [#allocation8], 3136  }
  0xf0   :  { %10541 = vsyncadd [#allocation8], 4294964160 }
  0xf1   :  { %10542 = dma.done.wait [#allocation11], 6208  }
  0xf2   :  { %10543 = vsyncadd [#allocation11], 4294961088 }
  0xf3   :  { %10544 = dma.done.wait [#allocation14], 65600  }
  0xf4   :  { %10545 = vsyncadd [#allocation14], 4294901696 }
  0xf5   :  { %10546 = dma.done.wait [#allocation17], 16448  }
  0xf6   :  { %10547 = vsyncadd [#allocation17], 4294950848 }
  0xf7   :  { %10548 = dma.done.wait [#allocation20], 4160  }
  0xf8   :  { %10549 = vsyncadd [#allocation20], 4294963136 }
  0xf9   :  { %10550 = dma.done.wait [#allocation23], 16  }
  0xfa   :  { %10551 = vsyncadd [#allocation23], 4294967280  ;;  %v287_v0 = vld [vmem:[#allocation6] sm:$0xff]  ;;  %v288_v1 = vld [vmem:[#allocation6 + $0x8] sm:$0xff]  ;;  %vm250_vm0 = vcmask 1040384   ;;  %vm321_vm1 = vcmask 130048  }
  0xfb   :  { %v226_v2 = vld [vmem:[#allocation2] sm:$0xff]  ;;  %v9003_v3 = vpack.c.bf16 %v288_v1, %v287_v0  ;;  %v227_v6 = vld [vmem:[#allocation2 + $0x8] sm:$0xff]  ;;  %v228_v11 = vld [vmem:[#allocation2 + $0x10] sm:$0xff]  ;;  %vm297_vm2 = vcmask 1046528   ;;  %vm564_vm3 = vcmask 1045504   ;;  %vm861_vm4 = vcmask 523264  }
  0xfc   :  { %v238_v4 = vrot.slane %v226_v2, 1  ;;  %v251_v5 = vrot.slane %v226_v2, 7  ;;  %v586_v7 = vld [vmem:[#allocation6 + $0x20] sm:$0xff]  ;;  %v587_v8 = vld [vmem:[#allocation6 + $0x28] sm:$0xff]  ;;  %v252_v9 = vrot.slane %v227_v6, 7  ;;  %v229_v12 = vld [vmem:[#allocation2 + $0x18] sm:$0xff] }
  0xfd   :  { %v9007_v10 = vpack.c.bf16 %v587_v8, %v586_v7  ;;  %v230_v13 = vld [vmem:[#allocation4] sm:$0xff]  ;;  %9004 = vmatprep.subr.bf16.mxu0 %v9003_v3  ;;  %v239_v15 = vrot.slane %v228_v11, 1  ;;  %v254_v16 = vrot.slane %v228_v11, 7  ;;  %v231_v17 = vld [vmem:[#allocation4 + $0x8] sm:$0xff]  ;;  %v255_v19 = vrot.slane %v229_v12, 7  ;;  %v319_v20 = vld [vmem:[#allocation6 + $0x10] sm:$0xff] }
  0xfe   :  { %v10846_v14 = vsel %vm250_vm0, %v238_v4, %v251_v5  ;;  %9006 = vmatpush3.bf16.msra.mxu0 %v9003_v3  ;;  %v10851_v18 = vsel %vm250_vm0, %v251_v5, %v252_v9  ;;  %v320_v21 = vld [vmem:[#allocation6 + $0x18] sm:$0xff]  ;;  %v240_v23 = vrot.slane %v230_v13, 1  ;;  %v232_v24 = vld [vmem:[#allocation4 + $0x10] sm:$0xff]  ;;  %v271_v26 = vrot.slane %v227_v6, 5 }
  0xff   :  { %8755 = vmatprep.mubr.msk.f32.mxu0 %vm321_vm1, %v10846_v14  ;;  %9008 = vmatprep.subr.bf16.mxu0 %v9007_v10  ;;  %v10854_v22 = vsel %vm250_vm0, %v239_v15, %v254_v16  ;;  %v298_v25 = vrot.slane %v10846_v14, 1  ;;  %v257_v27 = vrot.slane %v230_v13, 7  ;;  %v233_v28 = vld [vmem:[#allocation4 + $0x18] sm:$0xff]  ;;  %v10862_v29 = vsel %vm250_vm0, %v254_v16, %v255_v19 }
 0x100   :  { %v272_v30 = vrot.slane %v229_v12, 5  ;;  %v258_v31 = vrot.slane %v231_v17, 7  ;;  %v8999_v32 = vpack.c.bf16 %v320_v21, %v319_v20  ;;  %v241_v34 = vrot.slane %v232_v24, 1  ;;  %v853_v21 = vld [vmem:[#allocation9 + $0x40] sm:$0xff] }
 0x101   :  { %8756 = vmatmul.mubr.msk.f32.vlgmr.msra.gmra.mrb[0].mxu0 %vm321_vm1, %v10851_v18  ;;  %v10865_v33 = vsel %vm250_vm0, %v240_v23, %v257_v27  ;;  %v260_v35 = vrot.slane %v232_v24, 7  ;;  %v299_v36 = vrot.slane %v10851_v18, 1  ;;  %v303_v37 = vrot.slane %v10854_v22, 1  ;;  %v855_v24 = vld [vmem:[#allocation9 + $0x50] sm:$0xff] }
 0x102   :  { %9010 = vmatpush3.bf16.msra.mxu0 %v9007_v10  ;;  %8758 = vmatprep.mubr.msk.f32.mxu0 %vm321_vm1, %v10854_v22  ;;  %v304_v38 = vrot.slane %v10862_v29, 1  ;;  %v273_v39 = vrot.slane %v231_v17, 5  ;;  %v565_v41 = vrot.slane %v10846_v14, 2  ;;  %v259_v42 = vsel %vm250_vm0, %v257_v27, %v258_v31  ;;  %v857_v27 = vld [vmem:[#allocation9 + $0x60] sm:$0xff] }
 0x103   :  { %9000 = vmatprep.subr.bf16.mxu1 %v8999_v32  ;;  %v300_v40 = vsel %vm297_vm2, %v298_v25, %v299_v36  ;;  %v261_v43 = vrot.slane %v233_v28, 7  ;;  %v566_v44 = vrot.slane %v10851_v18, 2  ;;  %v282_v45 = vsel %vm250_vm0, %v241_v34, %v260_v35  ;;  %v856_v25 = vld [vmem:[#allocation9 + $0x58] sm:$0xff]  ;;  %v817_v34 = vld [vmem:[#allocation9 + $0x8] sm:$0xff] }
 0x104   :  { %9002 = vmatpush3.bf16.msra.mxu1 %v8999_v32  ;;  %8739 = vmatprep.mubr.msk.f32.mxu1 %vm321_vm1, %v300_v40  ;;  %v283_v46 = vsel %vm250_vm0, %v252_v9, %v271_v26  ;;  %v284_v47 = vsel %vm250_vm0, %v255_v19, %v272_v30  ;;  %v274_v48 = vrot.slane %v233_v28, 5  ;;  %v308_v51 = vrot.slane %v10865_v33, 1  ;;  %v858_v28 = vld [vmem:[#allocation9 + $0x68] sm:$0xff]  ;;  %v859_v30 = vld [vmem:[#allocation9 + $0x70] sm:$0xff]  ;;  %v1421_v40 = vld [vmem:[#allocation12 + $0x98] sm:$0xff] }
 0x105   :  { %8759 = vmatmul.mubr.msk.f32.gmra.mrb[2].mxu0 %vm321_vm1, %v10862_v29  ;;  %v301_v49 = vrot.slane %v283_v46, 1  ;;  %v306_v50 = vrot.slane %v284_v47, 1  ;;  %v309_v52 = vrot.slane %v259_v42, 1  ;;  %v305_v53 = vsel %vm297_vm2, %v303_v37, %v304_v38  ;;  %v1419_v37 = vld [vmem:[#allocation12 + $0x88] sm:$0xff] }
 0x106   :  { %8761 = vmatprep.mubr.msk.f32.mxu0 %vm321_vm1, %v10865_v33  ;;  %v285_v54 = vsel %vm250_vm0, %v258_v31, %v273_v39  ;;  %v262_v55 = vsel %vm250_vm0, %v260_v35, %v261_v43  ;;  %v568_v57 = vrot.slane %v283_v46, 2  ;;  %v570_v58 = vrot.slane %v10854_v22, 2  ;;  %v854_v22 = vld [vmem:[#allocation9 + $0x48] sm:$0xff]  ;;  %v860_v31 = vld [vmem:[#allocation9 + $0x78] sm:$0xff] }
 0x107   :  { %v302_v56 = vsel %vm297_vm2, %v299_v36, %v301_v49  ;;  %v571_v59 = vrot.slane %v10862_v29, 2  ;;  %v567_v60 = vsel %vm564_vm3, %v565_v41, %v566_v44  ;;  %v307_v61 = vsel %vm297_vm2, %v304_v38, %v306_v50  ;;  %v1418_v36 = vld [vmem:[#allocation12 + $0x80] sm:$0xff]  ;;  %v1420_v38 = vld [vmem:[#allocation12 + $0x90] sm:$0xff]  ;;  %v10925_v50 = vld [vmem:[#allocation7] ss:$0 sm:$0xff] }
 0x108   :  { %8740 = vmatmul.mubr.msk.f32.vlgmr.msra.gmra.mrb[0].mxu1 %vm321_vm1, %v302_v56  ;;  %v311_v62 = vrot.slane %v285_v54, 1  ;;  %v313_v63 = vrot.slane %v282_v45, 1  ;;  %v314_v0 = vrot.slane %v262_v55, 1  ;;  %v310_v1 = vsel %vm297_vm2, %v308_v51, %v309_v52  ;;  %v10927_v56 = vld [vmem:[#allocation7 + $0x1] ss:$0 sm:$0xff] }
 0x109   :  { %8762 = vmatmul.mubr.msk.f32.gmra.mrb[4].mxu0 %vm321_vm1, %v259_v42  ;;  %8742 = vmatprep.mubr.msk.f32.mxu1 %vm321_vm1, %v305_v53  ;;  %v286_v2 = vsel %vm250_vm0, %v261_v43, %v274_v48  ;;  %v569_v3 = vsel %vm564_vm3, %v566_v44, %v568_v57  ;;  %v573_v4 = vrot.slane %v284_v47, 2  ;;  %v575_v5 = vrot.slane %v10865_v33, 2  ;;  %v816_v33 = vld [vmem:[#allocation9] sm:$0xff]  ;;  %v1423_v43 = vld [vmem:[#allocation12 + $0xa8] sm:$0xff]  ;;  %v1424_v44 = vld [vmem:[#allocation12 + $0xb0] sm:$0xff] }
 0x10a   :  { %8764 = vmatprep.mubr.msk.f32.mxu0 %vm321_vm1, %v282_v45  ;;  %v576_v6 = vrot.slane %v259_v42, 2  ;;  %v572_v7 = vsel %vm564_vm3, %v570_v58, %v571_v59  ;;  %v312_v8 = vsel %vm297_vm2, %v309_v52, %v311_v62  ;;  %v316_v9 = vrot.slane %v286_v2, 1  ;;  %v1422_v42 = vld [vmem:[#allocation12 + $0xa0] sm:$0xff]  ;;  %v819_v62 = vld [vmem:[#allocation9 + $0x18] sm:$0xff] }
 0x10b   :  { %v315_v10 = vsel %vm297_vm2, %v313_v63, %v314_v0  ;;  %v574_v11 = vsel %vm564_vm3, %v571_v59, %v573_v4  ;;  %v578_v12 = vrot.slane %v285_v54, 2  ;;  %v580_v13 = vrot.slane %v282_v45, 2  ;;  %v1425_v45 = vld [vmem:[#allocation12 + $0xb8] sm:$0xff] }
 0x10c   :  { %8743 = vmatmul.mubr.msk.f32.gmra.mrb[2].mxu1 %vm321_vm1, %v307_v61  ;;  %v581_v14 = vrot.slane %v262_v55, 2  ;;  %v577_v15 = vsel %vm564_vm3, %v575_v5, %v576_v6  ;;  %v317_v16 = vsel %vm297_vm2, %v314_v0, %v316_v9  ;;  %v583_v18 = vrot.slane %v286_v2, 2  ;;  %v818_v61 = vld [vmem:[#allocation9 + $0x10] sm:$0xff]  ;;  %v10930_v63 = vld [vmem:[#allocation7 + $0x2] ss:$0 sm:$0xff]  ;;  %v820_v2 = vld [vmem:[#allocation9 + $0x20] sm:$0xff] }
 0x10d   :  { %8765 = vmatmul.mubr.msk.f32.gmra.mrb[6].mxu0 %vm321_vm1, %v262_v55  ;;  %8745 = vmatprep.mubr.msk.f32.mxu1 %vm321_vm1, %v310_v1  ;;  %v579_v17 = vsel %vm564_vm3, %v576_v6, %v578_v12  ;;  %v9011_v23 = vpack.c.bf16 %v854_v22, %v853_v21  ;;  %v9015_v26 = vpack.c.bf16 %v856_v25, %v855_v24  ;;  %vm1927_vm5 = vcmask 1041409  }
 0x10e   :  { %8771 = vmatprep.mubr.msk.f32.mxu0 %vm321_vm1, %v567_v60  ;;  %v582_v19 = vsel %vm564_vm3, %v580_v13, %v581_v14  ;;  %v584_v20 = vsel %vm564_vm3, %v581_v14, %v583_v18  ;;  %v9019_v29 = vpack.c.bf16 %v858_v28, %v857_v27  ;;  %v9023_v32 = vpack.c.bf16 %v860_v31, %v859_v30  ;;  %v823_v14 = vld [vmem:[#allocation9 + $0x38] sm:$0xff] }
 0x10f   :  { %9012 = vmatprep.subr.bf16.mxu1 %v9011_v23  ;;  %v10922_v35 = vpack.c.bf16 %v817_v34, %v816_v33  ;;  %v9059_v39 = vpack.c.bf16 %v1419_v37, %v1418_v36  ;;  %v9063_v41 = vpack.c.bf16 %v1421_v40, %v1420_v38  ;;  %v9067_v46 = vpack.c.bf16 %v1423_v43, %v1422_v42 }
 0x110   :  { %8746 = vmatmul.mubr.msk.f32.gmra.mrb[4].mxu1 %vm321_vm1, %v312_v8  ;;  %v9071_v47 = vpack.c.bf16 %v1425_v45, %v1424_v44  ;;  %v10937_v18 = vpack.c.bf16 %v819_v62, %v818_v61  ;;  %vm1930_vm6 = vcmask 1042434   ;;  %vm1933_vm7 = vcmask 1043459  }
 0x111   :  { %8772 = vmatmul.mubr.msk.f32.vlgmr.msra.gmra.mrb[0].mxu0 %vm321_vm1, %v569_v3  ;;  %8748 = vmatprep.mubr.msk.f32.mxu1 %vm321_vm1, %v315_v10  ;;  %v821_v3 = vld [vmem:[#allocation9 + $0x28] sm:$0xff] }
 0x112   :  { %8774 = vmatprep.mubr.msk.f32.mxu0 %vm321_vm1, %v572_v7  ;;  %9014 = vmatpush3.bf16.msra.mxu1 %v9011_v23  ;;  %v822_v7 = vld [vmem:[#allocation9 + $0x30] sm:$0xff]  ;;  %v10940_v23 = vpack.c.bf16 %v821_v3, %v820_v2 }
 0x113   :  { %9016 = vmatprep.subr.bf16.mxu1 %v9015_v26  ;;  %9060 = vmatprep.subr.bf16.mxu0 %v9059_v39  ;;  %v10943_v27 = vpack.c.bf16 %v823_v14, %v822_v7 }
 0x114   :  { %8749 = vmatmul.mubr.msk.f32.gmra.mrb[6].mxu1 %vm321_vm1, %v317_v16  ;;  %9062 = vmatpush3.bf16.msra.mxu0 %v9059_v39 }
 0x115   :  { %8775 = vmatmul.mubr.msk.f32.gmra.mrb[2].mxu0 %vm321_vm1, %v574_v11  ;;  %9064 = vmatprep.subr.bf16.mxu0 %v9063_v41 }
 0x116   :  { %8777 = vmatprep.mubr.msk.f32.mxu0 %vm321_vm1, %v577_v15  ;;  %9018 = vmatpush3.bf16.msra.mxu1 %v9015_v26 }
 0x117   :  { %9020 = vmatprep.subr.bf16.mxu1 %v9019_v29 }
 0x118   :  { %9066 = vmatpush3.bf16.msra.mxu0 %v9063_v41 }
 0x119   :  { %8778 = vmatmul.mubr.msk.f32.gmra.mrb[4].mxu0 %vm321_vm1, %v579_v17  ;;  %9068 = vmatprep.subr.bf16.mxu0 %v9067_v46 }
 0x11a   :  { %8780 = vmatprep.mubr.msk.f32.mxu0 %vm321_vm1, %v582_v19  ;;  %9022 = vmatpush3.bf16.msra.mxu1 %v9019_v29 }
 0x11b   :  { %9024 = vmatprep.subr.bf16.mxu1 %v9023_v32 }
 0x11c   :  { %9070 = vmatpush3.bf16.msra.mxu0 %v9067_v46 }
 0x11d   :  { %8781 = vmatmul.mubr.msk.f32.gmra.mrb[6].mxu0 %vm321_vm1, %v584_v20  ;;  %9072 = vmatprep.subr.bf16.mxu0 %v9071_v47 }
 0x11e   :  { %9026 = vmatpush3.bf16.msra.mxu1 %v9023_v32 }
 0x11f   :  { %9028 = vmatprep.subr.bf16.mxu1 %v10922_v35 }
 0x120   :  { %9074 = vmatpush3.bf16.msra.mxu0 %v9071_v47 }
 0x1db   :  { %v8741_v48 = vpop.f32.mrb[0].mxu1 }
 0x1dc   :  { %v404_v49 = vpop.f32.mrb[1].mxu1 }
 0x1df   :  { %v8744_v51 = vpop.f32.mrb[2].mxu1 }
 0x1e0   :  { %v414_v52 = vpop.f32.mrb[3].mxu1 }
 0x1e3   :  { %v8747_v58 = vpop.f32.mrb[4].mxu1 }
 0x1e4   :  { %v8773_v53 = vpop.f32.mrb[0].mxu0  ;;  %v424_v60 = vpop.f32.mrb[5].mxu1 }
 0x1e5   :  { %v9155_v54 = vadd.f32 %v8773_v53, %v8741_v48  ;;  %v670_v55 = vpop.f32.mrb[1].mxu0 }
 0x1e6   :  { %v9156_v57 = vadd.f32 %v670_v55, %v404_v49 }
 0x1e7   :  { %v725_v59 = vadd.f32 %v9155_v54, %v10925_v50  ;;  %v8750_v10 = vpop.f32.mrb[6].mxu1 }
 0x1e8   :  { %v724_v0 = vadd.f32 %v9156_v57, %v10925_v50  ;;  %v8776_v1 = vpop.f32.mrb[2].mxu0  ;;  %v434_v13 = vpop.f32.mrb[7].mxu1 }
 0x1e9   :  { %v733_v4 = vmax.f32 %v725_v59, 0.0  ;;  %v9157_v5 = vadd.f32 %v8776_v1, %v8744_v51  ;;  %v680_v6 = vpop.f32.mrb[3].mxu0 }
 0x1ea   :  { %v732_v8 = vmax.f32 %v724_v0, 0.0  ;;  %v9158_v9 = vadd.f32 %v680_v6, %v414_v52 }
 0x1eb   :  { %v745_v11 = vmul.f32 %v10927_v56, %v733_v4  ;;  %v727_v12 = vadd.f32 %v9157_v5, %v10925_v50 }
 0x1ec   :  { %v744_v15 = vmul.f32 %v10927_v56, %v732_v8  ;;  %v726_v16 = vadd.f32 %v9158_v9, %v10925_v50  ;;  %v8779_v17 = vpop.f32.mrb[4].mxu0 }
 0x1ed   :  { %v757_v19 = vadd.f32 %v10930_v63, %v745_v11  ;;  %v735_v20 = vmax.f32 %v727_v12, 0.0  ;;  %v9159_v21 = vadd.f32 %v8779_v17, %v8747_v58  ;;  %v690_v22 = vpop.f32.mrb[5].mxu0 }
 0x1ee   :  { %v756_v24 = vadd.f32 %v10930_v63, %v744_v15  ;;  %v734_v25 = vmax.f32 %v726_v16, 0.0  ;;  %v9160_v26 = vadd.f32 %v690_v22, %v424_v60 }
 0x1ef   :  { %v781_v28 = vrot.slane %v757_v19, 7  ;;  %v800_v29 = vrot.slane %v757_v19, 5  ;;  %v747_v30 = vmul.f32 %v10927_v56, %v735_v20  ;;  %v729_v31 = vadd.f32 %v9159_v21, %v10925_v50 }
 0x1f0   :  { %v768_v32 = vrot.slane %v756_v24, 1  ;;  %v780_v33 = vrot.slane %v756_v24, 7  ;;  %v746_v34 = vmul.f32 %v10927_v56, %v734_v25  ;;  %v728_v36 = vadd.f32 %v9160_v26, %v10925_v50  ;;  %v8782_v37 = vpop.f32.mrb[6].mxu0 }
 0x1f1   :  { %v10950_v38 = vsel %vm250_vm0, %v781_v28, %v800_v29  ;;  %v759_v39 = vadd.f32 %v10930_v63, %v747_v30  ;;  %v737_v40 = vmax.f32 %v729_v31, 0.0  ;;  %v9161_v41 = vadd.f32 %v8782_v37, %v8750_v10  ;;  %v700_v42 = vpop.f32.mrb[7].mxu0  ;;  %v1125_v37 = vld [vmem:[#allocation9 + $0x80] sm:$0xff] }
 0x1f2   :  { %v758_v43 = vadd.f32 %v10930_v63, %v746_v34  ;;  %v736_v44 = vmax.f32 %v728_v36, 0.0  ;;  %v9162_v45 = vadd.f32 %v700_v42, %v434_v13  ;;  %v10955_v46 = vsel %vm250_vm0, %v780_v33, %v781_v28 }
 0x1f3   :  { %v784_v47 = vrot.slane %v759_v39, 7  ;;  %v801_v48 = vrot.slane %v759_v39, 5  ;;  %v749_v49 = vmul.f32 %v10927_v56, %v737_v40  ;;  %v731_v51 = vadd.f32 %v9161_v41, %v10925_v50  ;;  %v1126_v41 = vld [vmem:[#allocation9 + $0x88] sm:$0xff] }
 0x1f4   :  { %v769_v52 = vrot.slane %v758_v43, 1  ;;  %v783_v53 = vrot.slane %v758_v43, 7  ;;  %v748_v54 = vmul.f32 %v10927_v56, %v736_v44  ;;  %v730_v55 = vadd.f32 %v9162_v45, %v10925_v50 }
 0x1f5   :  { %v761_v57 = vadd.f32 %v10930_v63, %v749_v49  ;;  %v739_v58 = vmax.f32 %v731_v51, 0.0  ;;  %v10963_v59 = vsel %vm250_vm0, %v768_v32, %v780_v33  ;;  %v833_v60 = vrot.slane %v10955_v46, 1 }
 0x1f6   :  { %v760_v61 = vadd.f32 %v10930_v63, %v748_v54  ;;  %v738_v62 = vmax.f32 %v730_v55, 0.0  ;;  %v832_v0 = vrot.slane %v10963_v59, 1  ;;  %v835_v1 = vrot.slane %v10950_v38, 1 }
 0x1f7   :  { %v787_v2 = vrot.slane %v761_v57, 7  ;;  %v802_v3 = vrot.slane %v761_v57, 5  ;;  %v751_v4 = vmul.f32 %v10927_v56, %v739_v58  ;;  %v10971_v50 = vsel %vm250_vm0, %v783_v53, %v784_v47 }
 0x1f8   :  { %v770_v5 = vrot.slane %v760_v61, 1  ;;  %v786_v6 = vrot.slane %v760_v61, 7  ;;  %v750_v7 = vmul.f32 %v10927_v56, %v738_v62  ;;  %v834_v8 = vsel %vm297_vm2, %v832_v0, %v833_v60  ;;  %v1127_v0 = vld [vmem:[#allocation9 + $0x90] sm:$0xff] }
 0x1f9   :  { %v763_v9 = vadd.f32 %v10930_v63, %v751_v4  ;;  %8799 = vmatprep.mubr.msk.f32.mxu1 %vm861_vm4, %v834_v8  ;;  %v836_v10 = vsel %vm297_vm2, %v833_v60, %v835_v1  ;;  %v10979_v11 = vsel %vm250_vm0, %v769_v52, %v783_v53  ;;  %v838_v12 = vrot.slane %v10971_v50, 1  ;;  %v1128_v1 = vld [vmem:[#allocation9 + $0x98] sm:$0xff]  ;;  %v1131_v8 = vld [vmem:[#allocation9 + $0xb0] sm:$0xff] }
 0x1fa   :  { %v762_v13 = vadd.f32 %v10930_v63, %v750_v7  ;;  %8800 = vmatmul.mubr.msk.f32.vlgmr.msra.gmra.mrb[8].mxu1 %vm861_vm4, %v836_v10  ;;  %v837_v14 = vrot.slane %v10979_v11, 1  ;;  %v813_v56 = vsel %vm250_vm0, %v784_v47, %v801_v48  ;;  %v10987_v15 = vsel %vm250_vm0, %v786_v6, %v787_v2  ;;  %v1428_v10 = vld [vmem:[#allocation12 + $0xd0] sm:$0xff] }
 0x1fb   :  { %v790_v16 = vrot.slane %v763_v9, 7  ;;  %v803_v17 = vrot.slane %v763_v9, 5  ;;  %9030 = vmatpush3.bf16.msra.mxu1 %v10922_v35  ;;  %v840_v19 = vrot.slane %v813_v56, 1  ;;  %v10991_v20 = vsel %vm250_vm0, %v770_v5, %v786_v6  ;;  %v1129_v5 = vld [vmem:[#allocation9 + $0xa0] sm:$0xff]  ;;  %v1130_v6 = vld [vmem:[#allocation9 + $0xa8] sm:$0xff]  ;;  %v1132_v9 = vld [vmem:[#allocation9 + $0xb8] sm:$0xff] }
 0x1fc   :  { %v771_v21 = vrot.slane %v762_v13, 1  ;;  %v789_v22 = vrot.slane %v762_v13, 7  ;;  %v839_v63 = vsel %vm297_vm2, %v837_v14, %v838_v12  ;;  %9032 = vmatprep.subr.bf16.mxu1 %v10937_v18  ;;  %v842_v24 = vrot.slane %v10991_v20, 1  ;;  %v1430_v13 = vld [vmem:[#allocation12 + $0xe0] sm:$0xff]  ;;  %v1431_v14 = vld [vmem:[#allocation12 + $0xe8] sm:$0xff] }
 0x1fd   :  { %8802 = vmatprep.mubr.msk.f32.mxu1 %vm861_vm4, %v839_v63  ;;  %v841_v25 = vsel %vm297_vm2, %v838_v12, %v840_v19  ;;  %v843_v26 = vrot.slane %v10987_v15, 1  ;;  %v814_v35 = vsel %vm250_vm0, %v787_v2, %v802_v3  ;;  %v815_v28 = vsel %vm250_vm0, %v790_v16, %v803_v17  ;;  %v1365_v19 = vld [vmem:[#allocation12] sm:$0xff]  ;;  %v9238_v63 = vld [vmem:[#allocation15 + $0x104] ss:$16 sps:$4 sm:$0xff]  }
 0x1fe   :  { %8803 = vmatmul.mubr.msk.f32.gmra.mrb[10].mxu1 %vm861_vm4, %v841_v25  ;;  %v845_v29 = vrot.slane %v814_v35, 1  ;;  %v11003_v30 = vsel %vm250_vm0, %v789_v22, %v790_v16  ;;  %v811_v31 = vsel %vm250_vm0, %v771_v21, %v789_v22  ;;  %v850_v32 = vrot.slane %v815_v28, 1  ;;  %v1433_v16 = vld [vmem:[#allocation12 + $0xf8] sm:$0xff]  ;;  %v9236_v22 = vld [vmem:[#allocation15 + $0x100] ss:$16 sps:$4 sm:$0xff]  }
 0x1ff   :  { %9034 = vmatpush3.bf16.msra.mxu1 %v10937_v18  ;;  %v844_v33 = vsel %vm297_vm2, %v842_v24, %v843_v26  ;;  %v847_v34 = vrot.slane %v811_v31, 1  ;;  %v848_v36 = vrot.slane %v11003_v30, 1  ;;  %v1104_v39 = vrot.slane %v10963_v59, 2  ;;  %v7862_v24 = vld [vmem:[#allocation10] ss:$0 sm:$0xff] }
 0x200   :  { %8805 = vmatprep.mubr.msk.f32.mxu1 %vm861_vm4, %v844_v33  ;;  %v846_v40 = vsel %vm297_vm2, %v843_v26, %v845_v29  ;;  %9036 = vmatprep.subr.bf16.mxu1 %v10940_v23  ;;  %v1105_v42 = vrot.slane %v10955_v46, 2  ;;  %v1107_v43 = vrot.slane %v10950_v38, 2  ;;  %v1109_v18 = vrot.slane %v10979_v11, 2 }
 0x201   :  { %v849_v44 = vsel %vm297_vm2, %v847_v34, %v848_v36  ;;  %v851_v45 = vsel %vm297_vm2, %v848_v36, %v850_v32  ;;  %v1110_v47 = vrot.slane %v10971_v50, 2  ;;  %v1112_v48 = vrot.slane %v813_v56, 2  ;;  %v1367_v34 = vld [vmem:[#allocation12 + $0x10] sm:$0xff] }
 0x202   :  { %8806 = vmatmul.mubr.msk.f32.gmra.mrb[12].mxu1 %vm861_vm4, %v846_v40  ;;  %v1106_v49 = vsel %vm564_vm3, %v1104_v39, %v1105_v42  ;;  %v1108_v51 = vsel %vm564_vm3, %v1105_v42, %v1107_v43  ;;  %v1114_v52 = vrot.slane %v10991_v20, 2  ;;  %v1115_v53 = vrot.slane %v10987_v15, 2  ;;  %v1368_v40 = vld [vmem:[#allocation12 + $0x18] sm:$0xff]  ;;  %v1370_v42 = vld [vmem:[#allocation12 + $0x28] sm:$0xff] }
 0x203   :  { %9038 = vmatpush3.bf16.msra.mxu1 %v10940_v23  ;;  %8808 = vmatprep.mubr.msk.f32.mxu1 %vm861_vm4, %v849_v44  ;;  %v1111_v38 = vsel %vm564_vm3, %v1109_v18, %v1110_v47  ;;  %v1113_v54 = vsel %vm564_vm3, %v1110_v47, %v1112_v48  ;;  %v1117_v55 = vrot.slane %v814_v35, 2  ;;  %v1119_v57 = vrot.slane %v811_v31, 2 }
 0x204   :  { %9040 = vmatprep.subr.bf16.mxu1 %v10943_v27  ;;  %v9043_v58 = vpack.c.bf16 %v1126_v41, %v1125_v37  ;;  %v1116_v60 = vsel %vm564_vm3, %v1114_v52, %v1115_v53  ;;  %v1120_v61 = vrot.slane %v11003_v30, 2  ;;  %v1122_v62 = vrot.slane %v815_v28, 2  ;;  %v11062_v28 = vld [vmem:[#allocation10 + $0x1] ss:$0 sm:$0xff]  ;;  %v1369_v41 = vld [vmem:[#allocation12 + $0x20] sm:$0xff] }
 0x205   :  { %v1118_v23 = vsel %vm564_vm3, %v1115_v53, %v1117_v55  ;;  %v9047_v4 = vpack.c.bf16 %v1128_v1, %v1127_v0  ;;  %v9051_v7 = vpack.c.bf16 %v1130_v6, %v1129_v5  ;;  %v9083_v56 = vpack.c.bf16 %v1431_v14, %v1430_v13  ;;  %v1371_v53 = vld [vmem:[#allocation12 + $0x30] sm:$0xff] }
 0x206   :  { %8809 = vmatmul.mubr.msk.f32.gmra.mrb[14].mxu1 %vm861_vm4, %v851_v45  ;;  %v1121_v2 = vsel %vm564_vm3, %v1119_v57, %v1120_v61  ;;  %v1123_v3 = vsel %vm564_vm3, %v1120_v61, %v1122_v62  ;;  %v11072_v52 = vpack.c.bf16 %v1370_v42, %v1369_v41 }
 0x207   :  { %9042 = vmatpush3.bf16.msra.mxu1 %v10943_v27  ;;  %8827 = vmatprep.mubr.msk.f32.mxu1 %vm861_vm4, %v10963_v59  ;;  %v9055_v27 = vpack.c.bf16 %v1132_v9, %v1131_v8  ;;  %v1427_v59 = vld [vmem:[#allocation12 + $0xc8] sm:$0xff] }
 0x208   :  { %9044 = vmatprep.subr.bf16.mxu1 %v9043_v58 }
 0x20a   :  { %8828 = vmatmul.mubr.msk.f32.vlgmr.msra.gmra.mrb[8].mxu1 %vm861_vm4, %v10955_v46  ;;  %v1426_v46 = vld [vmem:[#allocation12 + $0xc0] sm:$0xff] }
 0x20b   :  { %8830 = vmatprep.mubr.msk.f32.mxu1 %vm861_vm4, %v10979_v11  ;;  %9046 = vmatpush3.bf16.msra.mxu1 %v9043_v58  ;;  %v1429_v11 = vld [vmem:[#allocation12 + $0xd8] sm:$0xff] }
 0x20c   :  { %9048 = vmatprep.subr.bf16.mxu1 %v9047_v4  ;;  %v9079_v12 = vpack.c.bf16 %v1429_v11, %v1428_v10 }
 0x20e   :  { %8831 = vmatmul.mubr.msk.f32.gmra.mrb[10].mxu1 %vm861_vm4, %v10971_v50  ;;  %v9075_v50 = vpack.c.bf16 %v1427_v59, %v1426_v46 }
 0x20f   :  { %8833 = vmatprep.mubr.msk.f32.mxu1 %vm861_vm4, %v10991_v20  ;;  %9050 = vmatpush3.bf16.msra.mxu1 %v9047_v4  ;;  %v1366_v20 = vld [vmem:[#allocation12 + $0x8] sm:$0xff] }
 0x210   :  { %9052 = vmatprep.subr.bf16.mxu1 %v9051_v7  ;;  %9076 = vmatprep.subr.bf16.mxu0 %v9075_v50  ;;  %v11059_v21 = vpack.c.bf16 %v1366_v20, %v1365_v19 }
 0x211   :  { %9078 = vmatpush3.bf16.msra.mxu0 %v9075_v50 }
 0x212   :  { %8834 = vmatmul.mubr.msk.f32.gmra.mrb[12].mxu1 %vm861_vm4, %v10987_v15  ;;  %9080 = vmatprep.subr.bf16.mxu0 %v9079_v12  ;;  %v1432_v15 = vld [vmem:[#allocation12 + $0xf0] sm:$0xff] }
 0x213   :  { %8836 = vmatprep.mubr.msk.f32.mxu1 %vm861_vm4, %v811_v31  ;;  %9054 = vmatpush3.bf16.msra.mxu1 %v9051_v7  ;;  %v9087_v17 = vpack.c.bf16 %v1433_v16, %v1432_v15  ;;  %v11064_v31 = vld [vmem:[#allocation10 + $0x2] ss:$0 sm:$0xff] }
 0x214   :  { %9056 = vmatprep.subr.bf16.mxu1 %v9055_v27 }
 0x215   :  { %9082 = vmatpush3.bf16.msra.mxu0 %v9079_v12 }
 0x216   :  { %8837 = vmatmul.mubr.msk.f32.gmra.mrb[14].mxu1 %vm861_vm4, %v11003_v30  ;;  %9084 = vmatprep.subr.bf16.mxu0 %v9083_v56 }
 0x217   :  { %9058 = vmatpush3.bf16.msra.mxu1 %v9055_v27  ;;  %8855 = vmatprep.mubr.msk.f32.mxu1 %vm861_vm4, %v1106_v49 }
 0x218   :  { %2097 = vmatprep.subr.bf16.mxu1 %v9238_v63 }
 0x219   :  { %9086 = vmatpush3.bf16.msra.mxu0 %v9083_v56 }
 0x21a   :  { %8856 = vmatmul.mubr.msk.f32.vlgmr.msra.gmra.mrb[8].mxu1 %vm861_vm4, %v1108_v51  ;;  %9088 = vmatprep.subr.bf16.mxu0 %v9087_v17  ;;  %v11070_v51 = vpack.c.bf16 %v1368_v40, %v1367_v34 }
 0x21b   :  { %8858 = vmatprep.mubr.msk.f32.mxu1 %vm861_vm4, %v1111_v38  ;;  %2098 = vmatpush1.bf16.msra.mxu1 %v9236_v22  ;;  %v1372_v38 = vld [vmem:[#allocation12 + $0x38] sm:$0xff] }
 0x21c   :  { %v11080_v4 = vpack.c.bf16 %v1372_v38, %v1371_v53 }
 0x21d   :  { %9090 = vmatpush3.bf16.msra.mxu0 %v9087_v17 }
 0x21e   :  { %8859 = vmatmul.mubr.msk.f32.gmra.mrb[10].mxu1 %vm861_vm4, %v1113_v54  ;;  %9092 = vmatprep.subr.bf16.mxu0 %v11059_v21 }
 0x21f   :  { %8861 = vmatprep.mubr.msk.f32.mxu1 %vm861_vm4, %v1116_v60 }
 0x222   :  { %8862 = vmatmul.mubr.msk.f32.gmra.mrb[12].mxu1 %vm861_vm4, %v1118_v23 }
 0x223   :  { %8864 = vmatprep.mubr.msk.f32.mxu1 %vm861_vm4, %v1121_v2 }
 0x226   :  { %8865 = vmatmul.mubr.msk.f32.gmra.mrb[14].mxu1 %vm861_vm4, %v1123_v3 }
 0x2ed   :  { %v8857_v25 = vpop.f32.mrb[8].mxu1 }
 0x2ee   :  { %v1270_v26 = vadd.f32 %v8857_v25, %v7862_v24  ;;  %v1215_v35 = vpop.f32.mrb[9].mxu1 }
 0x2ef   :  { %v1269_v29 = vadd.f32 %v7862_v24, %v1215_v35 }
 0x2f0   :  { %v1278_v30 = vmax.f32 %v1270_v26, 0.0 }
 0x2f1   :  { %v1277_v32 = vmax.f32 %v1269_v29, 0.0  ;;  %v8860_v33 = vpop.f32.mrb[10].mxu1 }
 0x2f2   :  { %v1290_v36 = vmul.f32 %v11062_v28, %v1278_v30  ;;  %v1272_v37 = vadd.f32 %v8860_v33, %v7862_v24  ;;  %v1225_v39 = vpop.f32.mrb[11].mxu1 }
 0x2f3   :  { %v1289_v43 = vmul.f32 %v11062_v28, %v1277_v32  ;;  %v1271_v18 = vadd.f32 %v7862_v24, %v1225_v39 }
 0x2f4   :  { %v1302_v44 = vadd.f32 %v11064_v31, %v1290_v36  ;;  %v1280_v45 = vmax.f32 %v1272_v37, 0.0 }
 0x2f5   :  { %v1301_v47 = vadd.f32 %v11064_v31, %v1289_v43  ;;  %v1279_v48 = vmax.f32 %v1271_v18, 0.0  ;;  %v8863_v49 = vpop.f32.mrb[12].mxu1 }
 0x2f6   :  { %v1326_v54 = vrot.slane %v1302_v44, 7  ;;  %v1349_v55 = vrot.slane %v1302_v44, 5  ;;  %v1292_v57 = vmul.f32 %v11062_v28, %v1280_v45  ;;  %v1274_v58 = vadd.f32 %v8863_v49, %v7862_v24  ;;  %v1235_v60 = vpop.f32.mrb[13].mxu1 }
 0x2f7   :  { %v1313_v61 = vrot.slane %v1301_v47, 1  ;;  %v1325_v62 = vrot.slane %v1301_v47, 7  ;;  %v1291_v0 = vmul.f32 %v11062_v28, %v1279_v48  ;;  %v1273_v1 = vadd.f32 %v7862_v24, %v1235_v60 }
 0x2f8   :  { %v1304_v23 = vadd.f32 %v11064_v31, %v1292_v57  ;;  %v1282_v2 = vmax.f32 %v1274_v58, 0.0  ;;  %v11078_v3 = vsel %vm250_vm0, %v1326_v54, %v1349_v55 }
 0x2f9   :  { %v1303_v5 = vadd.f32 %v11064_v31, %v1291_v0  ;;  %v1281_v6 = vmax.f32 %v1273_v1, 0.0  ;;  %v8866_v7 = vpop.f32.mrb[14].mxu1  ;;  %v11084_v8 = vsel %vm250_vm0, %v1325_v62, %v1326_v54  ;;  %v11087_v9 = vsel %vm250_vm0, %v1313_v61, %v1325_v62 }
 0x2fa   :  { %v1329_v27 = vrot.slane %v1304_v23, 7  ;;  %v1350_v46 = vrot.slane %v1304_v23, 5  ;;  %v1294_v59 = vmul.f32 %v11062_v28, %v1282_v2  ;;  %v1276_v50 = vadd.f32 %v8866_v7, %v7862_v24  ;;  %v1245_v10 = vpop.f32.mrb[15].mxu1 }
 0x2fb   :  { %v1314_v11 = vrot.slane %v1303_v5, 1  ;;  %v1328_v12 = vrot.slane %v1303_v5, 7  ;;  %v1293_v13 = vmul.f32 %v11062_v28, %v1281_v6  ;;  %v1275_v14 = vadd.f32 %v7862_v24, %v1245_v10 }
 0x2fc   :  { %v1306_v56 = vadd.f32 %v11064_v31, %v1294_v59  ;;  %v1284_v15 = vmax.f32 %v1276_v50, 0.0  ;;  %v1389_v16 = vrot.slane %v11087_v9, 1  ;;  %v1390_v17 = vrot.slane %v11084_v8, 1 }
 0x2fd   :  { %v1305_v19 = vadd.f32 %v11064_v31, %v1293_v13  ;;  %v1283_v20 = vmax.f32 %v1275_v14, 0.0  ;;  %v1392_v22 = vrot.slane %v11078_v3, 1  ;;  %v11097_v63 = vsel %vm250_vm0, %v1328_v12, %v1329_v27 }
 0x2fe   :  { %v1332_v25 = vrot.slane %v1306_v56, 7  ;;  %v1351_v26 = vrot.slane %v1306_v56, 5  ;;  %v1296_v35 = vmul.f32 %v11062_v28, %v1284_v15  ;;  %v1391_v24 = vsel %vm297_vm2, %v1389_v16, %v1390_v17 }
 0x2ff   :  { %v1315_v29 = vrot.slane %v1305_v19, 1  ;;  %v1331_v30 = vrot.slane %v1305_v19, 7  ;;  %v1295_v32 = vmul.f32 %v11062_v28, %v1283_v20  ;;  %8899 = vmatprep.mubr.f32.mxu0 %v1391_v24  ;;  %v1393_v33 = vsel %vm297_vm2, %v1390_v17, %v1392_v22  ;;  %v1375_v20 = vld [vmem:[#allocation12 + $0x50] sm:$0xff]  ;;  %v1376_v22 = vld [vmem:[#allocation12 + $0x58] sm:$0xff]  ;;  %v1377_v24 = vld [vmem:[#allocation12 + $0x60] sm:$0xff] }
 0x300   :  { %v1308_v34 = vadd.f32 %v11064_v31, %v1296_v35  ;;  %8900 = vmatmul.mubr.f32.vlgmr.msra.gmra.mrb[8].mxu0 %v1393_v33  ;;  %v11105_v36 = vsel %vm250_vm0, %v1314_v11, %v1328_v12  ;;  %v1395_v37 = vrot.slane %v11097_v63, 1  ;;  %v1362_v39 = vsel %vm250_vm0, %v1329_v27, %v1350_v46  ;;  %v1373_v27 = vld [vmem:[#allocation12 + $0x40] sm:$0xff]  ;;  %v1374_v46 = vld [vmem:[#allocation12 + $0x48] sm:$0xff]  ;;  %v1380_v33 = vld [vmem:[#allocation12 + $0x78] sm:$0xff] }
 0x301   :  { %v1307_v40 = vadd.f32 %v11064_v31, %v1295_v32  ;;  %9094 = vmatpush3.bf16.msra.mxu0 %v11059_v21  ;;  %v1394_v41 = vrot.slane %v11105_v36, 1  ;;  %v1397_v28 = vrot.slane %v1362_v39, 1  ;;  %v11113_v42 = vsel %vm250_vm0, %v1331_v30, %v1332_v25  ;;  %v1379_v32 = vld [vmem:[#allocation12 + $0x70] sm:$0xff] }
 0x302   :  { %v1335_v43 = vrot.slane %v1308_v34, 7  ;;  %v1352_v18 = vrot.slane %v1308_v34, 5  ;;  %9096 = vmatprep.subr.bf16.mxu0 %v11070_v51  ;;  %v11117_v44 = vsel %vm250_vm0, %v1315_v29, %v1331_v30  ;;  %v1400_v45 = vrot.slane %v11113_v42, 1  ;;  %v1378_v29 = vld [vmem:[#allocation12 + $0x68] sm:$0xff] }
 0x303   :  { %v1316_v47 = vrot.slane %v1307_v40, 1  ;;  %v1334_v48 = vrot.slane %v1307_v40, 7  ;;  %v1396_v31 = vsel %vm297_vm2, %v1394_v41, %v1395_v37  ;;  %v1398_v21 = vsel %vm297_vm2, %v1395_v37, %v1397_v28  ;;  %v1673_v37 = vld [vmem:[#allocation12 + $0x100] sm:$0xff]  ;;  %v1676_v41 = vld [vmem:[#allocation12 + $0x118] sm:$0xff] }
 0x304   :  { %8902 = vmatprep.mubr.f32.mxu0 %v1396_v31  ;;  %v1399_v49 = vrot.slane %v11117_v44, 1  ;;  %v1363_v53 = vsel %vm250_vm0, %v1332_v25, %v1351_v26  ;;  %v1364_v38 = vsel %vm250_vm0, %v1335_v43, %v1352_v18  ;;  %v1644_v54 = vrot.slane %v11087_v9, 2  ;;  %v1677_v28 = vld [vmem:[#allocation12 + $0x120] sm:$0xff] }
 0x305   :  { %8903 = vmatmul.mubr.f32.gmra.mrb[10].mxu0 %v1398_v21  ;;  %v1402_v55 = vrot.slane %v1363_v53, 1  ;;  %v11127_v57 = vsel %vm250_vm0, %v1334_v48, %v1335_v43  ;;  %v11130_v58 = vsel %vm250_vm0, %v1316_v47, %v1334_v48  ;;  %v1407_v60 = vrot.slane %v1364_v38, 1  ;;  %v1678_v43 = vld [vmem:[#allocation12 + $0x128] sm:$0xff]  ;;  %v1680_v47 = vld [vmem:[#allocation12 + $0x138] sm:$0xff]  ;;  %v1681_v31 = vld [vmem:[#allocation12 + $0x140] sm:$0xff] }
 0x306   :  { %9098 = vmatpush3.bf16.msra.mxu0 %v11070_v51  ;;  %v1401_v61 = vsel %vm297_vm2, %v1399_v49, %v1400_v45  ;;  %v1404_v62 = vrot.slane %v11130_v58, 1  ;;  %v1405_v0 = vrot.slane %v11127_v57, 1  ;;  %v1645_v1 = vrot.slane %v11084_v8, 2  ;;  %v1682_v21 = vld [vmem:[#allocation12 + $0x148] sm:$0xff]  ;;  %v1684_v49 = vld [vmem:[#allocation12 + $0x158] sm:$0xff] }
 0x307   :  { %8905 = vmatprep.mubr.f32.mxu0 %v1401_v61  ;;  %9100 = vmatprep.subr.bf16.mxu0 %v11072_v52  ;;  %v1403_v23 = vsel %vm297_vm2, %v1400_v45, %v1402_v55  ;;  %v1647_v2 = vrot.slane %v11078_v3, 2  ;;  %v1649_v5 = vrot.slane %v11105_v36, 2  ;;  %v1650_v6 = vrot.slane %v11097_v63, 2  ;;  %v1679_v45 = vld [vmem:[#allocation12 + $0x130] sm:$0xff] }
 0x308   :  { %v1406_v51 = vsel %vm297_vm2, %v1404_v62, %v1405_v0  ;;  %v1408_v7 = vsel %vm297_vm2, %v1405_v0, %v1407_v60  ;;  %v11145_v59 = vsel %vm564_vm3, %v1644_v54, %v1645_v1  ;;  %v1652_v50 = vrot.slane %v1362_v39, 2  ;;  %v1674_v39 = vld [vmem:[#allocation12 + $0x108] sm:$0xff]  ;;  %v1688_v54 = vld [vmem:[#allocation12 + $0x178] sm:$0xff]  ;;  %v9247_v61 = vld [vmem:[#allocation15 + $0x2c] ss:$16 sps:$4 sm:$0xff]  }
 0x309   :  { %8906 = vmatmul.mubr.f32.gmra.mrb[12].mxu0 %v1403_v23  ;;  %v11148_v10 = vsel %vm564_vm3, %v1645_v1, %v1647_v2  ;;  %v11151_v3 = vsel %vm564_vm3, %v1649_v5, %v1650_v6  ;;  %v1654_v11 = vrot.slane %v11117_v44, 2  ;;  %v1655_v12 = vrot.slane %v11113_v42, 2  ;;  %v9244_v60 = vld [vmem:[#allocation15 + $0x124] ss:$16 sps:$4 sm:$0xff]   ;;  %v9242_v62 = vld [vmem:[#allocation15 + $0x120] ss:$16 sps:$4 sm:$0xff]  }
 0x30a   :  { %9102 = vmatpush3.bf16.msra.mxu0 %v11072_v52  ;;  %8908 = vmatprep.mubr.f32.mxu0 %v1406_v51  ;;  %v11157_v13 = vsel %vm564_vm3, %v1650_v6, %v1652_v50  ;;  %v1657_v14 = vrot.slane %v1363_v53, 2  ;;  %v1659_v56 = vrot.slane %v11130_v58, 2  ;;  %v1660_v15 = vrot.slane %v11127_v57, 2  ;;  %v1686_v53 = vld [vmem:[#allocation12 + $0x168] sm:$0xff]  ;;  %v9253_v23 = vld [vmem:[#allocation15 + $0x4c] ss:$16 sps:$4 sm:$0xff]  }
 0x30b   :  { %9104 = vmatprep.subr.bf16.mxu0 %v11080_v4  ;;  %v9107_v16 = vpack.c.bf16 %v1374_v46, %v1373_v27  ;;  %v11163_v17 = vsel %vm564_vm3, %v1654_v11, %v1655_v12  ;;  %v1662_v19 = vrot.slane %v1364_v38, 2  ;;  %v9111_v35 = vpack.c.bf16 %v1376_v22, %v1375_v20  ;;  %v9245_v0 = vld [vmem:[#allocation15 + $0x28] ss:$16 sps:$4 sm:$0xff]   ;;  %2099 = vmatprep.subr.bf16.mxu1 %v9244_v60  ;;  %v9250_v1 = vld [vmem:[#allocation15 + $0x144] ss:$16 sps:$4 sm:$0xff]  }
 0x30c   :  { %v11166_v52 = vsel %vm564_vm3, %v1655_v12, %v1657_v14  ;;  %v11169_v25 = vsel %vm564_vm3, %v1659_v56, %v1660_v15  ;;  %v9115_v30 = vpack.c.bf16 %v1378_v29, %v1377_v24  ;;  %v9119_v34 = vpack.c.bf16 %v1380_v33, %v1379_v32  ;;  %2100 = vmatpush1.bf16.msra.mxu1 %v9242_v62  ;;  %v9248_v2 = vld [vmem:[#allocation15 + $0x140] ss:$16 sps:$4 sm:$0xff]   ;;  %v9251_v5 = vld [vmem:[#allocation15 + $0x48] ss:$16 sps:$4 sm:$0xff]   ;;  %v9256_v6 = vld [vmem:[#allocation15 + $0x164] ss:$16 sps:$4 sm:$0xff]  }
 0x30d   :  { %8909 = vmatmul.mubr.f32.gmra.mrb[14].mxu0 %v1408_v7  ;;  %v11172_v26 = vsel %vm564_vm3, %v1660_v15, %v1662_v19  ;;  %v9123_v40 = vpack.c.bf16 %v1674_v39, %v1673_v37  ;;  %v9131_v18 = vpack.c.bf16 %v1678_v43, %v1677_v28  ;;  %v9135_v48 = vpack.c.bf16 %v1680_v47, %v1679_v45  ;;  %v9259_v51 = vld [vmem:[#allocation15 + $0x6c] ss:$16 sps:$4 sm:$0xff]   ;;  %v9254_v7 = vld [vmem:[#allocation15 + $0x160] ss:$16 sps:$4 sm:$0xff]   ;;  %v9257_v27 = vld [vmem:[#allocation15 + $0x68] ss:$16 sps:$4 sm:$0xff]  }
 0x30e   :  { %9106 = vmatpush3.bf16.msra.mxu0 %v11080_v4  ;;  %8943 = vmatprep.mubr.f32.mxu0 %v11087_v9  ;;  %v1675_v4 = vld [vmem:[#allocation12 + $0x110] sm:$0xff]  ;;  %v9262_v46 = vld [vmem:[#allocation15 + $0x184] ss:$16 sps:$4 sm:$0xff]   ;;  %v9269_v12 = vld [vmem:[#allocation15 + $0xa8] ss:$16 sps:$4 sm:$0xff]   ;;  %v10572_v20 = vmov 0  }
 0x30f   :  { %9108 = vmatprep.subr.bf16.mxu0 %v9107_v16  ;;  %v9127_v9 = vpack.c.bf16 %v1676_v41, %v1675_v4  ;;  %2101 = vmatprep.subr.bf16.mxu1 %v9250_v1  ;;  %v9260_v50 = vld [vmem:[#allocation15 + $0x180] ss:$16 sps:$4 sm:$0xff]   ;;  %v9274_v14 = vld [vmem:[#allocation15 + $0x1c4] ss:$16 sps:$4 sm:$0xff]   ;;  %v9277_v56 = vld [vmem:[#allocation15 + $0xcc] ss:$16 sps:$4 sm:$0xff]  }
 0x310   :  { %2102 = vmatpush1.bf16.msra.mxu1 %v9248_v2  ;;  %v9266_v11 = vld [vmem:[#allocation15 + $0x1a0] ss:$16 sps:$4 sm:$0xff]   ;;  %v9283_v19 = vld [vmem:[#allocation15 + $0xec] ss:$16 sps:$4 sm:$0xff]   ;;  %2129 = vmatprep.mubr.bf16.mxu1 %v10572_v20 }
 0x311   :  { %2103 = vmatprep.subr.bf16.mxu1 %v9256_v6  ;;  %v9272_v15 = vld [vmem:[#allocation15 + $0x1c0] ss:$16 sps:$4 sm:$0xff]   ;;  %v7866_v32 = vld [vmem:[#allocation13 + $0x1] ss:$0 sm:$0xff]  ;;  %v7867_v37 = vld [vmem:[#allocation13 + $0x2] ss:$0 sm:$0xff] }
 0x312   :  { %9110 = vmatpush3.bf16.msra.mxu0 %v9107_v16  ;;  %v9275_v16 = vld [vmem:[#allocation15 + $0xc8] ss:$16 sps:$4 sm:$0xff]   ;;  %v9278_v22 = vld [vmem:[#allocation15 + $0x1e0] ss:$16 sps:$4 sm:$0xff]  }
 0x313   :  { %9112 = vmatprep.subr.bf16.mxu0 %v9111_v35 }
 0x314   :  { %2104 = vmatpush1.bf16.msra.mxu1 %v9254_v7 }
 0x315   :  { %2105 = vmatprep.subr.bf16.mxu1 %v9262_v46 }
 0x316   :  { %9114 = vmatpush3.bf16.msra.mxu0 %v9111_v35  ;;  %v7865_v35 = vld [vmem:[#allocation13] ss:$0 sm:$0xff] }
 0x317   :  { %9116 = vmatprep.subr.bf16.mxu0 %v9115_v30 }
 0x318   :  { %2106 = vmatpush1.bf16.msra.mxu1 %v9260_v50 }
 0x31a   :  { %9118 = vmatpush3.bf16.msra.mxu0 %v9115_v30 }
 0x31b   :  { %9120 = vmatprep.subr.bf16.mxu0 %v9119_v34 }
 0x31e   :  { %9122 = vmatpush3.bf16.msra.mxu0 %v9119_v34 }
 0x31f   :  { %9124 = vmatprep.subr.bf16.mxu0 %v9123_v40 }
 0x321   :  { %8944 = vmatmul.mubr.f32.vlgmr.msra.gmra.mrb[8].mxu0 %v11084_v8  ;;  %v9139_v8 = vpack.c.bf16 %v1682_v21, %v1681_v31 }
 0x322   :  { %8946 = vmatprep.mubr.f32.mxu0 %v11105_v36  ;;  %9126 = vmatpush3.bf16.msra.mxu0 %v9123_v40  ;;  %v1683_v36 = vld [vmem:[#allocation12 + $0x150] sm:$0xff] }
 0x323   :  { %9128 = vmatprep.subr.bf16.mxu0 %v9127_v9 }
 0x325   :  { %8947 = vmatmul.mubr.f32.gmra.mrb[10].mxu0 %v11097_v63  ;;  %v9143_v63 = vpack.c.bf16 %v1684_v49, %v1683_v36 }
 0x326   :  { %8949 = vmatprep.mubr.f32.mxu0 %v11117_v44  ;;  %9130 = vmatpush3.bf16.msra.mxu0 %v9127_v9  ;;  %v1685_v44 = vld [vmem:[#allocation12 + $0x160] sm:$0xff] }
 0x327   :  { %9132 = vmatprep.subr.bf16.mxu0 %v9131_v18  ;;  %v9147_v38 = vpack.c.bf16 %v1686_v53, %v1685_v44 }
 0x329   :  { %8950 = vmatmul.mubr.f32.gmra.mrb[12].mxu0 %v11113_v42  ;;  %v1687_v42 = vld [vmem:[#allocation12 + $0x170] sm:$0xff] }
 0x32a   :  { %8952 = vmatprep.mubr.f32.mxu0 %v11130_v58  ;;  %9134 = vmatpush3.bf16.msra.mxu0 %v9131_v18  ;;  %v9151_v55 = vpack.c.bf16 %v1688_v54, %v1687_v42  ;;  %v9241_v58 = vld [vmem:[#allocation15 + $0xc] ss:$16 sps:$4 sm:$0xff]  }
 0x32b   :  { %9136 = vmatprep.subr.bf16.mxu0 %v9135_v48 }
 0x32d   :  { %8953 = vmatmul.mubr.f32.gmra.mrb[14].mxu0 %v11127_v57  ;;  %v9239_v57 = vld [vmem:[#allocation15 + $0x8] ss:$16 sps:$4 sm:$0xff]  }
 0x32e   :  { %9138 = vmatpush3.bf16.msra.mxu0 %v9135_v48  ;;  %8987 = vmatprep.mubr.f32.mxu0 %v11145_v59  ;;  %v9265_v59 = vld [vmem:[#allocation15 + $0x8c] ss:$16 sps:$4 sm:$0xff]  }
 0x32f   :  { %9140 = vmatprep.subr.bf16.mxu0 %v9139_v8 }
 0x332   :  { %9142 = vmatpush3.bf16.msra.mxu0 %v9139_v8 }
 0x333   :  { %9144 = vmatprep.subr.bf16.mxu0 %v9143_v63 }
 0x336   :  { %9146 = vmatpush3.bf16.msra.mxu0 %v9143_v63 }
 0x337   :  { %9148 = vmatprep.subr.bf16.mxu0 %v9147_v38 }
 0x33a   :  { %9150 = vmatpush3.bf16.msra.mxu0 %v9147_v38 }
 0x33b   :  { %9152 = vmatprep.subr.bf16.mxu0 %v9151_v55 }
 0x33e   :  { %9154 = vmatpush3.bf16.msra.mxu0 %v9151_v55 }
 0x33f   :  { %2388 = vmatprep.subr.bf16.mxu0 %v9241_v58 }
 0x341   :  { %8988 = vmatmul.mubr.f32.vlgmr.msra.gmra.mrb[8].mxu0 %v11148_v10  ;;  %v9263_v10 = vld [vmem:[#allocation15 + $0x88] ss:$16 sps:$4 sm:$0xff]  }
 0x342   :  { %8990 = vmatprep.mubr.f32.mxu0 %v11151_v3  ;;  %2389 = vmatpush1.bf16.msra.mxu0 %v9239_v57  ;;  %v9268_v3 = vld [vmem:[#allocation15 + $0x1a4] ss:$16 sps:$4 sm:$0xff]  }
 0x343   :  { %2390 = vmatprep.subr.bf16.mxu0 %v9247_v61  ;;  %2107 = vmatprep.subr.bf16.mxu1 %v9268_v3 }
 0x344   :  { %2108 = vmatpush1.bf16.msra.mxu1 %v9266_v11 }
 0x345   :  { %8991 = vmatmul.mubr.f32.gmra.mrb[10].mxu0 %v11157_v13  ;;  %v9271_v13 = vld [vmem:[#allocation15 + $0xac] ss:$16 sps:$4 sm:$0xff]   ;;  %2109 = vmatprep.subr.bf16.mxu1 %v9274_v14 }
 0x346   :  { %8993 = vmatprep.mubr.f32.mxu0 %v11163_v17  ;;  %2391 = vmatpush1.bf16.msra.mxu0 %v9245_v0  ;;  %v9280_v17 = vld [vmem:[#allocation15 + $0x1e4] ss:$16 sps:$4 sm:$0xff]  }
 0x347   :  { %2392 = vmatprep.subr.bf16.mxu0 %v9253_v23 }
 0x348   :  { %2110 = vmatpush1.bf16.msra.mxu1 %v9272_v15 }
 0x349   :  { %8994 = vmatmul.mubr.f32.gmra.mrb[12].mxu0 %v11166_v52  ;;  %v9281_v52 = vld [vmem:[#allocation15 + $0xe8] ss:$16 sps:$4 sm:$0xff]   ;;  %2111 = vmatprep.subr.bf16.mxu1 %v9280_v17 }
 0x34a   :  { %8996 = vmatprep.mubr.f32.mxu0 %v11169_v25  ;;  %2393 = vmatpush1.bf16.msra.mxu0 %v9251_v5  ;;  %v9286_v25 = vld [vmem:[#allocation15 + $0x10c] ss:$16 sps:$4 sm:$0xff]  }
 0x34b   :  { %2394 = vmatprep.subr.bf16.mxu0 %v9259_v51 }
 0x34c   :  { %2112 = vmatpush1.bf16.msra.mxu1 %v9278_v22 }
 0x34d   :  { %8997 = vmatmul.mubr.f32.gmra.mrb[14].mxu0 %v11172_v26  ;;  %v9289_v26 = vld [vmem:[#allocation15 + $0x20c] ss:$16 sps:$4 sm:$0xff]   ;;  %2138 = vmatprep.subr.bf16.mxu1 %v9286_v25 }
 0x34e   :  { %2395 = vmatpush1.bf16.msra.mxu0 %v9257_v27  ;;  %2420 = vmatprep.mubr.bf16.mxu0 %v10572_v20 }
 0x34f   :  { %2396 = vmatprep.subr.bf16.mxu0 %v9265_v59 }
 0x352   :  { %2397 = vmatpush1.bf16.msra.mxu0 %v9263_v10 }
 0x353   :  { %2398 = vmatprep.subr.bf16.mxu0 %v9271_v13 }
 0x356   :  { %2399 = vmatpush1.bf16.msra.mxu0 %v9269_v12 }
 0x357   :  { %2400 = vmatprep.subr.bf16.mxu0 %v9277_v56 }
 0x35a   :  { %2401 = vmatpush1.bf16.msra.mxu0 %v9275_v16 }
 0x35b   :  { %2402 = vmatprep.subr.bf16.mxu0 %v9283_v19 }
 0x35e   :  { %2403 = vmatpush1.bf16.msra.mxu0 %v9281_v52 }
 0x35f   :  { %2671 = vmatprep.subr.bf16.mxu0 %v9289_v26 }
 0x414   :  { %v8989_v24 = vpop.f32.mrb[8].mxu0 }
 0x415   :  { %v1810_v29 = vadd.f32 %v8989_v24, %v7865_v35  ;;  %v1755_v30 = vpop.f32.mrb[9].mxu0 }
 0x416   :  { %v1809_v33 = vadd.f32 %v7865_v35, %v1755_v30 }
 0x417   :  { %v1818_v34 = vmax.f32 %v1810_v29, 0.0 }
 0x418   :  { %v1817_v39 = vmax.f32 %v1809_v33, 0.0  ;;  %v8992_v40 = vpop.f32.mrb[10].mxu0 }
 0x419   :  { %v1830_v4 = vmul.f32 %v7866_v32, %v1818_v34  ;;  %v1812_v41 = vadd.f32 %v8992_v40, %v7865_v35  ;;  %v1765_v9 = vpop.f32.mrb[11].mxu0 }
 0x41a   :  { %v1829_v28 = vmul.f32 %v7866_v32, %v1817_v39  ;;  %v1811_v43 = vadd.f32 %v7865_v35, %v1765_v9 }
 0x41b   :  { %v1842_v18 = vadd.f32 %v7867_v37, %v1830_v4  ;;  %v1820_v45 = vmax.f32 %v1812_v41, 0.0 }
 0x41c   :  { %v1841_v47 = vadd.f32 %v7867_v37, %v1829_v28  ;;  %v1819_v48 = vmax.f32 %v1811_v43, 0.0  ;;  %v8995_v31 = vpop.f32.mrb[12].mxu0 }
 0x41d   :  { %v1832_v21 = vmul.f32 %v7866_v32, %v1820_v45  ;;  %v1814_v8 = vadd.f32 %v8995_v31, %v7865_v35  ;;  %v1775_v36 = vpop.f32.mrb[13].mxu0 }
 0x41e   :  { %v11193_v49 = vpack.c.bf16 %v1842_v18, %v1841_v47  ;;  %v1831_v63 = vmul.f32 %v7866_v32, %v1819_v48  ;;  %v1813_v44 = vadd.f32 %v7865_v35, %v1775_v36 }
 0x41f   :  { %v1844_v53 = vadd.f32 %v7867_v37, %v1832_v21  ;;  %v1822_v38 = vmax.f32 %v1814_v8, 0.0 }
 0x420   :  { %v11196_v42 = vunpack.c.l.b16 %v11193_v49  ;;  %v1843_v54 = vadd.f32 %v7867_v37, %v1831_v63  ;;  %v1821_v55 = vmax.f32 %v1813_v44, 0.0  ;;  %v8998_v58 = vpop.f32.mrb[14].mxu0  ;;  %v9284_v63 = vld [vmem:[#allocation15 + $0x108] ss:$16 sps:$4 sm:$0xff]  }
 0x421   :  { %v1834_v57 = vmul.f32 %v7866_v32, %v1822_v38  ;;  %v1816_v60 = vadd.f32 %v8998_v58, %v7865_v35  ;;  %v1785_v61 = vpop.f32.mrb[15].mxu0  ;;  %v9287_v44 = vld [vmem:[#allocation15 + $0x208] ss:$16 sps:$4 sm:$0xff]  }
 0x422   :  { %v1850_v62 = vpack.c.bf16 %v1844_v53, %v1843_v54  ;;  %v1833_v0 = vmul.f32 %v7866_v32, %v1821_v55  ;;  %v1815_v1 = vadd.f32 %v7865_v35, %v1785_v61  ;;  %v1926_v7 = vrot.slane %v11196_v42, 1  ;;  %v9292_v61 = vld [vmem:[#allocation15 + $0x12c] ss:$16 sps:$4 sm:$0xff]  }
 0x423   :  { %v1846_v23 = vadd.f32 %v7867_v37, %v1834_v57  ;;  %v1824_v2 = vmax.f32 %v1816_v60, 0.0  ;;  %v2462_v46 = vrot.slane %v11196_v42, 2  ;;  %v2749_v59 = vrot.slane %v11196_v42, 3 }
 0x424   :  { %v11198_v5 = vunpack.c.l.b16 %v1850_v62  ;;  %v1845_v6 = vadd.f32 %v7867_v37, %v1833_v0  ;;  %v1823_v51 = vmax.f32 %v1815_v1, 0.0  ;;  %v3036_v50 = vrot.slane %v11196_v42, 4  ;;  %v9295_v0 = vld [vmem:[#allocation15 + $0x22c] ss:$16 sps:$4 sm:$0xff]  }
 0x425   :  { %v1836_v27 = vmul.f32 %v7866_v32, %v1824_v2  ;;  %v3324_v22 = vrot.slane %v11196_v42, 5  ;;  %v3612_v8 = vrot.slane %v11196_v42, 6  ;;  %v11251_v58 = vunpack.c.h.b16 %v1850_v62 }
 0x426   :  { %v1851_v10 = vpack.c.bf16 %v1846_v23, %v1845_v6  ;;  %v1835_v3 = vmul.f32 %v7866_v32, %v1823_v51  ;;  %v1928_v11 = vsel %vm1927_vm5, %v11198_v5, %v1926_v7  ;;  %v2179_v12 = vrot.slane %v11198_v5, 7 }
 0x427   :  { %v1848_v13 = vadd.f32 %v7867_v37, %v1836_v27  ;;  %v2463_v14 = vrot.slane %v11198_v5, 1  ;;  %v2750_v56 = vrot.slane %v11198_v5, 2  ;;  %v3037_v15 = vrot.slane %v11198_v5, 3 }
 0x428   :  { %v11210_v16 = vunpack.c.l.b16 %v1851_v10  ;;  %v1847_v17 = vadd.f32 %v7867_v37, %v1835_v3  ;;  %v2180_v19 = vsel %vm1927_vm5, %v2179_v12, %v11196_v42  ;;  %v3325_v35 = vrot.slane %v11198_v5, 4 }
 0x429   :  { %v2464_v52 = vsel %vm1927_vm5, %v2463_v14, %v2462_v46  ;;  %v2751_v25 = vsel %vm1927_vm5, %v2750_v56, %v2749_v59  ;;  %v3038_v26 = vsel %vm1927_vm5, %v3037_v15, %v3036_v50  ;;  %v3613_v36 = vrot.slane %v11198_v5, 5  ;;  %v9290_v46 = vld [vmem:[#allocation15 + $0x128] ss:$16 sps:$4 sm:$0xff]  }
 0x42a   :  { %v1852_v24 = vpack.c.bf16 %v1848_v13, %v1847_v17  ;;  %v1929_v29 = vrot.slane %v11210_v16, 7  ;;  %v2181_v30 = vrot.slane %v11210_v16, 6  ;;  %v2465_v32 = vsel %vm1930_vm6, %v11210_v16, %v2464_v52  ;;  %v9293_v59 = vld [vmem:[#allocation15 + $0x228] ss:$16 sps:$4 sm:$0xff]  }
 0x42b   :  { %v2752_v33 = vrot.slane %v11210_v16, 1  ;;  %v3039_v34 = vrot.slane %v11210_v16, 2  ;;  %v3326_v37 = vsel %vm1927_vm5, %v3325_v35, %v3324_v22  ;;  %v3327_v39 = vrot.slane %v11210_v16, 3  ;;  %v9299_v22 = vld [vmem:[#allocation15 + $0x248] ss:$16 sps:$4 sm:$0xff]  }
 0x42c   :  { %v11227_v40 = vunpack.c.l.b16 %v1852_v24  ;;  %v1931_v4 = vsel %vm1930_vm6, %v1929_v29, %v1928_v11  ;;  %v2182_v41 = vsel %vm1930_vm6, %v2181_v30, %v2180_v19  ;;  %v3615_v55 = vrot.slane %v11210_v16, 4  ;;  %v9296_v19 = vld [vmem:[#allocation15 + $0x148] ss:$16 sps:$4 sm:$0xff]   ;;  %v9304_v35 = vld [vmem:[#allocation15 + $0x16c] ss:$16 sps:$4 sm:$0xff]  }
 0x42d   :  { %v2753_v9 = vsel %vm1930_vm6, %v2752_v33, %v2751_v25  ;;  %v3040_v28 = vsel %vm1930_vm6, %v3039_v34, %v3038_v26  ;;  %v3328_v43 = vsel %vm1930_vm6, %v3327_v39, %v3326_v37  ;;  %v11260_v23 = vunpack.c.h.b16 %v1851_v10  ;;  %v9298_v10 = vld [vmem:[#allocation15 + $0x14c] ss:$16 sps:$4 sm:$0xff]  }
 0x42e   :  { %v1932_v18 = vrot.slane %v11227_v40, 6  ;;  %v2183_v45 = vrot.slane %v11227_v40, 5  ;;  %v2466_v47 = vrot.slane %v11227_v40, 7  ;;  %v11239_v48 = vsel %vm1933_vm7, %v11227_v40, %v2753_v9  ;;  %v9305_v9 = vld [vmem:[#allocation15 + $0x268] ss:$16 sps:$4 sm:$0xff]  }
 0x42f   :  { %v3041_v31 = vrot.slane %v11227_v40, 1  ;;  %v3329_v21 = vrot.slane %v11227_v40, 2  ;;  %v3614_v6 = vsel %vm1927_vm5, %v3613_v36, %v3612_v8  ;;  %v3617_v51 = vrot.slane %v11227_v40, 3 }
 0x430   :  { %v1934_v53 = vsel %vm1933_vm7, %v1932_v18, %v1931_v4  ;;  %v2184_v38 = vsel %vm1933_vm7, %v2183_v45, %v2182_v41  ;;  %v11248_v54 = vsel %vm1933_vm7, %v2466_v47, %v2465_v32  ;;  %v11268_v62 = vunpack.c.h.b16 %v11193_v49  ;;  %v9301_v49 = vld [vmem:[#allocation15 + $0x24c] ss:$16 sps:$4 sm:$0xff]  }
 0x431   :  { %v11253_v57 = vpack.c.b16 %v1934_v53, %v1934_v53  ;;  %v11255_v60 = vpack.c.b16 %v2184_v38, %v2184_v38  ;;  %v11258_v1 = vsel %vm1933_vm7, %v3041_v31, %v3040_v28  ;;  %v11263_v2 = vsel %vm1933_vm7, %v3329_v21, %v3328_v43  ;;  %v9310_v47 = vld [vmem:[#allocation15 + $0x18c] ss:$16 sps:$4 sm:$0xff]  }
 0x432   :  { %v11270_v7 = vunpack.c.h.b16 %v1852_v24  ;;  %v3616_v27 = vsel %vm1930_vm6, %v3615_v55, %v3614_v6  ;;  %v3900_v3 = vrot.slane %v11196_v42, 7  ;;  %v3901_v11 = vrot.slane %v11198_v5, 6  ;;  %v9307_v24 = vld [vmem:[#allocation15 + $0x26c] ss:$16 sps:$4 sm:$0xff]   ;;  %v9308_v6 = vld [vmem:[#allocation15 + $0x188] ss:$16 sps:$4 sm:$0xff]  }
 0x433   :  { %2130 = vmatmul.mubr.bf16.vlgmr.msra.gmra.mrb[16].mxu1 %v11253_v57  ;;  %2421 = vmatmul.mubr.bf16.vlgmr.msra.gmra.mrb[16].mxu0 %v11255_v60  ;;  %v11276_v50 = vsel %vm1933_vm7, %v3617_v51, %v3616_v27  ;;  %v3903_v12 = vrot.slane %v11210_v16, 5  ;;  %v3905_v13 = vrot.slane %v11227_v40, 4  ;;  %v4192_v14 = vrot.slane %v11251_v58, 7  ;;  %v9302_v40 = vld [vmem:[#allocation15 + $0x168] ss:$16 sps:$4 sm:$0xff]  }
 0x434   :  { %2139 = vmatpush1.bf16.msra.mxu1 %v9284_v63  ;;  %2672 = vmatpush1.bf16.msra.mxu0 %v9287_v44  ;;  %v4194_v56 = vrot.slane %v11260_v23, 6  ;;  %v3902_v15 = vsel %vm1927_vm5, %v3901_v11, %v3900_v3  ;;  %v4196_v17 = vrot.slane %v11270_v7, 5  ;;  %v4479_v42 = vrot.slane %v11268_v62, 1  ;;  %v9313_v31 = vld [vmem:[#allocation15 + $0x28c] ss:$16 sps:$4 sm:$0xff]  }
 0x435   :  { %2140 = vmatprep.subr.bf16.mxu1 %v9292_v61  ;;  %2673 = vmatprep.subr.bf16.mxu0 %v9295_v0  ;;  %v4481_v5 = vrot.slane %v11260_v23, 7  ;;  %v3904_v16 = vsel %vm1930_vm6, %v3903_v12, %v3902_v15  ;;  %v4193_v52 = vsel %vm1927_vm5, %v4192_v14, %v11268_v62  ;;  %v4483_v25 = vrot.slane %v11270_v7, 6  ;;  %v9311_v51 = vld [vmem:[#allocation15 + $0x288] ss:$16 sps:$4 sm:$0xff]   ;;  %v9319_v3 = vld [vmem:[#allocation15 + $0x2ac] ss:$16 sps:$4 sm:$0xff]  }
 0x436   :  { %2170 = vmatprep.mubr.bf16.mxu1 %v10572_v20  ;;  %2703 = vmatprep.mubr.bf16.mxu0 %v10572_v20  ;;  %v4766_v26 = vrot.slane %v11268_v62, 2  ;;  %v11296_v29 = vsel %vm1933_vm7, %v3905_v13, %v3904_v16  ;;  %v4195_v30 = vsel %vm1930_vm6, %v4194_v56, %v4193_v52  ;;  %v4480_v32 = vsel %vm1927_vm5, %v11251_v58, %v4479_v42  ;;  %v9317_v16 = vld [vmem:[#allocation15 + $0x2a8] ss:$16 sps:$4 sm:$0xff]  }
 0x437   :  { %v4767_v33 = vrot.slane %v11251_v58, 1  ;;  %v11303_v34 = vsel %vm1933_vm7, %v4196_v17, %v4195_v30  ;;  %v4482_v37 = vsel %vm1930_vm6, %v4481_v5, %v4480_v32  ;;  %v4770_v39 = vrot.slane %v11270_v7, 7 }
 0x438   :  { %2141 = vmatpush1.bf16.msra.mxu1 %v9290_v46  ;;  %2674 = vmatpush1.bf16.msra.mxu0 %v9293_v59  ;;  %v11308_v4 = vsel %vm1933_vm7, %v4483_v25, %v4482_v37  ;;  %v5053_v43 = vrot.slane %v11268_v62, 3  ;;  %v5054_v18 = vrot.slane %v11251_v58, 2  ;;  %v5056_v45 = vrot.slane %v11260_v23, 1  ;;  %v9328_v37 = vld [vmem:[#allocation15 + $0x1ec] ss:$16 sps:$4 sm:$0xff]  }
 0x439   :  { %2142 = vmatprep.subr.bf16.mxu1 %v9298_v10  ;;  %2675 = vmatprep.subr.bf16.mxu0 %v9301_v49  ;;  %v4768_v41 = vsel %vm1927_vm5, %v4767_v33, %v4766_v26  ;;  %v5340_v8 = vrot.slane %v11268_v62, 4  ;;  %v5341_v36 = vrot.slane %v11251_v58, 3  ;;  %v5343_v44 = vrot.slane %v11260_v23, 2  ;;  %v9316_v49 = vld [vmem:[#allocation15 + $0x1ac] ss:$16 sps:$4 sm:$0xff]  }
 0x43a   :  { %v4769_v28 = vsel %vm1930_vm6, %v11260_v23, %v4768_v41  ;;  %v5055_v63 = vsel %vm1927_vm5, %v5054_v18, %v5053_v43  ;;  %v5345_v53 = vrot.slane %v11270_v7, 1  ;;  %v5628_v61 = vrot.slane %v11268_v62, 5  ;;  %v9329_v41 = vld [vmem:[#allocation15 + $0x2e8] ss:$16 sps:$4 sm:$0xff]   ;;  %v9332_v43 = vld [vmem:[#allocation15] ss:$16 sps:$4 sm:$0xff]  }
 0x43b   :  { %v11317_v21 = vsel %vm1933_vm7, %v4770_v39, %v4769_v28  ;;  %v5057_v38 = vsel %vm1930_vm6, %v5056_v45, %v5055_v63  ;;  %v5342_v55 = vsel %vm1927_vm5, %v5341_v36, %v5340_v8  ;;  %v5629_v0 = vrot.slane %v11251_v58, 4  ;;  %v9331_v39 = vld [vmem:[#allocation15 + $0x2ec] ss:$16 sps:$4 sm:$0xff]   ;;  %v9335_v18 = vld [vmem:[#allocation15 + $0x308] ss:$16 sps:$4 sm:$0xff]  }
 0x43c   :  { %2143 = vmatpush1.bf16.msra.mxu1 %v9296_v19  ;;  %2676 = vmatpush1.bf16.msra.mxu0 %v9299_v22  ;;  %v11330_v27 = vsel %vm1933_vm7, %v11270_v7, %v5057_v38  ;;  %v5344_v46 = vsel %vm1930_vm6, %v5343_v44, %v5342_v55  ;;  %v5631_v59 = vrot.slane %v11260_v23, 3  ;;  %v5633_v10 = vrot.slane %v11270_v7, 2  ;;  %v9314_v22 = vld [vmem:[#allocation15 + $0x1a8] ss:$16 sps:$4 sm:$0xff]   ;;  %v9337_v28 = vld [vmem:[#allocation15 + $0x30c] ss:$16 sps:$4 sm:$0xff]  }
 0x43d   :  { %2144 = vmatprep.subr.bf16.mxu1 %v9304_v35  ;;  %2677 = vmatprep.subr.bf16.mxu0 %v9307_v24  ;;  %v11336_v11 = vsel %vm1933_vm7, %v5345_v53, %v5344_v46  ;;  %v5630_v12 = vsel %vm1927_vm5, %v5629_v0, %v5628_v61  ;;  %v5916_v14 = vrot.slane %v11268_v62, 6  ;;  %v5917_v56 = vrot.slane %v11251_v58, 5  ;;  %v9322_v35 = vld [vmem:[#allocation15 + $0x1cc] ss:$16 sps:$4 sm:$0xff]   ;;  %v9338_v8 = vld [vmem:[#allocation15 + $0x20] ss:$16 sps:$4 sm:$0xff]  }
 0x43e   :  { %v5632_v13 = vsel %vm1930_vm6, %v5631_v59, %v5630_v12  ;;  %v5919_v15 = vrot.slane %v11260_v23, 4  ;;  %v5921_v42 = vrot.slane %v11270_v7, 3  ;;  %v6204_v5 = vrot.slane %v11268_v62, 7  ;;  %v9325_v24 = vld [vmem:[#allocation15 + $0x2cc] ss:$16 sps:$4 sm:$0xff]  }
 0x43f   :  { %v11344_v17 = vsel %vm1933_vm7, %v5633_v10, %v5632_v13  ;;  %v6205_v19 = vrot.slane %v11251_v58, 6  ;;  %v5918_v52 = vsel %vm1927_vm5, %v5917_v56, %v5916_v14  ;;  %v6207_v25 = vrot.slane %v11260_v23, 5  ;;  %v9320_v23 = vld [vmem:[#allocation15 + $0x1c8] ss:$16 sps:$4 sm:$0xff]   ;;  %v9346_v63 = vld [vmem:[#allocation15 + $0x44] ss:$16 sps:$4 sm:$0xff]  }
 0x440   :  { %2145 = vmatpush1.bf16.msra.mxu1 %v9302_v40  ;;  %2678 = vmatpush1.bf16.msra.mxu0 %v9305_v9  ;;  %v6209_v26 = vrot.slane %v11270_v7, 4  ;;  %v5920_v30 = vsel %vm1930_vm6, %v5919_v15, %v5918_v52  ;;  %v9323_v7 = vld [vmem:[#allocation15 + $0x2c8] ss:$16 sps:$4 sm:$0xff]   ;;  %v9334_v9 = vld [vmem:[#allocation15 + $0x4] ss:$16 sps:$4 sm:$0xff]   ;;  %v11363_v45 = vpack.c.b16 %v11248_v54, %v11248_v54 }
 0x441   :  { %2146 = vmatprep.subr.bf16.mxu1 %v9310_v47  ;;  %2679 = vmatprep.subr.bf16.mxu0 %v9313_v31  ;;  %v6206_v62 = vsel %vm1927_vm5, %v6205_v19, %v6204_v5  ;;  %v11355_v58 = vsel %vm1933_vm7, %v5921_v42, %v5920_v30  ;;  %v9326_v40 = vld [vmem:[#allocation15 + $0x1e8] ss:$16 sps:$4 sm:$0xff]   ;;  %v9340_v47 = vld [vmem:[#allocation15 + $0x24] ss:$16 sps:$4 sm:$0xff]   ;;  %v9343_v31 = vld [vmem:[#allocation15 + $0x32c] ss:$16 sps:$4 sm:$0xff]  }
 0x442   :  { %v6208_v32 = vsel %vm1930_vm6, %v6207_v25, %v6206_v62  ;;  %v9341_v36 = vld [vmem:[#allocation15 + $0x328] ss:$16 sps:$4 sm:$0xff]   ;;  %v9349_v44 = vld [vmem:[#allocation15 + $0x34c] ss:$16 sps:$4 sm:$0xff]   ;;  %v9344_v54 = vld [vmem:[#allocation15 + $0x40] ss:$16 sps:$4 sm:$0xff]  }
 0x443   :  { %v11359_v33 = vsel %vm1933_vm7, %v6209_v26, %v6208_v32  ;;  %v9347_v53 = vld [vmem:[#allocation15 + $0x348] ss:$16 sps:$4 sm:$0xff]   ;;  %v9355_v38 = vld [vmem:[#allocation15 + $0x36c] ss:$16 sps:$4 sm:$0xff]   ;;  %v9350_v55 = vld [vmem:[#allocation15 + $0x60] ss:$16 sps:$4 sm:$0xff]   ;;  %v11371_v26 = vpack.c.b16 %v11239_v48, %v11239_v48 }
 0x444   :  { %2147 = vmatpush1.bf16.msra.mxu1 %v9308_v6  ;;  %2680 = vmatpush1.bf16.msra.mxu0 %v9311_v51  ;;  %v9353_v61 = vld [vmem:[#allocation15 + $0x368] ss:$16 sps:$4 sm:$0xff]   ;;  %v9358_v0 = vld [vmem:[#allocation15 + $0x84] ss:$16 sps:$4 sm:$0xff]   ;;  %v9361_v6 = vld [vmem:[#allocation15 + $0x38c] ss:$16 sps:$4 sm:$0xff]  }
 0x445   :  { %2148 = vmatprep.subr.bf16.mxu1 %v9316_v49  ;;  %2681 = vmatprep.subr.bf16.mxu0 %v9319_v3  ;;  %v9356_v51 = vld [vmem:[#allocation15 + $0x80] ss:$16 sps:$4 sm:$0xff]   ;;  %v9359_v46 = vld [vmem:[#allocation15 + $0x388] ss:$16 sps:$4 sm:$0xff]   ;;  %v9364_v59 = vld [vmem:[#allocation15 + $0xa4] ss:$16 sps:$4 sm:$0xff]  }
 0x446   :  { %v9367_v10 = vld [vmem:[#allocation15 + $0x3ac] ss:$16 sps:$4 sm:$0xff]   ;;  %v9362_v49 = vld [vmem:[#allocation15 + $0xa0] ss:$16 sps:$4 sm:$0xff]   ;;  %v9365_v3 = vld [vmem:[#allocation15 + $0x3a8] ss:$16 sps:$4 sm:$0xff]  }
 0x447   :  { %v9370_v12 = vld [vmem:[#allocation15 + $0xc4] ss:$16 sps:$4 sm:$0xff]   ;;  %v9373_v13 = vld [vmem:[#allocation15 + $0x3cc] ss:$16 sps:$4 sm:$0xff]   ;;  %v9368_v14 = vld [vmem:[#allocation15 + $0xc0] ss:$16 sps:$4 sm:$0xff]  }
 0x448   :  { %2149 = vmatpush1.bf16.msra.mxu1 %v9314_v22  ;;  %2682 = vmatpush1.bf16.msra.mxu0 %v9317_v16  ;;  %v9371_v56 = vld [vmem:[#allocation15 + $0x3c8] ss:$16 sps:$4 sm:$0xff]   ;;  %v9376_v15 = vld [vmem:[#allocation15 + $0xe4] ss:$16 sps:$4 sm:$0xff]   ;;  %v9379_v42 = vld [vmem:[#allocation15 + $0x3ec] ss:$16 sps:$4 sm:$0xff]  }
 0x449   :  { %2150 = vmatprep.subr.bf16.mxu1 %v9322_v35  ;;  %2683 = vmatprep.subr.bf16.mxu0 %v9325_v24  ;;  %v9374_v5 = vld [vmem:[#allocation15 + $0xe0] ss:$16 sps:$4 sm:$0xff]   ;;  %v9377_v19 = vld [vmem:[#allocation15 + $0x3e8] ss:$16 sps:$4 sm:$0xff]   ;;  %v9382_v22 = vld [vmem:[#allocation15 + $0x204] ss:$16 sps:$4 sm:$0xff]  }
 0x44a   :  { %v9385_v16 = vld [vmem:[#allocation15 + $0x40c] ss:$16 sps:$4 sm:$0xff]   ;;  %v9380_v52 = vld [vmem:[#allocation15 + $0x200] ss:$16 sps:$4 sm:$0xff]   ;;  %v9383_v25 = vld [vmem:[#allocation15 + $0x408] ss:$16 sps:$4 sm:$0xff]  }
 0x44b   :  { %v9388_v35 = vld [vmem:[#allocation15 + $0x224] ss:$16 sps:$4 sm:$0xff]   ;;  %v9391_v24 = vld [vmem:[#allocation15 + $0x42c] ss:$16 sps:$4 sm:$0xff]   ;;  %v9386_v30 = vld [vmem:[#allocation15 + $0x220] ss:$16 sps:$4 sm:$0xff]  }
 0x44c   :  { %2151 = vmatpush1.bf16.msra.mxu1 %v9320_v23  ;;  %2684 = vmatpush1.bf16.msra.mxu0 %v9323_v7  ;;  %v9389_v62 = vld [vmem:[#allocation15 + $0x428] ss:$16 sps:$4 sm:$0xff]   ;;  %v9394_v32 = vld [vmem:[#allocation15 + $0x244] ss:$16 sps:$4 sm:$0xff]   ;;  %v9397_v23 = vld [vmem:[#allocation15 + $0x44c] ss:$16 sps:$4 sm:$0xff]  }
 0x44d   :  { %2152 = vmatprep.subr.bf16.mxu1 %v9328_v37  ;;  %2685 = vmatprep.subr.bf16.mxu0 %v9331_v39  ;;  %v9392_v48 = vld [vmem:[#allocation15 + $0x240] ss:$16 sps:$4 sm:$0xff]   ;;  %v9395_v7 = vld [vmem:[#allocation15 + $0x448] ss:$16 sps:$4 sm:$0xff]   ;;  %v9403_v37 = vld [vmem:[#allocation15 + $0x46c] ss:$16 sps:$4 sm:$0xff]  }
 0x44e   :  { %v9398_v39 = vld [vmem:[#allocation15 + $0x260] ss:$16 sps:$4 sm:$0xff]  }
 0x450   :  { %2153 = vmatpush1.bf16.msra.mxu1 %v9326_v40  ;;  %2686 = vmatpush1.bf16.msra.mxu0 %v9329_v41  ;;  %v9401_v40 = vld [vmem:[#allocation15 + $0x468] ss:$16 sps:$4 sm:$0xff]   ;;  %v9406_v41 = vld [vmem:[#allocation15 + $0x284] ss:$16 sps:$4 sm:$0xff]  }
 0x451   :  { %2347 = vmatprep.subr.bf16.mxu1 %v9334_v9  ;;  %2958 = vmatprep.subr.bf16.mxu0 %v9337_v28  ;;  %v9409_v9 = vld [vmem:[#allocation15 + $0x48c] ss:$16 sps:$4 sm:$0xff]   ;;  %v9404_v28 = vld [vmem:[#allocation15 + $0x280] ss:$16 sps:$4 sm:$0xff]  }
 0x453   :  { %2171 = vmatmul.mubr.bf16.vlgmr.msra.gmra.mrb[20].mxu1 %v11253_v57  ;;  %2704 = vmatmul.mubr.bf16.vlgmr.msra.gmra.mrb[20].mxu0 %v11363_v45  ;;  %v9352_v57 = vld [vmem:[#allocation15 + $0x64] ss:$16 sps:$4 sm:$0xff]  }
 0x454   :  { %2348 = vmatpush1.bf16.msra.mxu1 %v9332_v43  ;;  %2959 = vmatpush1.bf16.msra.mxu0 %v9335_v18  ;;  %v9407_v43 = vld [vmem:[#allocation15 + $0x488] ss:$16 sps:$4 sm:$0xff]   ;;  %v9412_v18 = vld [vmem:[#allocation15 + $0x2a4] ss:$16 sps:$4 sm:$0xff]  }
 0x455   :  { %2349 = vmatprep.subr.bf16.mxu1 %v9340_v47  ;;  %2960 = vmatprep.subr.bf16.mxu0 %v9343_v31  ;;  %v9415_v47 = vld [vmem:[#allocation15 + $0x4ac] ss:$16 sps:$4 sm:$0xff]   ;;  %v9410_v31 = vld [vmem:[#allocation15 + $0x2a0] ss:$16 sps:$4 sm:$0xff]  }
 0x456   :  { %2379 = vmatprep.mubr.bf16.mxu1 %v10572_v20  ;;  %2990 = vmatprep.mubr.bf16.mxu0 %v10572_v20 }
 0x458   :  { %2350 = vmatpush1.bf16.msra.mxu1 %v9338_v8  ;;  %2961 = vmatpush1.bf16.msra.mxu0 %v9341_v36  ;;  %v9413_v8 = vld [vmem:[#allocation15 + $0x4a8] ss:$16 sps:$4 sm:$0xff]   ;;  %v9418_v36 = vld [vmem:[#allocation15 + $0x2c4] ss:$16 sps:$4 sm:$0xff]  }
 0x459   :  { %2351 = vmatprep.subr.bf16.mxu1 %v9346_v63  ;;  %2962 = vmatprep.subr.bf16.mxu0 %v9349_v44  ;;  %v9421_v63 = vld [vmem:[#allocation15 + $0x4cc] ss:$16 sps:$4 sm:$0xff]   ;;  %v9416_v44 = vld [vmem:[#allocation15 + $0x2c0] ss:$16 sps:$4 sm:$0xff]  }
 0x45c   :  { %2352 = vmatpush1.bf16.msra.mxu1 %v9344_v54  ;;  %2963 = vmatpush1.bf16.msra.mxu0 %v9347_v53  ;;  %v9419_v54 = vld [vmem:[#allocation15 + $0x4c8] ss:$16 sps:$4 sm:$0xff]   ;;  %v9424_v53 = vld [vmem:[#allocation15 + $0x2e4] ss:$16 sps:$4 sm:$0xff]  }
 0x45d   :  { %2353 = vmatprep.subr.bf16.mxu1 %v9352_v57  ;;  %2964 = vmatprep.subr.bf16.mxu0 %v9355_v38  ;;  %v9427_v57 = vld [vmem:[#allocation15 + $0x4ec] ss:$16 sps:$4 sm:$0xff]   ;;  %v9422_v38 = vld [vmem:[#allocation15 + $0x2e0] ss:$16 sps:$4 sm:$0xff]  }
 0x460   :  { %2354 = vmatpush1.bf16.msra.mxu1 %v9350_v55  ;;  %2965 = vmatpush1.bf16.msra.mxu0 %v9353_v61  ;;  %v9425_v55 = vld [vmem:[#allocation15 + $0x4e8] ss:$16 sps:$4 sm:$0xff]   ;;  %v9430_v61 = vld [vmem:[#allocation15 + $0x304] ss:$16 sps:$4 sm:$0xff]  }
 0x461   :  { %2355 = vmatprep.subr.bf16.mxu1 %v9358_v0  ;;  %2966 = vmatprep.subr.bf16.mxu0 %v9361_v6  ;;  %v9433_v0 = vld [vmem:[#allocation15 + $0x50c] ss:$16 sps:$4 sm:$0xff]   ;;  %v9428_v6 = vld [vmem:[#allocation15 + $0x300] ss:$16 sps:$4 sm:$0xff]  }
 0x464   :  { %2356 = vmatpush1.bf16.msra.mxu1 %v9356_v51  ;;  %2967 = vmatpush1.bf16.msra.mxu0 %v9359_v46  ;;  %v9431_v51 = vld [vmem:[#allocation15 + $0x508] ss:$16 sps:$4 sm:$0xff]   ;;  %v11379_v46 = vpack.c.b16 %v11258_v1, %v11258_v1  ;;  %v9440_v1 = vld [vmem:[#allocation15 + $0x340] ss:$16 sps:$4 sm:$0xff]  }
 0x465   :  { %2357 = vmatprep.subr.bf16.mxu1 %v9364_v59  ;;  %2968 = vmatprep.subr.bf16.mxu0 %v9367_v10  ;;  %v9436_v59 = vld [vmem:[#allocation15 + $0x324] ss:$16 sps:$4 sm:$0xff]   ;;  %v9439_v10 = vld [vmem:[#allocation15 + $0x52c] ss:$16 sps:$4 sm:$0xff]  }
 0x468   :  { %2358 = vmatpush1.bf16.msra.mxu1 %v9362_v49  ;;  %2969 = vmatpush1.bf16.msra.mxu0 %v9365_v3  ;;  %v9434_v49 = vld [vmem:[#allocation15 + $0x320] ss:$16 sps:$4 sm:$0xff]   ;;  %v9437_v3 = vld [vmem:[#allocation15 + $0x528] ss:$16 sps:$4 sm:$0xff]  }
 0x469   :  { %2359 = vmatprep.subr.bf16.mxu1 %v9370_v12  ;;  %2970 = vmatprep.subr.bf16.mxu0 %v9373_v13  ;;  %v9442_v12 = vld [vmem:[#allocation15 + $0x344] ss:$16 sps:$4 sm:$0xff]   ;;  %v9445_v13 = vld [vmem:[#allocation15 + $0x54c] ss:$16 sps:$4 sm:$0xff]  }
 0x46c   :  { %2360 = vmatpush1.bf16.msra.mxu1 %v9368_v14  ;;  %2971 = vmatpush1.bf16.msra.mxu0 %v9371_v56  ;;  %v9443_v14 = vld [vmem:[#allocation15 + $0x548] ss:$16 sps:$4 sm:$0xff]   ;;  %v9451_v56 = vld [vmem:[#allocation15 + $0x56c] ss:$16 sps:$4 sm:$0xff]  }
 0x46d   :  { %2361 = vmatprep.subr.bf16.mxu1 %v9376_v15  ;;  %2972 = vmatprep.subr.bf16.mxu0 %v9379_v42  ;;  %v9446_v15 = vld [vmem:[#allocation15 + $0x360] ss:$16 sps:$4 sm:$0xff]   ;;  %v9449_v42 = vld [vmem:[#allocation15 + $0x568] ss:$16 sps:$4 sm:$0xff]  }
 0x470   :  { %2362 = vmatpush1.bf16.msra.mxu1 %v9374_v5  ;;  %2973 = vmatpush1.bf16.msra.mxu0 %v9377_v19  ;;  %v9454_v5 = vld [vmem:[#allocation15 + $0x384] ss:$16 sps:$4 sm:$0xff]   ;;  %v9457_v19 = vld [vmem:[#allocation15 + $0x58c] ss:$16 sps:$4 sm:$0xff]  }
 0x471   :  { %2630 = vmatprep.subr.bf16.mxu1 %v9382_v22  ;;  %3246 = vmatprep.subr.bf16.mxu0 %v9385_v16  ;;  %v9452_v22 = vld [vmem:[#allocation15 + $0x380] ss:$16 sps:$4 sm:$0xff]   ;;  %v9455_v16 = vld [vmem:[#allocation15 + $0x588] ss:$16 sps:$4 sm:$0xff]  }
 0x473   :  { %2380 = vmatmul.mubr.bf16.vlgmr.msra.gmra.mrb[24].mxu1 %v11255_v60  ;;  %2991 = vmatmul.mubr.bf16.vlgmr.msra.gmra.mrb[24].mxu0 %v11371_v26  ;;  %v9400_v60 = vld [vmem:[#allocation15 + $0x264] ss:$16 sps:$4 sm:$0xff]  }
 0x474   :  { %2631 = vmatpush1.bf16.msra.mxu1 %v9380_v52  ;;  %3247 = vmatpush1.bf16.msra.mxu0 %v9383_v25  ;;  %v9460_v52 = vld [vmem:[#allocation15 + $0x3a4] ss:$16 sps:$4 sm:$0xff]   ;;  %v9463_v25 = vld [vmem:[#allocation15 + $0x5ac] ss:$16 sps:$4 sm:$0xff]  }
 0x475   :  { %2632 = vmatprep.subr.bf16.mxu1 %v9388_v35  ;;  %3248 = vmatprep.subr.bf16.mxu0 %v9391_v24  ;;  %v9458_v35 = vld [vmem:[#allocation15 + $0x3a0] ss:$16 sps:$4 sm:$0xff]   ;;  %v9461_v24 = vld [vmem:[#allocation15 + $0x5a8] ss:$16 sps:$4 sm:$0xff]  }
 0x476   :  { %2662 = vmatprep.mubr.bf16.mxu1 %v10572_v20  ;;  %3278 = vmatprep.mubr.bf16.mxu0 %v10572_v20 }
 0x478   :  { %2633 = vmatpush1.bf16.msra.mxu1 %v9386_v30  ;;  %3249 = vmatpush1.bf16.msra.mxu0 %v9389_v62  ;;  %v9466_v30 = vld [vmem:[#allocation15 + $0x3c4] ss:$16 sps:$4 sm:$0xff]   ;;  %v9469_v62 = vld [vmem:[#allocation15 + $0x5cc] ss:$16 sps:$4 sm:$0xff]  }
 0x479   :  { %2634 = vmatprep.subr.bf16.mxu1 %v9394_v32  ;;  %3250 = vmatprep.subr.bf16.mxu0 %v9397_v23  ;;  %v9464_v32 = vld [vmem:[#allocation15 + $0x3c0] ss:$16 sps:$4 sm:$0xff]   ;;  %v9467_v23 = vld [vmem:[#allocation15 + $0x5c8] ss:$16 sps:$4 sm:$0xff]  }
 0x47c   :  { %2635 = vmatpush1.bf16.msra.mxu1 %v9392_v48  ;;  %3251 = vmatpush1.bf16.msra.mxu0 %v9395_v7  ;;  %v9472_v48 = vld [vmem:[#allocation15 + $0x3e4] ss:$16 sps:$4 sm:$0xff]   ;;  %v9475_v7 = vld [vmem:[#allocation15 + $0x5ec] ss:$16 sps:$4 sm:$0xff]  }
 0x47d   :  { %2636 = vmatprep.subr.bf16.mxu1 %v9400_v60  ;;  %3252 = vmatprep.subr.bf16.mxu0 %v9403_v37  ;;  %v9470_v60 = vld [vmem:[#allocation15 + $0x3e0] ss:$16 sps:$4 sm:$0xff]   ;;  %v9473_v37 = vld [vmem:[#allocation15 + $0x5e8] ss:$16 sps:$4 sm:$0xff]  }
 0x480   :  { %2637 = vmatpush1.bf16.msra.mxu1 %v9398_v39  ;;  %3253 = vmatpush1.bf16.msra.mxu0 %v9401_v40  ;;  %v9478_v39 = vld [vmem:[#allocation15 + $0x404] ss:$16 sps:$4 sm:$0xff]   ;;  %v9481_v40 = vld [vmem:[#allocation15 + $0x60c] ss:$16 sps:$4 sm:$0xff]  }
 0x481   :  { %2638 = vmatprep.subr.bf16.mxu1 %v9406_v41  ;;  %3254 = vmatprep.subr.bf16.mxu0 %v9409_v9  ;;  %v9476_v41 = vld [vmem:[#allocation15 + $0x400] ss:$16 sps:$4 sm:$0xff]   ;;  %v9479_v9 = vld [vmem:[#allocation15 + $0x608] ss:$16 sps:$4 sm:$0xff]  }
 0x484   :  { %2639 = vmatpush1.bf16.msra.mxu1 %v9404_v28  ;;  %3255 = vmatpush1.bf16.msra.mxu0 %v9407_v43  ;;  %v11387_v28 = vpack.c.b16 %v11263_v2, %v11263_v2  ;;  %v9484_v43 = vld [vmem:[#allocation15 + $0x424] ss:$16 sps:$4 sm:$0xff]   ;;  %v9488_v2 = vld [vmem:[#allocation15 + $0x440] ss:$16 sps:$4 sm:$0xff]  }
 0x485   :  { %2640 = vmatprep.subr.bf16.mxu1 %v9412_v18  ;;  %3256 = vmatprep.subr.bf16.mxu0 %v9415_v47  ;;  %v9487_v18 = vld [vmem:[#allocation15 + $0x62c] ss:$16 sps:$4 sm:$0xff]   ;;  %v9482_v47 = vld [vmem:[#allocation15 + $0x420] ss:$16 sps:$4 sm:$0xff]  }
 0x488   :  { %2641 = vmatpush1.bf16.msra.mxu1 %v9410_v31  ;;  %3257 = vmatpush1.bf16.msra.mxu0 %v9413_v8  ;;  %v9485_v31 = vld [vmem:[#allocation15 + $0x628] ss:$16 sps:$4 sm:$0xff]   ;;  %v9490_v8 = vld [vmem:[#allocation15 + $0x444] ss:$16 sps:$4 sm:$0xff]  }
 0x489   :  { %2642 = vmatprep.subr.bf16.mxu1 %v9418_v36  ;;  %3258 = vmatprep.subr.bf16.mxu0 %v9421_v63  ;;  %v9493_v36 = vld [vmem:[#allocation15 + $0x64c] ss:$16 sps:$4 sm:$0xff]   ;;  %v9491_v63 = vld [vmem:[#allocation15 + $0x648] ss:$16 sps:$4 sm:$0xff]  }
 0x48c   :  { %2643 = vmatpush1.bf16.msra.mxu1 %v9416_v44  ;;  %3259 = vmatpush1.bf16.msra.mxu0 %v9419_v54  ;;  %v9499_v44 = vld [vmem:[#allocation15 + $0x66c] ss:$16 sps:$4 sm:$0xff]   ;;  %v9494_v54 = vld [vmem:[#allocation15 + $0x460] ss:$16 sps:$4 sm:$0xff]  }
 0x48d   :  { %2644 = vmatprep.subr.bf16.mxu1 %v9424_v53  ;;  %3260 = vmatprep.subr.bf16.mxu0 %v9427_v57  ;;  %v9497_v53 = vld [vmem:[#allocation15 + $0x668] ss:$16 sps:$4 sm:$0xff]   ;;  %v9502_v57 = vld [vmem:[#allocation15 + $0x484] ss:$16 sps:$4 sm:$0xff]  }
 0x490   :  { %2645 = vmatpush1.bf16.msra.mxu1 %v9422_v38  ;;  %3261 = vmatpush1.bf16.msra.mxu0 %v9425_v55  ;;  %v9505_v38 = vld [vmem:[#allocation15 + $0x68c] ss:$16 sps:$4 sm:$0xff]   ;;  %v9500_v55 = vld [vmem:[#allocation15 + $0x480] ss:$16 sps:$4 sm:$0xff]  }
 0x491   :  { %2917 = vmatprep.subr.bf16.mxu1 %v9430_v61  ;;  %3534 = vmatprep.subr.bf16.mxu0 %v9433_v0  ;;  %v9503_v61 = vld [vmem:[#allocation15 + $0x688] ss:$16 sps:$4 sm:$0xff]   ;;  %v9508_v0 = vld [vmem:[#allocation15 + $0x4a4] ss:$16 sps:$4 sm:$0xff]  }
 0x493   :  { %2663 = vmatmul.mubr.bf16.vlgmr.msra.gmra.mrb[28].mxu1 %v11363_v45  ;;  %3279 = vmatmul.mubr.bf16.vlgmr.msra.gmra.mrb[28].mxu0 %v11379_v46  ;;  %v9448_v45 = vld [vmem:[#allocation15 + $0x364] ss:$16 sps:$4 sm:$0xff]  }
 0x494   :  { %2918 = vmatpush1.bf16.msra.mxu1 %v9428_v6  ;;  %3535 = vmatpush1.bf16.msra.mxu0 %v9431_v51  ;;  %v9511_v6 = vld [vmem:[#allocation15 + $0x6ac] ss:$16 sps:$4 sm:$0xff]   ;;  %v9506_v51 = vld [vmem:[#allocation15 + $0x4a0] ss:$16 sps:$4 sm:$0xff]  }
 0x495   :  { %2919 = vmatprep.subr.bf16.mxu1 %v9436_v59  ;;  %3536 = vmatprep.subr.bf16.mxu0 %v9439_v10  ;;  %v9509_v59 = vld [vmem:[#allocation15 + $0x6a8] ss:$16 sps:$4 sm:$0xff]   ;;  %v9514_v10 = vld [vmem:[#allocation15 + $0x4c4] ss:$16 sps:$4 sm:$0xff]  }
 0x496   :  { %2949 = vmatprep.mubr.bf16.mxu1 %v10572_v20  ;;  %3566 = vmatprep.mubr.bf16.mxu0 %v10572_v20 }
 0x498   :  { %2920 = vmatpush1.bf16.msra.mxu1 %v9434_v49  ;;  %3537 = vmatpush1.bf16.msra.mxu0 %v9437_v3  ;;  %v9517_v49 = vld [vmem:[#allocation15 + $0x6cc] ss:$16 sps:$4 sm:$0xff]   ;;  %v9512_v3 = vld [vmem:[#allocation15 + $0x4c0] ss:$16 sps:$4 sm:$0xff]  }
 0x499   :  { %2921 = vmatprep.subr.bf16.mxu1 %v9442_v12  ;;  %3538 = vmatprep.subr.bf16.mxu0 %v9445_v13  ;;  %v9515_v12 = vld [vmem:[#allocation15 + $0x6c8] ss:$16 sps:$4 sm:$0xff]   ;;  %v9520_v13 = vld [vmem:[#allocation15 + $0x4e4] ss:$16 sps:$4 sm:$0xff]  }
 0x49c   :  { %2922 = vmatpush1.bf16.msra.mxu1 %v9440_v1  ;;  %3539 = vmatpush1.bf16.msra.mxu0 %v9443_v14  ;;  %v9523_v1 = vld [vmem:[#allocation15 + $0x6ec] ss:$16 sps:$4 sm:$0xff]   ;;  %v9518_v14 = vld [vmem:[#allocation15 + $0x4e0] ss:$16 sps:$4 sm:$0xff]  }
 0x49d   :  { %2923 = vmatprep.subr.bf16.mxu1 %v9448_v45  ;;  %3540 = vmatprep.subr.bf16.mxu0 %v9451_v56  ;;  %v9521_v45 = vld [vmem:[#allocation15 + $0x6e8] ss:$16 sps:$4 sm:$0xff]   ;;  %v9526_v56 = vld [vmem:[#allocation15 + $0x504] ss:$16 sps:$4 sm:$0xff]  }
 0x4a0   :  { %2924 = vmatpush1.bf16.msra.mxu1 %v9446_v15  ;;  %3541 = vmatpush1.bf16.msra.mxu0 %v9449_v42  ;;  %v9529_v15 = vld [vmem:[#allocation15 + $0x70c] ss:$16 sps:$4 sm:$0xff]   ;;  %v9524_v42 = vld [vmem:[#allocation15 + $0x500] ss:$16 sps:$4 sm:$0xff]  }
 0x4a1   :  { %2925 = vmatprep.subr.bf16.mxu1 %v9454_v5  ;;  %3542 = vmatprep.subr.bf16.mxu0 %v9457_v19  ;;  %v9527_v5 = vld [vmem:[#allocation15 + $0x708] ss:$16 sps:$4 sm:$0xff]   ;;  %v11395_v19 = vpack.c.b16 %v11276_v50, %v11276_v50  ;;  %v9536_v50 = vld [vmem:[#allocation15 + $0x540] ss:$16 sps:$4 sm:$0xff]  }
 0x4a4   :  { %2926 = vmatpush1.bf16.msra.mxu1 %v9452_v22  ;;  %3543 = vmatpush1.bf16.msra.mxu0 %v9455_v16  ;;  %v9532_v22 = vld [vmem:[#allocation15 + $0x524] ss:$16 sps:$4 sm:$0xff]   ;;  %v9535_v16 = vld [vmem:[#allocation15 + $0x72c] ss:$16 sps:$4 sm:$0xff]  }
 0x4a5   :  { %2927 = vmatprep.subr.bf16.mxu1 %v9460_v52  ;;  %3544 = vmatprep.subr.bf16.mxu0 %v9463_v25  ;;  %v9530_v52 = vld [vmem:[#allocation15 + $0x520] ss:$16 sps:$4 sm:$0xff]   ;;  %v9533_v25 = vld [vmem:[#allocation15 + $0x728] ss:$16 sps:$4 sm:$0xff]  }
 0x4a8   :  { %2928 = vmatpush1.bf16.msra.mxu1 %v9458_v35  ;;  %3545 = vmatpush1.bf16.msra.mxu0 %v9461_v24  ;;  %v9538_v35 = vld [vmem:[#allocation15 + $0x544] ss:$16 sps:$4 sm:$0xff]   ;;  %v9541_v24 = vld [vmem:[#allocation15 + $0x74c] ss:$16 sps:$4 sm:$0xff]  }
 0x4a9   :  { %2929 = vmatprep.subr.bf16.mxu1 %v9466_v30  ;;  %3546 = vmatprep.subr.bf16.mxu0 %v9469_v62  ;;  %v9539_v30 = vld [vmem:[#allocation15 + $0x748] ss:$16 sps:$4 sm:$0xff]   ;;  %v9547_v62 = vld [vmem:[#allocation15 + $0x76c] ss:$16 sps:$4 sm:$0xff]  }
 0x4ac   :  { %2930 = vmatpush1.bf16.msra.mxu1 %v9464_v32  ;;  %3547 = vmatpush1.bf16.msra.mxu0 %v9467_v23  ;;  %v9542_v32 = vld [vmem:[#allocation15 + $0x560] ss:$16 sps:$4 sm:$0xff]   ;;  %v9545_v23 = vld [vmem:[#allocation15 + $0x768] ss:$16 sps:$4 sm:$0xff]  }
 0x4ad   :  { %2931 = vmatprep.subr.bf16.mxu1 %v9472_v48  ;;  %3548 = vmatprep.subr.bf16.mxu0 %v9475_v7  ;;  %v9550_v48 = vld [vmem:[#allocation15 + $0x584] ss:$16 sps:$4 sm:$0xff]   ;;  %v9553_v7 = vld [vmem:[#allocation15 + $0x78c] ss:$16 sps:$4 sm:$0xff]  }
 0x4b0   :  { %2932 = vmatpush1.bf16.msra.mxu1 %v9470_v60  ;;  %3549 = vmatpush1.bf16.msra.mxu0 %v9473_v37  ;;  %v9548_v60 = vld [vmem:[#allocation15 + $0x580] ss:$16 sps:$4 sm:$0xff]   ;;  %v9551_v37 = vld [vmem:[#allocation15 + $0x788] ss:$16 sps:$4 sm:$0xff]  }
 0x4b1   :  { %3205 = vmatprep.subr.bf16.mxu1 %v9478_v39  ;;  %3822 = vmatprep.subr.bf16.mxu0 %v9481_v40  ;;  %v9556_v39 = vld [vmem:[#allocation15 + $0x5a4] ss:$16 sps:$4 sm:$0xff]   ;;  %v9559_v40 = vld [vmem:[#allocation15 + $0x7ac] ss:$16 sps:$4 sm:$0xff]  }
 0x4b3   :  { %2950 = vmatmul.mubr.bf16.vlgmr.msra.gmra.mrb[32].mxu1 %v11371_v26  ;;  %3567 = vmatmul.mubr.bf16.vlgmr.msra.gmra.mrb[32].mxu0 %v11387_v28  ;;  %v9496_v26 = vld [vmem:[#allocation15 + $0x464] ss:$16 sps:$4 sm:$0xff]  }
 0x4b4   :  { %3206 = vmatpush1.bf16.msra.mxu1 %v9476_v41  ;;  %3823 = vmatpush1.bf16.msra.mxu0 %v9479_v9  ;;  %v9554_v41 = vld [vmem:[#allocation15 + $0x5a0] ss:$16 sps:$4 sm:$0xff]   ;;  %v9557_v9 = vld [vmem:[#allocation15 + $0x7a8] ss:$16 sps:$4 sm:$0xff]  }
 0x4b5   :  { %3207 = vmatprep.subr.bf16.mxu1 %v9484_v43  ;;  %3824 = vmatprep.subr.bf16.mxu0 %v9487_v18  ;;  %v9562_v43 = vld [vmem:[#allocation15 + $0x5c4] ss:$16 sps:$4 sm:$0xff]   ;;  %v9565_v18 = vld [vmem:[#allocation15 + $0x7cc] ss:$16 sps:$4 sm:$0xff]  }
 0x4b6   :  { %3237 = vmatprep.mubr.bf16.mxu1 %v10572_v20  ;;  %3854 = vmatprep.mubr.bf16.mxu0 %v10572_v20 }
 0x4b8   :  { %3208 = vmatpush1.bf16.msra.mxu1 %v9482_v47  ;;  %3825 = vmatpush1.bf16.msra.mxu0 %v9485_v31  ;;  %v9560_v47 = vld [vmem:[#allocation15 + $0x5c0] ss:$16 sps:$4 sm:$0xff]   ;;  %v9563_v31 = vld [vmem:[#allocation15 + $0x7c8] ss:$16 sps:$4 sm:$0xff]  }
 0x4b9   :  { %3209 = vmatprep.subr.bf16.mxu1 %v9490_v8  ;;  %3826 = vmatprep.subr.bf16.mxu0 %v9493_v36  ;;  %v9568_v8 = vld [vmem:[#allocation15 + $0x5e4] ss:$16 sps:$4 sm:$0xff]   ;;  %v9571_v36 = vld [vmem:[#allocation15 + $0x7ec] ss:$16 sps:$4 sm:$0xff]  }
 0x4bc   :  { %3210 = vmatpush1.bf16.msra.mxu1 %v9488_v2  ;;  %3827 = vmatpush1.bf16.msra.mxu0 %v9491_v63  ;;  %v9566_v2 = vld [vmem:[#allocation15 + $0x5e0] ss:$16 sps:$4 sm:$0xff]   ;;  %v9569_v63 = vld [vmem:[#allocation15 + $0x7e8] ss:$16 sps:$4 sm:$0xff]  }
 0x4bd   :  { %3211 = vmatprep.subr.bf16.mxu1 %v9496_v26  ;;  %3828 = vmatprep.subr.bf16.mxu0 %v9499_v44  ;;  %v9574_v26 = vld [vmem:[#allocation15 + $0x604] ss:$16 sps:$4 sm:$0xff]   ;;  %v9577_v44 = vld [vmem:[#allocation15 + $0x80c] ss:$16 sps:$4 sm:$0xff]  }
 0x4c0   :  { %3212 = vmatpush1.bf16.msra.mxu1 %v9494_v54  ;;  %3829 = vmatpush1.bf16.msra.mxu0 %v9497_v53  ;;  %v9572_v54 = vld [vmem:[#allocation15 + $0x600] ss:$16 sps:$4 sm:$0xff]   ;;  %v9575_v53 = vld [vmem:[#allocation15 + $0x808] ss:$16 sps:$4 sm:$0xff]  }
 0x4c1   :  { %3213 = vmatprep.subr.bf16.mxu1 %v9502_v57  ;;  %3830 = vmatprep.subr.bf16.mxu0 %v9505_v38  ;;  %v11403_v57 = vpack.c.b16 %v11296_v29, %v11296_v29  ;;  %v9580_v38 = vld [vmem:[#allocation15 + $0x624] ss:$16 sps:$4 sm:$0xff]   ;;  %v9584_v29 = vld [vmem:[#allocation15 + $0x640] ss:$16 sps:$4 sm:$0xff]  }
 0x4c4   :  { %3214 = vmatpush1.bf16.msra.mxu1 %v9500_v55  ;;  %3831 = vmatpush1.bf16.msra.mxu0 %v9503_v61  ;;  %v9583_v55 = vld [vmem:[#allocation15 + $0x82c] ss:$16 sps:$4 sm:$0xff]   ;;  %v9578_v61 = vld [vmem:[#allocation15 + $0x620] ss:$16 sps:$4 sm:$0xff]  }
 0x4c5   :  { %3215 = vmatprep.subr.bf16.mxu1 %v9508_v0  ;;  %3832 = vmatprep.subr.bf16.mxu0 %v9511_v6  ;;  %v9581_v0 = vld [vmem:[#allocation15 + $0x828] ss:$16 sps:$4 sm:$0xff]   ;;  %v9586_v6 = vld [vmem:[#allocation15 + $0x644] ss:$16 sps:$4 sm:$0xff]  }
 0x4c8   :  { %3216 = vmatpush1.bf16.msra.mxu1 %v9506_v51  ;;  %3833 = vmatpush1.bf16.msra.mxu0 %v9509_v59  ;;  %v9589_v51 = vld [vmem:[#allocation15 + $0x84c] ss:$16 sps:$4 sm:$0xff]   ;;  %v9587_v59 = vld [vmem:[#allocation15 + $0x848] ss:$16 sps:$4 sm:$0xff]  }
 0x4c9   :  { %3217 = vmatprep.subr.bf16.mxu1 %v9514_v10  ;;  %3834 = vmatprep.subr.bf16.mxu0 %v9517_v49  ;;  %v9595_v10 = vld [vmem:[#allocation15 + $0x86c] ss:$16 sps:$4 sm:$0xff]   ;;  %v9590_v49 = vld [vmem:[#allocation15 + $0x660] ss:$16 sps:$4 sm:$0xff]  }
 0x4cc   :  { %3218 = vmatpush1.bf16.msra.mxu1 %v9512_v3  ;;  %3835 = vmatpush1.bf16.msra.mxu0 %v9515_v12  ;;  %v9593_v3 = vld [vmem:[#allocation15 + $0x868] ss:$16 sps:$4 sm:$0xff]   ;;  %v9598_v12 = vld [vmem:[#allocation15 + $0x684] ss:$16 sps:$4 sm:$0xff]  }
 0x4cd   :  { %3219 = vmatprep.subr.bf16.mxu1 %v9520_v13  ;;  %3836 = vmatprep.subr.bf16.mxu0 %v9523_v1  ;;  %v9601_v13 = vld [vmem:[#allocation15 + $0x88c] ss:$16 sps:$4 sm:$0xff]   ;;  %v9596_v1 = vld [vmem:[#allocation15 + $0x680] ss:$16 sps:$4 sm:$0xff]  }
 0x4d0   :  { %3220 = vmatpush1.bf16.msra.mxu1 %v9518_v14  ;;  %3837 = vmatpush1.bf16.msra.mxu0 %v9521_v45  ;;  %v9599_v14 = vld [vmem:[#allocation15 + $0x888] ss:$16 sps:$4 sm:$0xff]   ;;  %v9604_v45 = vld [vmem:[#allocation15 + $0x6a4] ss:$16 sps:$4 sm:$0xff]  }
 0x4d1   :  { %3493 = vmatprep.subr.bf16.mxu1 %v9526_v56  ;;  %4110 = vmatprep.subr.bf16.mxu0 %v9529_v15  ;;  %v9607_v56 = vld [vmem:[#allocation15 + $0x8ac] ss:$16 sps:$4 sm:$0xff]   ;;  %v9602_v15 = vld [vmem:[#allocation15 + $0x6a0] ss:$16 sps:$4 sm:$0xff]  }
 0x4d3   :  { %3238 = vmatmul.mubr.bf16.vlgmr.msra.gmra.mrb[36].mxu1 %v11379_v46  ;;  %3855 = vmatmul.mubr.bf16.vlgmr.msra.gmra.mrb[36].mxu0 %v11395_v19  ;;  %v9544_v46 = vld [vmem:[#allocation15 + $0x564] ss:$16 sps:$4 sm:$0xff]  }
 0x4d4   :  { %3494 = vmatpush1.bf16.msra.mxu1 %v9524_v42  ;;  %4111 = vmatpush1.bf16.msra.mxu0 %v9527_v5  ;;  %v9605_v42 = vld [vmem:[#allocation15 + $0x8a8] ss:$16 sps:$4 sm:$0xff]   ;;  %v9610_v5 = vld [vmem:[#allocation15 + $0x6c4] ss:$16 sps:$4 sm:$0xff]  }
 0x4d5   :  { %3495 = vmatprep.subr.bf16.mxu1 %v9532_v22  ;;  %4112 = vmatprep.subr.bf16.mxu0 %v9535_v16  ;;  %v9613_v22 = vld [vmem:[#allocation15 + $0x8cc] ss:$16 sps:$4 sm:$0xff]  }
 0x4d6   :  { %3525 = vmatprep.mubr.bf16.mxu1 %v10572_v20  ;;  %4142 = vmatprep.mubr.bf16.mxu0 %v10572_v20 }
 0x4d8   :  { %3496 = vmatpush1.bf16.msra.mxu1 %v9530_v52  ;;  %4113 = vmatpush1.bf16.msra.mxu0 %v9533_v25 }
 0x4d9   :  { %3497 = vmatprep.subr.bf16.mxu1 %v9538_v35  ;;  %4114 = vmatprep.subr.bf16.mxu0 %v9541_v24 }
 0x4dc   :  { %3498 = vmatpush1.bf16.msra.mxu1 %v9536_v50  ;;  %4115 = vmatpush1.bf16.msra.mxu0 %v9539_v30  ;;  %v9608_v30 = vld [vmem:[#allocation15 + $0x6c0] ss:$16 sps:$4 sm:$0xff]  }
 0x4dd   :  { %3499 = vmatprep.subr.bf16.mxu1 %v9544_v46  ;;  %4116 = vmatprep.subr.bf16.mxu0 %v9547_v62  ;;  %v9611_v46 = vld [vmem:[#allocation15 + $0x8c8] ss:$16 sps:$4 sm:$0xff]  }
 0x4e0   :  { %3500 = vmatpush1.bf16.msra.mxu1 %v9542_v32  ;;  %4117 = vmatpush1.bf16.msra.mxu0 %v9545_v23  ;;  %v9616_v23 = vld [vmem:[#allocation15 + $0x6e4] ss:$16 sps:$4 sm:$0xff]  }
 0x4e1   :  { %3501 = vmatprep.subr.bf16.mxu1 %v9550_v48  ;;  %4118 = vmatprep.subr.bf16.mxu0 %v9553_v7  ;;  %v9619_v48 = vld [vmem:[#allocation15 + $0x8ec] ss:$16 sps:$4 sm:$0xff]   ;;  %v9614_v7 = vld [vmem:[#allocation15 + $0x6e0] ss:$16 sps:$4 sm:$0xff]  }
 0x4e4   :  { %3502 = vmatpush1.bf16.msra.mxu1 %v9548_v60  ;;  %4119 = vmatpush1.bf16.msra.mxu0 %v9551_v37  ;;  %v9617_v60 = vld [vmem:[#allocation15 + $0x8e8] ss:$16 sps:$4 sm:$0xff]   ;;  %v9622_v37 = vld [vmem:[#allocation15 + $0x704] ss:$16 sps:$4 sm:$0xff]  }
 0x4e5   :  { %3503 = vmatprep.subr.bf16.mxu1 %v9556_v39  ;;  %4120 = vmatprep.subr.bf16.mxu0 %v9559_v40  ;;  %v9625_v39 = vld [vmem:[#allocation15 + $0x90c] ss:$16 sps:$4 sm:$0xff]   ;;  %v9620_v40 = vld [vmem:[#allocation15 + $0x700] ss:$16 sps:$4 sm:$0xff]  }
 0x4e8   :  { %3504 = vmatpush1.bf16.msra.mxu1 %v9554_v41  ;;  %4121 = vmatpush1.bf16.msra.mxu0 %v9557_v9  ;;  %v9623_v41 = vld [vmem:[#allocation15 + $0x908] ss:$16 sps:$4 sm:$0xff]   ;;  %v11419_v9 = vpack.c.b16 %v11303_v34, %v11303_v34  ;;  %v9632_v34 = vld [vmem:[#allocation15 + $0x740] ss:$16 sps:$4 sm:$0xff]  }
 0x4e9   :  { %3505 = vmatprep.subr.bf16.mxu1 %v9562_v43  ;;  %4122 = vmatprep.subr.bf16.mxu0 %v9565_v18  ;;  %v9628_v43 = vld [vmem:[#allocation15 + $0x724] ss:$16 sps:$4 sm:$0xff]   ;;  %v9631_v18 = vld [vmem:[#allocation15 + $0x92c] ss:$16 sps:$4 sm:$0xff]  }
 0x4ec   :  { %3506 = vmatpush1.bf16.msra.mxu1 %v9560_v47  ;;  %4123 = vmatpush1.bf16.msra.mxu0 %v9563_v31  ;;  %v9626_v47 = vld [vmem:[#allocation15 + $0x720] ss:$16 sps:$4 sm:$0xff]   ;;  %v9629_v31 = vld [vmem:[#allocation15 + $0x928] ss:$16 sps:$4 sm:$0xff]  }
 0x4ed   :  { %3507 = vmatprep.subr.bf16.mxu1 %v9568_v8  ;;  %4124 = vmatprep.subr.bf16.mxu0 %v9571_v36  ;;  %v9634_v8 = vld [vmem:[#allocation15 + $0x744] ss:$16 sps:$4 sm:$0xff]   ;;  %v9637_v36 = vld [vmem:[#allocation15 + $0x94c] ss:$16 sps:$4 sm:$0xff]  }
 0x4f0   :  { %3508 = vmatpush1.bf16.msra.mxu1 %v9566_v2  ;;  %4125 = vmatpush1.bf16.msra.mxu0 %v9569_v63  ;;  %v9635_v2 = vld [vmem:[#allocation15 + $0x948] ss:$16 sps:$4 sm:$0xff]   ;;  %v9643_v63 = vld [vmem:[#allocation15 + $0x96c] ss:$16 sps:$4 sm:$0xff]  }
 0x4f1   :  { %3781 = vmatprep.subr.bf16.mxu1 %v9574_v26  ;;  %4401 = vmatprep.subr.bf16.mxu0 %v9577_v44  ;;  %v9638_v26 = vld [vmem:[#allocation15 + $0x760] ss:$16 sps:$4 sm:$0xff]   ;;  %v9641_v44 = vld [vmem:[#allocation15 + $0x968] ss:$16 sps:$4 sm:$0xff]  }
 0x4f3   :  { %3526 = vmatmul.mubr.bf16.vlgmr.msra.gmra.mrb[40].mxu1 %v11387_v28  ;;  %4143 = vmatmul.mubr.bf16.vlgmr.msra.gmra.mrb[40].mxu0 %v11403_v57  ;;  %v9592_v28 = vld [vmem:[#allocation15 + $0x664] ss:$16 sps:$4 sm:$0xff]  }
 0x4f4   :  { %3782 = vmatpush1.bf16.msra.mxu1 %v9572_v54  ;;  %4402 = vmatpush1.bf16.msra.mxu0 %v9575_v53  ;;  %v9646_v54 = vld [vmem:[#allocation15 + $0x784] ss:$16 sps:$4 sm:$0xff]   ;;  %v9649_v53 = vld [vmem:[#allocation15 + $0x98c] ss:$16 sps:$4 sm:$0xff]  }
 0x4f5   :  { %3783 = vmatprep.subr.bf16.mxu1 %v9580_v38  ;;  %4403 = vmatprep.subr.bf16.mxu0 %v9583_v55  ;;  %v9644_v38 = vld [vmem:[#allocation15 + $0x780] ss:$16 sps:$4 sm:$0xff]   ;;  %v9647_v55 = vld [vmem:[#allocation15 + $0x988] ss:$16 sps:$4 sm:$0xff]  }
 0x4f6   :  { %3813 = vmatprep.mubr.bf16.mxu1 %v10572_v20  ;;  %4433 = vmatprep.mubr.bf16.mxu0 %v10572_v20 }
 0x4f8   :  { %3784 = vmatpush1.bf16.msra.mxu1 %v9578_v61  ;;  %4404 = vmatpush1.bf16.msra.mxu0 %v9581_v0  ;;  %v9652_v61 = vld [vmem:[#allocation15 + $0x7a4] ss:$16 sps:$4 sm:$0xff]   ;;  %v9655_v0 = vld [vmem:[#allocation15 + $0x9ac] ss:$16 sps:$4 sm:$0xff]  }
 0x4f9   :  { %3785 = vmatprep.subr.bf16.mxu1 %v9586_v6  ;;  %4405 = vmatprep.subr.bf16.mxu0 %v9589_v51  ;;  %v9650_v6 = vld [vmem:[#allocation15 + $0x7a0] ss:$16 sps:$4 sm:$0xff]   ;;  %v9653_v51 = vld [vmem:[#allocation15 + $0x9a8] ss:$16 sps:$4 sm:$0xff]  }
 0x4fc   :  { %3786 = vmatpush1.bf16.msra.mxu1 %v9584_v29  ;;  %4406 = vmatpush1.bf16.msra.mxu0 %v9587_v59  ;;  %v9658_v29 = vld [vmem:[#allocation15 + $0x7c4] ss:$16 sps:$4 sm:$0xff]   ;;  %v9661_v59 = vld [vmem:[#allocation15 + $0x9cc] ss:$16 sps:$4 sm:$0xff]  }
 0x4fd   :  { %3787 = vmatprep.subr.bf16.mxu1 %v9592_v28  ;;  %4407 = vmatprep.subr.bf16.mxu0 %v9595_v10 }
 0x500   :  { %3788 = vmatpush1.bf16.msra.mxu1 %v9590_v49  ;;  %4408 = vmatpush1.bf16.msra.mxu0 %v9593_v3 }
 0x501   :  { %3789 = vmatprep.subr.bf16.mxu1 %v9598_v12  ;;  %4409 = vmatprep.subr.bf16.mxu0 %v9601_v13 }
 0x504   :  { %3790 = vmatpush1.bf16.msra.mxu1 %v9596_v1  ;;  %4410 = vmatpush1.bf16.msra.mxu0 %v9599_v14 }
 0x505   :  { %3791 = vmatprep.subr.bf16.mxu1 %v9604_v45  ;;  %4411 = vmatprep.subr.bf16.mxu0 %v9607_v56  ;;  %v9656_v45 = vld [vmem:[#allocation15 + $0x7c0] ss:$16 sps:$4 sm:$0xff]   ;;  %v9659_v56 = vld [vmem:[#allocation15 + $0x9c8] ss:$16 sps:$4 sm:$0xff]  }
 0x506   :  { %v11409_v16 = vpop.f32.mrb[16].mxu1  ;;  %v11411_v52 = vpop.f32.mrb[16].mxu0 }
 0x507   :  { %v11413_v25 = vpop.f32.mrb[17].mxu1  ;;  %v11415_v35 = vpop.f32.mrb[17].mxu0 }
 0x508   :  { %3792 = vmatpush1.bf16.msra.mxu1 %v9602_v15  ;;  %4412 = vmatpush1.bf16.msra.mxu0 %v9605_v42  ;;  %v2135_v24 = vpop.f32.mrb[18].mxu1  ;;  %v2426_v50 = vpop.f32.mrb[18].mxu0 }
 0x509   :  { %v2136_v62 = vpop.f32.mrb[19].mxu1  ;;  %v2427_v32 = vpop.f32.mrb[19].mxu0  ;;  %3793 = vmatprep.subr.bf16.mxu1 %v9610_v5  ;;  %4413 = vmatprep.subr.bf16.mxu0 %v9613_v22  ;;  %v9664_v22 = vld [vmem:[#allocation15 + $0x7e4] ss:$16 sps:$4 sm:$0xff]   ;;  %v9667_v24 = vld [vmem:[#allocation15 + $0x9ec] ss:$16 sps:$4 sm:$0xff]  }
 0x50a   :  { %v9668_v62 = vld [vmem:[#allocation15 + $0x800] ss:$16 sps:$4 sm:$0xff]   ;;  %v9671_v32 = vld [vmem:[#allocation15 + $0xa08] ss:$16 sps:$4 sm:$0xff]  }
 0x50c   :  { %3794 = vmatpush1.bf16.msra.mxu1 %v9608_v30  ;;  %4414 = vmatpush1.bf16.msra.mxu0 %v9611_v46  ;;  %v9670_v30 = vld [vmem:[#allocation15 + $0x804] ss:$16 sps:$4 sm:$0xff]   ;;  %v9673_v46 = vld [vmem:[#allocation15 + $0xa0c] ss:$16 sps:$4 sm:$0xff]  }
 0x50d   :  { %3795 = vmatprep.subr.bf16.mxu1 %v9616_v23  ;;  %4415 = vmatprep.subr.bf16.mxu0 %v9619_v48  ;;  %v11433_v23 = vpack.c.b16 %v11308_v4, %v11308_v4  ;;  %v9676_v48 = vld [vmem:[#allocation15 + $0x824] ss:$16 sps:$4 sm:$0xff]   ;;  %v9680_v4 = vld [vmem:[#allocation15 + $0x840] ss:$16 sps:$4 sm:$0xff]  }
 0x510   :  { %3796 = vmatpush1.bf16.msra.mxu1 %v9614_v7  ;;  %4416 = vmatpush1.bf16.msra.mxu0 %v9617_v60  ;;  %v9679_v7 = vld [vmem:[#allocation15 + $0xa2c] ss:$16 sps:$4 sm:$0xff]   ;;  %v9674_v60 = vld [vmem:[#allocation15 + $0x820] ss:$16 sps:$4 sm:$0xff]  }
 0x511   :  { %4069 = vmatprep.subr.bf16.mxu1 %v9622_v37  ;;  %4688 = vmatprep.subr.bf16.mxu0 %v9625_v39  ;;  %v9677_v37 = vld [vmem:[#allocation15 + $0xa28] ss:$16 sps:$4 sm:$0xff]   ;;  %v9682_v39 = vld [vmem:[#allocation15 + $0x844] ss:$16 sps:$4 sm:$0xff]  }
 0x513   :  { %3814 = vmatmul.mubr.bf16.vlgmr.msra.gmra.mrb[44].mxu1 %v11395_v19  ;;  %4434 = vmatmul.mubr.bf16.vlgmr.msra.gmra.mrb[44].mxu0 %v11419_v9  ;;  %v9640_v19 = vld [vmem:[#allocation15 + $0x764] ss:$16 sps:$4 sm:$0xff]  }
 0x514   :  { %4070 = vmatpush1.bf16.msra.mxu1 %v9620_v40  ;;  %4689 = vmatpush1.bf16.msra.mxu0 %v9623_v41  ;;  %v9685_v40 = vld [vmem:[#allocation15 + $0xa4c] ss:$16 sps:$4 sm:$0xff]   ;;  %v9683_v41 = vld [vmem:[#allocation15 + $0xa48] ss:$16 sps:$4 sm:$0xff]  }
 0x515   :  { %4071 = vmatprep.subr.bf16.mxu1 %v9628_v43  ;;  %4690 = vmatprep.subr.bf16.mxu0 %v9631_v18  ;;  %v9691_v43 = vld [vmem:[#allocation15 + $0xa6c] ss:$16 sps:$4 sm:$0xff]   ;;  %v9686_v18 = vld [vmem:[#allocation15 + $0x860] ss:$16 sps:$4 sm:$0xff]  }
 0x516   :  { %4101 = vmatprep.mubr.bf16.mxu1 %v10572_v20  ;;  %4720 = vmatprep.mubr.bf16.mxu0 %v10572_v20 }
 0x518   :  { %4072 = vmatpush1.bf16.msra.mxu1 %v9626_v47  ;;  %4691 = vmatpush1.bf16.msra.mxu0 %v9629_v31  ;;  %v9689_v47 = vld [vmem:[#allocation15 + $0xa68] ss:$16 sps:$4 sm:$0xff]   ;;  %v9694_v31 = vld [vmem:[#allocation15 + $0x884] ss:$16 sps:$4 sm:$0xff]  }
 0x519   :  { %4073 = vmatprep.subr.bf16.mxu1 %v9634_v8  ;;  %4692 = vmatprep.subr.bf16.mxu0 %v9637_v36  ;;  %v9697_v8 = vld [vmem:[#allocation15 + $0xa8c] ss:$16 sps:$4 sm:$0xff]   ;;  %v9692_v36 = vld [vmem:[#allocation15 + $0x880] ss:$16 sps:$4 sm:$0xff]  }
 0x51c   :  { %4074 = vmatpush1.bf16.msra.mxu1 %v9632_v34  ;;  %4693 = vmatpush1.bf16.msra.mxu0 %v9635_v2  ;;  %v9695_v34 = vld [vmem:[#allocation15 + $0xa88] ss:$16 sps:$4 sm:$0xff]   ;;  %v9700_v2 = vld [vmem:[#allocation15 + $0x8a4] ss:$16 sps:$4 sm:$0xff]  }
 0x51d   :  { %4075 = vmatprep.subr.bf16.mxu1 %v9640_v19  ;;  %4694 = vmatprep.subr.bf16.mxu0 %v9643_v63  ;;  %v9703_v19 = vld [vmem:[#allocation15 + $0xaac] ss:$16 sps:$4 sm:$0xff]   ;;  %v9698_v63 = vld [vmem:[#allocation15 + $0x8a0] ss:$16 sps:$4 sm:$0xff]  }
 0x520   :  { %4076 = vmatpush1.bf16.msra.mxu1 %v9638_v26  ;;  %4695 = vmatpush1.bf16.msra.mxu0 %v9641_v44  ;;  %v9701_v26 = vld [vmem:[#allocation15 + $0xaa8] ss:$16 sps:$4 sm:$0xff]   ;;  %v9706_v44 = vld [vmem:[#allocation15 + $0x8c4] ss:$16 sps:$4 sm:$0xff]  }
 0x521   :  { %4077 = vmatprep.subr.bf16.mxu1 %v9646_v54  ;;  %4696 = vmatprep.subr.bf16.mxu0 %v9649_v53  ;;  %v9709_v54 = vld [vmem:[#allocation15 + $0xacc] ss:$16 sps:$4 sm:$0xff]  }
 0x524   :  { %4078 = vmatpush1.bf16.msra.mxu1 %v9644_v38  ;;  %4697 = vmatpush1.bf16.msra.mxu0 %v9647_v55 }
 0x525   :  { %4079 = vmatprep.subr.bf16.mxu1 %v9652_v61  ;;  %4698 = vmatprep.subr.bf16.mxu0 %v9655_v0 }
 0x526   :  { %v2172_v28 = vpop.f32.mrb[20].mxu1  ;;  %v2705_v10 = vpop.f32.mrb[20].mxu0 }
 0x527   :  { %v2423_v49 = vadd.f32 %v11411_v52, %v2172_v28  ;;  %v2174_v3 = vpop.f32.mrb[21].mxu1  ;;  %v2707_v12 = vpop.f32.mrb[21].mxu0  ;;  %v9662_v52 = vld [vmem:[#allocation15 + $0x7e0] ss:$16 sps:$4 sm:$0xff]  }
 0x528   :  { %v2425_v13 = vadd.f32 %v11415_v35, %v2174_v3  ;;  %v2176_v1 = vpop.f32.mrb[22].mxu1  ;;  %v2709_v14 = vpop.f32.mrb[22].mxu0  ;;  %4080 = vmatpush1.bf16.msra.mxu1 %v9650_v6  ;;  %4699 = vmatpush1.bf16.msra.mxu0 %v9653_v51  ;;  %v9665_v35 = vld [vmem:[#allocation15 + $0x9e8] ss:$16 sps:$4 sm:$0xff]  }
 0x529   :  { %v11427_v15 = vadd.f32 %v2705_v10, %v2423_v49  ;;  %v2177_v42 = vpop.f32.mrb[23].mxu1  ;;  %v2710_v5 = vpop.f32.mrb[23].mxu0  ;;  %4081 = vmatprep.subr.bf16.mxu1 %v9658_v29  ;;  %4700 = vmatprep.subr.bf16.mxu0 %v9661_v59  ;;  %v9704_v10 = vld [vmem:[#allocation15 + $0x8c0] ss:$16 sps:$4 sm:$0xff]   ;;  %v9707_v49 = vld [vmem:[#allocation15 + $0xac8] ss:$16 sps:$4 sm:$0xff]  }
 0x52a   :  { %v11429_v50 = vadd.f32 %v2707_v12, %v2425_v13  ;;  %v9712_v12 = vld [vmem:[#allocation15 + $0x8e4] ss:$16 sps:$4 sm:$0xff]   ;;  %v9715_v13 = vld [vmem:[#allocation15 + $0xaec] ss:$16 sps:$4 sm:$0xff]   ;;  %v9710_v1 = vld [vmem:[#allocation15 + $0x8e0] ss:$16 sps:$4 sm:$0xff]   ;;  %v11453_v42 = vpack.c.b16 %v11317_v21, %v11317_v21 }
 0x52b   :  { %v9718_v14 = vld [vmem:[#allocation15 + $0x904] ss:$16 sps:$4 sm:$0xff]   ;;  %v9728_v21 = vld [vmem:[#allocation15 + $0x940] ss:$16 sps:$4 sm:$0xff]  }
 0x52c   :  { %4082 = vmatpush1.bf16.msra.mxu1 %v9656_v45  ;;  %4701 = vmatpush1.bf16.msra.mxu0 %v9659_v56  ;;  %v9721_v45 = vld [vmem:[#allocation15 + $0xb0c] ss:$16 sps:$4 sm:$0xff]   ;;  %v9716_v56 = vld [vmem:[#allocation15 + $0x900] ss:$16 sps:$4 sm:$0xff]   ;;  %v9724_v5 = vld [vmem:[#allocation15 + $0x924] ss:$16 sps:$4 sm:$0xff]  }
 0x52d   :  { %4083 = vmatprep.subr.bf16.mxu1 %v9664_v22  ;;  %4702 = vmatprep.subr.bf16.mxu0 %v9667_v24  ;;  %v9727_v22 = vld [vmem:[#allocation15 + $0xb2c] ss:$16 sps:$4 sm:$0xff]   ;;  %v9722_v24 = vld [vmem:[#allocation15 + $0x920] ss:$16 sps:$4 sm:$0xff]  }
 0x530   :  { %4084 = vmatpush1.bf16.msra.mxu1 %v9662_v52  ;;  %4703 = vmatpush1.bf16.msra.mxu0 %v9665_v35  ;;  %v9730_v52 = vld [vmem:[#allocation15 + $0x944] ss:$16 sps:$4 sm:$0xff]   ;;  %v9733_v35 = vld [vmem:[#allocation15 + $0xb4c] ss:$16 sps:$4 sm:$0xff]  }
 0x531   :  { %4360 = vmatprep.subr.bf16.mxu1 %v9670_v30  ;;  %4975 = vmatprep.subr.bf16.mxu0 %v9673_v46  ;;  %v9731_v30 = vld [vmem:[#allocation15 + $0xb48] ss:$16 sps:$4 sm:$0xff]   ;;  %v9739_v46 = vld [vmem:[#allocation15 + $0xb6c] ss:$16 sps:$4 sm:$0xff]  }
 0x533   :  { %4102 = vmatmul.mubr.bf16.vlgmr.msra.gmra.mrb[48].mxu1 %v11403_v57  ;;  %4721 = vmatmul.mubr.bf16.vlgmr.msra.gmra.mrb[48].mxu0 %v11433_v23  ;;  %v9688_v57 = vld [vmem:[#allocation15 + $0x864] ss:$16 sps:$4 sm:$0xff]  }
 0x534   :  { %4361 = vmatpush1.bf16.msra.mxu1 %v9668_v62  ;;  %4976 = vmatpush1.bf16.msra.mxu0 %v9671_v32  ;;  %v9734_v62 = vld [vmem:[#allocation15 + $0x960] ss:$16 sps:$4 sm:$0xff]   ;;  %v9737_v32 = vld [vmem:[#allocation15 + $0xb68] ss:$16 sps:$4 sm:$0xff]  }
 0x535   :  { %4362 = vmatprep.subr.bf16.mxu1 %v9676_v48  ;;  %4977 = vmatprep.subr.bf16.mxu0 %v9679_v7  ;;  %v9742_v48 = vld [vmem:[#allocation15 + $0x984] ss:$16 sps:$4 sm:$0xff]   ;;  %v9745_v7 = vld [vmem:[#allocation15 + $0xb8c] ss:$16 sps:$4 sm:$0xff]  }
 0x536   :  { %4392 = vmatprep.mubr.bf16.mxu1 %v10572_v20  ;;  %5007 = vmatprep.mubr.bf16.mxu0 %v10572_v20 }
 0x538   :  { %4363 = vmatpush1.bf16.msra.mxu1 %v9674_v60  ;;  %4978 = vmatpush1.bf16.msra.mxu0 %v9677_v37  ;;  %v9740_v60 = vld [vmem:[#allocation15 + $0x980] ss:$16 sps:$4 sm:$0xff]   ;;  %v9743_v37 = vld [vmem:[#allocation15 + $0xb88] ss:$16 sps:$4 sm:$0xff]  }
 0x539   :  { %4364 = vmatprep.subr.bf16.mxu1 %v9682_v39  ;;  %4979 = vmatprep.subr.bf16.mxu0 %v9685_v40  ;;  %v9748_v39 = vld [vmem:[#allocation15 + $0x9a4] ss:$16 sps:$4 sm:$0xff]   ;;  %v9751_v40 = vld [vmem:[#allocation15 + $0xbac] ss:$16 sps:$4 sm:$0xff]  }
 0x53c   :  { %4365 = vmatpush1.bf16.msra.mxu1 %v9680_v4  ;;  %4980 = vmatpush1.bf16.msra.mxu0 %v9683_v41  ;;  %v9746_v4 = vld [vmem:[#allocation15 + $0x9a0] ss:$16 sps:$4 sm:$0xff]   ;;  %v9749_v41 = vld [vmem:[#allocation15 + $0xba8] ss:$16 sps:$4 sm:$0xff]  }
 0x53d   :  { %4366 = vmatprep.subr.bf16.mxu1 %v9688_v57  ;;  %4981 = vmatprep.subr.bf16.mxu0 %v9691_v43  ;;  %v9754_v57 = vld [vmem:[#allocation15 + $0x9c4] ss:$16 sps:$4 sm:$0xff]   ;;  %v9757_v43 = vld [vmem:[#allocation15 + $0xbcc] ss:$16 sps:$4 sm:$0xff]  }
 0x540   :  { %4367 = vmatpush1.bf16.msra.mxu1 %v9686_v18  ;;  %4982 = vmatpush1.bf16.msra.mxu0 %v9689_v47 }
 0x541   :  { %4368 = vmatprep.subr.bf16.mxu1 %v9694_v31  ;;  %4983 = vmatprep.subr.bf16.mxu0 %v9697_v8 }
 0x544   :  { %4369 = vmatpush1.bf16.msra.mxu1 %v9692_v36  ;;  %4984 = vmatpush1.bf16.msra.mxu0 %v9695_v34 }
 0x545   :  { %4370 = vmatprep.subr.bf16.mxu1 %v9700_v2  ;;  %4985 = vmatprep.subr.bf16.mxu0 %v9703_v19 }
 0x546   :  { %v2381_v53 = vpop.f32.mrb[24].mxu1  ;;  %v2992_v38 = vpop.f32.mrb[24].mxu0 }
 0x547   :  { %v11440_v55 = vadd.f32 %v2381_v53, %v11409_v16  ;;  %v11443_v61 = vadd.f32 %v2992_v38, %v11427_v15  ;;  %v2383_v0 = vpop.f32.mrb[25].mxu1  ;;  %v2994_v6 = vpop.f32.mrb[25].mxu0  ;;  %v9719_v15 = vld [vmem:[#allocation15 + $0xb08] ss:$16 sps:$4 sm:$0xff]  }
 0x548   :  { %v11446_v51 = vadd.f32 %v2383_v0, %v11413_v25  ;;  %v11449_v29 = vadd.f32 %v2994_v6, %v11429_v50  ;;  %v2385_v59 = vpop.f32.mrb[26].mxu1  ;;  %v2996_v28 = vpop.f32.mrb[26].mxu0  ;;  %4371 = vmatpush1.bf16.msra.mxu1 %v9698_v63  ;;  %4986 = vmatpush1.bf16.msra.mxu0 %v9701_v26  ;;  %v9713_v25 = vld [vmem:[#allocation15 + $0xae8] ss:$16 sps:$4 sm:$0xff]   ;;  %v9758_v0 = vld [vmem:[#allocation15 + $0x9e0] ss:$16 sps:$4 sm:$0xff]  }
 0x549   :  { %v2386_v3 = vpop.f32.mrb[27].mxu1  ;;  %v2997_v16 = vpop.f32.mrb[27].mxu0  ;;  %4372 = vmatprep.subr.bf16.mxu1 %v9706_v44  ;;  %4987 = vmatprep.subr.bf16.mxu0 %v9709_v54  ;;  %v9725_v50 = vld [vmem:[#allocation15 + $0xb28] ss:$16 sps:$4 sm:$0xff]   ;;  %v9752_v44 = vld [vmem:[#allocation15 + $0x9c0] ss:$16 sps:$4 sm:$0xff]  }
 0x54a   :  { %v9755_v54 = vld [vmem:[#allocation15 + $0xbc8] ss:$16 sps:$4 sm:$0xff]   ;;  %v9764_v59 = vld [vmem:[#allocation15 + $0xa00] ss:$16 sps:$4 sm:$0xff]   ;;  %v9775_v3 = vld [vmem:[#allocation15 + $0xc2c] ss:$16 sps:$4 sm:$0xff]  }
 0x54b   :  { %v9761_v6 = vld [vmem:[#allocation15 + $0xbe8] ss:$16 sps:$4 sm:$0xff]   ;;  %v9770_v16 = vld [vmem:[#allocation15 + $0xa20] ss:$16 sps:$4 sm:$0xff]  }
 0x54c   :  { %4373 = vmatpush1.bf16.msra.mxu1 %v9704_v10  ;;  %4988 = vmatpush1.bf16.msra.mxu0 %v9707_v49  ;;  %v9767_v28 = vld [vmem:[#allocation15 + $0xc08] ss:$16 sps:$4 sm:$0xff]   ;;  %v11473_v10 = vpack.c.b16 %v11330_v27, %v11330_v27  ;;  %v9772_v49 = vld [vmem:[#allocation15 + $0xa24] ss:$16 sps:$4 sm:$0xff]   ;;  %v9776_v27 = vld [vmem:[#allocation15 + $0xa40] ss:$16 sps:$4 sm:$0xff]  }
 0x54d   :  { %4374 = vmatprep.subr.bf16.mxu1 %v9712_v12  ;;  %4989 = vmatprep.subr.bf16.mxu0 %v9715_v13  ;;  %v9773_v12 = vld [vmem:[#allocation15 + $0xc28] ss:$16 sps:$4 sm:$0xff]   ;;  %v9778_v13 = vld [vmem:[#allocation15 + $0xa44] ss:$16 sps:$4 sm:$0xff]  }
 0x550   :  { %4375 = vmatpush1.bf16.msra.mxu1 %v9710_v1  ;;  %4990 = vmatpush1.bf16.msra.mxu0 %v9713_v25  ;;  %v9781_v1 = vld [vmem:[#allocation15 + $0xc4c] ss:$16 sps:$4 sm:$0xff]   ;;  %v9779_v25 = vld [vmem:[#allocation15 + $0xc48] ss:$16 sps:$4 sm:$0xff]  }
 0x551   :  { %4647 = vmatprep.subr.bf16.mxu1 %v9718_v14  ;;  %5262 = vmatprep.subr.bf16.mxu0 %v9721_v45  ;;  %v9787_v14 = vld [vmem:[#allocation15 + $0xc6c] ss:$16 sps:$4 sm:$0xff]   ;;  %v9782_v45 = vld [vmem:[#allocation15 + $0xa60] ss:$16 sps:$4 sm:$0xff]  }
 0x553   :  { %4393 = vmatmul.mubr.bf16.vlgmr.msra.gmra.mrb[52].mxu1 %v11419_v9  ;;  %5008 = vmatmul.mubr.bf16.vlgmr.msra.gmra.mrb[52].mxu0 %v11453_v42  ;;  %v9736_v9 = vld [vmem:[#allocation15 + $0x964] ss:$16 sps:$4 sm:$0xff]  }
 0x554   :  { %4648 = vmatpush1.bf16.msra.mxu1 %v9716_v56  ;;  %5263 = vmatpush1.bf16.msra.mxu0 %v9719_v15  ;;  %v9785_v56 = vld [vmem:[#allocation15 + $0xc68] ss:$16 sps:$4 sm:$0xff]   ;;  %v9790_v15 = vld [vmem:[#allocation15 + $0xa84] ss:$16 sps:$4 sm:$0xff]  }
 0x555   :  { %4649 = vmatprep.subr.bf16.mxu1 %v9724_v5  ;;  %5264 = vmatprep.subr.bf16.mxu0 %v9727_v22  ;;  %v9793_v5 = vld [vmem:[#allocation15 + $0xc8c] ss:$16 sps:$4 sm:$0xff]   ;;  %v9788_v22 = vld [vmem:[#allocation15 + $0xa80] ss:$16 sps:$4 sm:$0xff]  }
 0x556   :  { %4679 = vmatprep.mubr.bf16.mxu1 %v10572_v20  ;;  %5294 = vmatprep.mubr.bf16.mxu0 %v10572_v20 }
 0x558   :  { %4650 = vmatpush1.bf16.msra.mxu1 %v9722_v24  ;;  %5265 = vmatpush1.bf16.msra.mxu0 %v9725_v50  ;;  %v9791_v24 = vld [vmem:[#allocation15 + $0xc88] ss:$16 sps:$4 sm:$0xff]   ;;  %v9796_v50 = vld [vmem:[#allocation15 + $0xaa4] ss:$16 sps:$4 sm:$0xff]  }
 0x559   :  { %4651 = vmatprep.subr.bf16.mxu1 %v9730_v52  ;;  %5266 = vmatprep.subr.bf16.mxu0 %v9733_v35  ;;  %v9799_v52 = vld [vmem:[#allocation15 + $0xcac] ss:$16 sps:$4 sm:$0xff]   ;;  %v9794_v35 = vld [vmem:[#allocation15 + $0xaa0] ss:$16 sps:$4 sm:$0xff]  }
 0x55c   :  { %4652 = vmatpush1.bf16.msra.mxu1 %v9728_v21  ;;  %5267 = vmatpush1.bf16.msra.mxu0 %v9731_v30  ;;  %v9797_v21 = vld [vmem:[#allocation15 + $0xca8] ss:$16 sps:$4 sm:$0xff]   ;;  %v9802_v30 = vld [vmem:[#allocation15 + $0xac4] ss:$16 sps:$4 sm:$0xff]  }
 0x55d   :  { %4653 = vmatprep.subr.bf16.mxu1 %v9736_v9  ;;  %5268 = vmatprep.subr.bf16.mxu0 %v9739_v46  ;;  %v9805_v9 = vld [vmem:[#allocation15 + $0xccc] ss:$16 sps:$4 sm:$0xff]  }
 0x560   :  { %4654 = vmatpush1.bf16.msra.mxu1 %v9734_v62  ;;  %5269 = vmatpush1.bf16.msra.mxu0 %v9737_v32 }
 0x561   :  { %4655 = vmatprep.subr.bf16.mxu1 %v9742_v48  ;;  %5270 = vmatprep.subr.bf16.mxu0 %v9745_v7 }
 0x564   :  { %4656 = vmatpush1.bf16.msra.mxu1 %v9740_v60  ;;  %5271 = vmatpush1.bf16.msra.mxu0 %v9743_v37 }
 0x565   :  { %4657 = vmatprep.subr.bf16.mxu1 %v9748_v39  ;;  %5272 = vmatprep.subr.bf16.mxu0 %v9751_v40 }
 0x566   :  { %v2664_v18 = vpop.f32.mrb[28].mxu1  ;;  %v3280_v47 = vpop.f32.mrb[28].mxu0 }
 0x567   :  { %v11460_v31 = vadd.f32 %v2664_v18, %v11440_v55  ;;  %v11463_v8 = vadd.f32 %v3280_v47, %v11443_v61  ;;  %v2666_v36 = vpop.f32.mrb[29].mxu1  ;;  %v3282_v34 = vpop.f32.mrb[29].mxu0  ;;  %v9760_v55 = vld [vmem:[#allocation15 + $0x9e4] ss:$16 sps:$4 sm:$0xff]   ;;  %v9763_v61 = vld [vmem:[#allocation15 + $0xbec] ss:$16 sps:$4 sm:$0xff]  }
 0x568   :  { %v11466_v2 = vadd.f32 %v2666_v36, %v11446_v51  ;;  %v11469_v19 = vadd.f32 %v3282_v34, %v11449_v29  ;;  %v2668_v63 = vpop.f32.mrb[30].mxu1  ;;  %v3284_v26 = vpop.f32.mrb[30].mxu0  ;;  %4658 = vmatpush1.bf16.msra.mxu1 %v9746_v4  ;;  %5273 = vmatpush1.bf16.msra.mxu0 %v9749_v41  ;;  %v9766_v51 = vld [vmem:[#allocation15 + $0xa04] ss:$16 sps:$4 sm:$0xff]   ;;  %v9769_v29 = vld [vmem:[#allocation15 + $0xc0c] ss:$16 sps:$4 sm:$0xff]  }
 0x569   :  { %v2669_v53 = vpop.f32.mrb[31].mxu1  ;;  %v3285_v38 = vpop.f32.mrb[31].mxu0  ;;  %4659 = vmatprep.subr.bf16.mxu1 %v9754_v57  ;;  %5274 = vmatprep.subr.bf16.mxu0 %v9757_v43  ;;  %v9800_v41 = vld [vmem:[#allocation15 + $0xac0] ss:$16 sps:$4 sm:$0xff]   ;;  %v9803_v57 = vld [vmem:[#allocation15 + $0xcc8] ss:$16 sps:$4 sm:$0xff]   ;;  %v11493_v26 = vpack.c.b16 %v11336_v11, %v11336_v11 }
 0x56a   :  { %v9808_v47 = vld [vmem:[#allocation15 + $0xae4] ss:$16 sps:$4 sm:$0xff]   ;;  %v9809_v36 = vld [vmem:[#allocation15 + $0xce8] ss:$16 sps:$4 sm:$0xff]   ;;  %v9818_v53 = vld [vmem:[#allocation15 + $0xb20] ss:$16 sps:$4 sm:$0xff]  }
 0x56b   :  { %v9814_v34 = vld [vmem:[#allocation15 + $0xb04] ss:$16 sps:$4 sm:$0xff]   ;;  %v9815_v63 = vld [vmem:[#allocation15 + $0xd08] ss:$16 sps:$4 sm:$0xff]   ;;  %v9824_v11 = vld [vmem:[#allocation15 + $0xb40] ss:$16 sps:$4 sm:$0xff]  }
 0x56c   :  { %4660 = vmatpush1.bf16.msra.mxu1 %v9752_v44  ;;  %5275 = vmatpush1.bf16.msra.mxu0 %v9755_v54  ;;  %v9820_v44 = vld [vmem:[#allocation15 + $0xb24] ss:$16 sps:$4 sm:$0xff]   ;;  %v9823_v54 = vld [vmem:[#allocation15 + $0xd2c] ss:$16 sps:$4 sm:$0xff]   ;;  %v9821_v38 = vld [vmem:[#allocation15 + $0xd28] ss:$16 sps:$4 sm:$0xff]  }
 0x56d   :  { %4661 = vmatprep.subr.bf16.mxu1 %v9760_v55  ;;  %5276 = vmatprep.subr.bf16.mxu0 %v9763_v61  ;;  %v9826_v55 = vld [vmem:[#allocation15 + $0xb44] ss:$16 sps:$4 sm:$0xff]   ;;  %v9829_v61 = vld [vmem:[#allocation15 + $0xd4c] ss:$16 sps:$4 sm:$0xff]  }
 0x570   :  { %4662 = vmatpush1.bf16.msra.mxu1 %v9758_v0  ;;  %5277 = vmatpush1.bf16.msra.mxu0 %v9761_v6  ;;  %v9827_v0 = vld [vmem:[#allocation15 + $0xd48] ss:$16 sps:$4 sm:$0xff]   ;;  %v9835_v6 = vld [vmem:[#allocation15 + $0xd6c] ss:$16 sps:$4 sm:$0xff]  }
 0x571   :  { %4934 = vmatprep.subr.bf16.mxu1 %v9766_v51  ;;  %5550 = vmatprep.subr.bf16.mxu0 %v9769_v29  ;;  %v9830_v51 = vld [vmem:[#allocation15 + $0xb60] ss:$16 sps:$4 sm:$0xff]   ;;  %v9833_v29 = vld [vmem:[#allocation15 + $0xd68] ss:$16 sps:$4 sm:$0xff]  }
 0x573   :  { %4680 = vmatmul.mubr.bf16.vlgmr.msra.gmra.mrb[56].mxu1 %v11433_v23  ;;  %5295 = vmatmul.mubr.bf16.vlgmr.msra.gmra.mrb[56].mxu0 %v11473_v10  ;;  %v9784_v23 = vld [vmem:[#allocation15 + $0xa64] ss:$16 sps:$4 sm:$0xff]  }
 0x574   :  { %4935 = vmatpush1.bf16.msra.mxu1 %v9764_v59  ;;  %5551 = vmatpush1.bf16.msra.mxu0 %v9767_v28  ;;  %v9838_v59 = vld [vmem:[#allocation15 + $0xb84] ss:$16 sps:$4 sm:$0xff]   ;;  %v9841_v28 = vld [vmem:[#allocation15 + $0xd8c] ss:$16 sps:$4 sm:$0xff]  }
 0x575   :  { %4936 = vmatprep.subr.bf16.mxu1 %v9772_v49  ;;  %5552 = vmatprep.subr.bf16.mxu0 %v9775_v3  ;;  %v9836_v49 = vld [vmem:[#allocation15 + $0xb80] ss:$16 sps:$4 sm:$0xff]   ;;  %v9839_v3 = vld [vmem:[#allocation15 + $0xd88] ss:$16 sps:$4 sm:$0xff]  }
 0x576   :  { %4966 = vmatprep.mubr.bf16.mxu1 %v10572_v20  ;;  %5582 = vmatprep.mubr.bf16.mxu0 %v10572_v20 }
 0x578   :  { %4937 = vmatpush1.bf16.msra.mxu1 %v9770_v16  ;;  %5553 = vmatpush1.bf16.msra.mxu0 %v9773_v12  ;;  %v9844_v16 = vld [vmem:[#allocation15 + $0xba4] ss:$16 sps:$4 sm:$0xff]   ;;  %v9847_v12 = vld [vmem:[#allocation15 + $0xdac] ss:$16 sps:$4 sm:$0xff]  }
 0x579   :  { %4938 = vmatprep.subr.bf16.mxu1 %v9778_v13  ;;  %5554 = vmatprep.subr.bf16.mxu0 %v9781_v1  ;;  %v9842_v13 = vld [vmem:[#allocation15 + $0xba0] ss:$16 sps:$4 sm:$0xff]   ;;  %v9845_v1 = vld [vmem:[#allocation15 + $0xda8] ss:$16 sps:$4 sm:$0xff]  }
 0x57c   :  { %4939 = vmatpush1.bf16.msra.mxu1 %v9776_v27  ;;  %5555 = vmatpush1.bf16.msra.mxu0 %v9779_v25  ;;  %v9850_v27 = vld [vmem:[#allocation15 + $0xbc4] ss:$16 sps:$4 sm:$0xff]   ;;  %v9853_v25 = vld [vmem:[#allocation15 + $0xdcc] ss:$16 sps:$4 sm:$0xff]  }
 0x57d   :  { %4940 = vmatprep.subr.bf16.mxu1 %v9784_v23  ;;  %5556 = vmatprep.subr.bf16.mxu0 %v9787_v14 }
 0x580   :  { %4941 = vmatpush1.bf16.msra.mxu1 %v9782_v45  ;;  %5557 = vmatpush1.bf16.msra.mxu0 %v9785_v56 }
 0x581   :  { %4942 = vmatprep.subr.bf16.mxu1 %v9790_v15  ;;  %5558 = vmatprep.subr.bf16.mxu0 %v9793_v5 }
 0x584   :  { %4943 = vmatpush1.bf16.msra.mxu1 %v9788_v22  ;;  %5559 = vmatpush1.bf16.msra.mxu0 %v9791_v24 }
 0x585   :  { %4944 = vmatprep.subr.bf16.mxu1 %v9796_v50  ;;  %5560 = vmatprep.subr.bf16.mxu0 %v9799_v52 }
 0x586   :  { %v2951_v46 = vpop.f32.mrb[32].mxu1  ;;  %v3568_v62 = vpop.f32.mrb[32].mxu0 }
 0x587   :  { %v11480_v32 = vadd.f32 %v2951_v46, %v11460_v31  ;;  %v11483_v48 = vadd.f32 %v3568_v62, %v11463_v8  ;;  %v2953_v7 = vpop.f32.mrb[33].mxu1  ;;  %v3570_v60 = vpop.f32.mrb[33].mxu0  ;;  %v9811_v31 = vld [vmem:[#allocation15 + $0xcec] ss:$16 sps:$4 sm:$0xff]   ;;  %v9806_v8 = vld [vmem:[#allocation15 + $0xae0] ss:$16 sps:$4 sm:$0xff]  }
 0x588   :  { %v11486_v37 = vadd.f32 %v2953_v7, %v11466_v2  ;;  %v11489_v39 = vadd.f32 %v3570_v60, %v11469_v19  ;;  %v2955_v40 = vpop.f32.mrb[34].mxu1  ;;  %v3572_v4 = vpop.f32.mrb[34].mxu0  ;;  %4945 = vmatpush1.bf16.msra.mxu1 %v9794_v35  ;;  %5561 = vmatpush1.bf16.msra.mxu0 %v9797_v21  ;;  %v9817_v2 = vld [vmem:[#allocation15 + $0xd0c] ss:$16 sps:$4 sm:$0xff]   ;;  %v9812_v19 = vld [vmem:[#allocation15 + $0xb00] ss:$16 sps:$4 sm:$0xff]  }
 0x589   :  { %v2956_v43 = vpop.f32.mrb[35].mxu1  ;;  %v3573_v18 = vpop.f32.mrb[35].mxu0  ;;  %4946 = vmatprep.subr.bf16.mxu1 %v9802_v30  ;;  %5562 = vmatprep.subr.bf16.mxu0 %v9805_v9  ;;  %v9848_v35 = vld [vmem:[#allocation15 + $0xbc0] ss:$16 sps:$4 sm:$0xff]   ;;  %v9851_v21 = vld [vmem:[#allocation15 + $0xdc8] ss:$16 sps:$4 sm:$0xff]   ;;  %v11513_v40 = vpack.c.b16 %v11344_v17, %v11344_v17 }
 0x58a   :  { %v9856_v46 = vld [vmem:[#allocation15 + $0xbe4] ss:$16 sps:$4 sm:$0xff]   ;;  %v9859_v62 = vld [vmem:[#allocation15 + $0xdec] ss:$16 sps:$4 sm:$0xff]   ;;  %v9869_v43 = vld [vmem:[#allocation15 + $0xe28] ss:$16 sps:$4 sm:$0xff]  }
 0x58b   :  { %v9862_v7 = vld [vmem:[#allocation15 + $0xc04] ss:$16 sps:$4 sm:$0xff]   ;;  %v9865_v60 = vld [vmem:[#allocation15 + $0xe0c] ss:$16 sps:$4 sm:$0xff]   ;;  %v9872_v17 = vld [vmem:[#allocation15 + $0xc40] ss:$16 sps:$4 sm:$0xff]  }
 0x58c   :  { %4947 = vmatpush1.bf16.msra.mxu1 %v9800_v41  ;;  %5563 = vmatpush1.bf16.msra.mxu0 %v9803_v57  ;;  %v9868_v4 = vld [vmem:[#allocation15 + $0xc24] ss:$16 sps:$4 sm:$0xff]   ;;  %v9871_v41 = vld [vmem:[#allocation15 + $0xe2c] ss:$16 sps:$4 sm:$0xff]   ;;  %v9866_v57 = vld [vmem:[#allocation15 + $0xc20] ss:$16 sps:$4 sm:$0xff]  }
 0x58d   :  { %4948 = vmatprep.subr.bf16.mxu1 %v9808_v47  ;;  %5564 = vmatprep.subr.bf16.mxu0 %v9811_v31  ;;  %v9874_v18 = vld [vmem:[#allocation15 + $0xc44] ss:$16 sps:$4 sm:$0xff]   ;;  %v9877_v47 = vld [vmem:[#allocation15 + $0xe4c] ss:$16 sps:$4 sm:$0xff]   ;;  %v9875_v31 = vld [vmem:[#allocation15 + $0xe48] ss:$16 sps:$4 sm:$0xff]  }
 0x590   :  { %4949 = vmatpush1.bf16.msra.mxu1 %v9806_v8  ;;  %5565 = vmatpush1.bf16.msra.mxu0 %v9809_v36  ;;  %v9883_v8 = vld [vmem:[#allocation15 + $0xe6c] ss:$16 sps:$4 sm:$0xff]   ;;  %v9878_v36 = vld [vmem:[#allocation15 + $0xc60] ss:$16 sps:$4 sm:$0xff]  }
 0x591   :  { %5221 = vmatprep.subr.bf16.mxu1 %v9814_v34  ;;  %5838 = vmatprep.subr.bf16.mxu0 %v9817_v2  ;;  %v9881_v34 = vld [vmem:[#allocation15 + $0xe68] ss:$16 sps:$4 sm:$0xff]   ;;  %v9886_v2 = vld [vmem:[#allocation15 + $0xc84] ss:$16 sps:$4 sm:$0xff]  }
 0x593   :  { %4967 = vmatmul.mubr.bf16.vlgmr.msra.gmra.mrb[60].mxu1 %v11453_v42  ;;  %5583 = vmatmul.mubr.bf16.vlgmr.msra.gmra.mrb[60].mxu0 %v11493_v26  ;;  %v9832_v42 = vld [vmem:[#allocation15 + $0xb64] ss:$16 sps:$4 sm:$0xff]  }
 0x594   :  { %5222 = vmatpush1.bf16.msra.mxu1 %v9812_v19  ;;  %5839 = vmatpush1.bf16.msra.mxu0 %v9815_v63  ;;  %v9889_v19 = vld [vmem:[#allocation15 + $0xe8c] ss:$16 sps:$4 sm:$0xff]   ;;  %v9884_v63 = vld [vmem:[#allocation15 + $0xc80] ss:$16 sps:$4 sm:$0xff]  }
 0x595   :  { %5223 = vmatprep.subr.bf16.mxu1 %v9820_v44  ;;  %5840 = vmatprep.subr.bf16.mxu0 %v9823_v54  ;;  %v9887_v44 = vld [vmem:[#allocation15 + $0xe88] ss:$16 sps:$4 sm:$0xff]   ;;  %v9892_v54 = vld [vmem:[#allocation15 + $0xca4] ss:$16 sps:$4 sm:$0xff]  }
 0x596   :  { %5253 = vmatprep.mubr.bf16.mxu1 %v10572_v20  ;;  %5870 = vmatprep.mubr.bf16.mxu0 %v10572_v20 }
 0x598   :  { %5224 = vmatpush1.bf16.msra.mxu1 %v9818_v53  ;;  %5841 = vmatpush1.bf16.msra.mxu0 %v9821_v38  ;;  %v9895_v53 = vld [vmem:[#allocation15 + $0xeac] ss:$16 sps:$4 sm:$0xff]   ;;  %v9890_v38 = vld [vmem:[#allocation15 + $0xca0] ss:$16 sps:$4 sm:$0xff]  }
 0x599   :  { %5225 = vmatprep.subr.bf16.mxu1 %v9826_v55  ;;  %5842 = vmatprep.subr.bf16.mxu0 %v9829_v61  ;;  %v9893_v55 = vld [vmem:[#allocation15 + $0xea8] ss:$16 sps:$4 sm:$0xff]   ;;  %v9898_v61 = vld [vmem:[#allocation15 + $0xcc4] ss:$16 sps:$4 sm:$0xff]  }
 0x59c   :  { %5226 = vmatpush1.bf16.msra.mxu1 %v9824_v11  ;;  %5843 = vmatpush1.bf16.msra.mxu0 %v9827_v0  ;;  %v9901_v11 = vld [vmem:[#allocation15 + $0xecc] ss:$16 sps:$4 sm:$0xff]  }
 0x59d   :  { %5227 = vmatprep.subr.bf16.mxu1 %v9832_v42  ;;  %5844 = vmatprep.subr.bf16.mxu0 %v9835_v6 }
 0x5a0   :  { %5228 = vmatpush1.bf16.msra.mxu1 %v9830_v51  ;;  %5845 = vmatpush1.bf16.msra.mxu0 %v9833_v29 }
 0x5a1   :  { %5229 = vmatprep.subr.bf16.mxu1 %v9838_v59  ;;  %5846 = vmatprep.subr.bf16.mxu0 %v9841_v28 }
 0x5a4   :  { %5230 = vmatpush1.bf16.msra.mxu1 %v9836_v49  ;;  %5847 = vmatpush1.bf16.msra.mxu0 %v9839_v3 }
 0x5a5   :  { %5231 = vmatprep.subr.bf16.mxu1 %v9844_v16  ;;  %5848 = vmatprep.subr.bf16.mxu0 %v9847_v12  ;;  %v9896_v12 = vld [vmem:[#allocation15 + $0xcc0] ss:$16 sps:$4 sm:$0xff]  }
 0x5a6   :  { %v3239_v23 = vpop.f32.mrb[36].mxu1  ;;  %v3856_v14 = vpop.f32.mrb[36].mxu0 }
 0x5a7   :  { %v11500_v45 = vadd.f32 %v3239_v23, %v11480_v32  ;;  %v11503_v56 = vadd.f32 %v3856_v14, %v11483_v48  ;;  %v3241_v15 = vpop.f32.mrb[37].mxu1  ;;  %v3858_v5 = vpop.f32.mrb[37].mxu0  ;;  %v9854_v32 = vld [vmem:[#allocation15 + $0xbe0] ss:$16 sps:$4 sm:$0xff]   ;;  %v9857_v48 = vld [vmem:[#allocation15 + $0xde8] ss:$16 sps:$4 sm:$0xff]  }
 0x5a8   :  { %v11506_v22 = vadd.f32 %v3241_v15, %v11486_v37  ;;  %v11509_v24 = vadd.f32 %v3858_v5, %v11489_v39  ;;  %v3243_v50 = vpop.f32.mrb[38].mxu1  ;;  %v3860_v52 = vpop.f32.mrb[38].mxu0  ;;  %5232 = vmatpush1.bf16.msra.mxu1 %v9842_v13  ;;  %5849 = vmatpush1.bf16.msra.mxu0 %v9845_v1  ;;  %v9860_v37 = vld [vmem:[#allocation15 + $0xc00] ss:$16 sps:$4 sm:$0xff]   ;;  %v9863_v39 = vld [vmem:[#allocation15 + $0xe08] ss:$16 sps:$4 sm:$0xff]  }
 0x5a9   :  { %v3244_v30 = vpop.f32.mrb[39].mxu1  ;;  %v3861_v9 = vpop.f32.mrb[39].mxu0  ;;  %5233 = vmatprep.subr.bf16.mxu1 %v9850_v27  ;;  %5850 = vmatprep.subr.bf16.mxu0 %v9853_v25  ;;  %v9899_v13 = vld [vmem:[#allocation15 + $0xec8] ss:$16 sps:$4 sm:$0xff]   ;;  %v9904_v25 = vld [vmem:[#allocation15 + $0xce4] ss:$16 sps:$4 sm:$0xff]  }
 0x5aa   :  { %v9907_v23 = vld [vmem:[#allocation15 + $0xeec] ss:$16 sps:$4 sm:$0xff]   ;;  %v9902_v14 = vld [vmem:[#allocation15 + $0xce0] ss:$16 sps:$4 sm:$0xff]   ;;  %v9916_v50 = vld [vmem:[#allocation15 + $0xd24] ss:$16 sps:$4 sm:$0xff]  }
 0x5ab   :  { %v9913_v15 = vld [vmem:[#allocation15 + $0xf0c] ss:$16 sps:$4 sm:$0xff]   ;;  %v9908_v5 = vld [vmem:[#allocation15 + $0xd00] ss:$16 sps:$4 sm:$0xff]   ;;  %v9922_v30 = vld [vmem:[#allocation15 + $0xd44] ss:$16 sps:$4 sm:$0xff]  }
 0x5ac   :  { %5234 = vmatpush1.bf16.msra.mxu1 %v9848_v35  ;;  %5851 = vmatpush1.bf16.msra.mxu0 %v9851_v21  ;;  %v9919_v52 = vld [vmem:[#allocation15 + $0xf2c] ss:$16 sps:$4 sm:$0xff]   ;;  %v9914_v35 = vld [vmem:[#allocation15 + $0xd20] ss:$16 sps:$4 sm:$0xff]   ;;  %v9917_v21 = vld [vmem:[#allocation15 + $0xf28] ss:$16 sps:$4 sm:$0xff]  }
 0x5ad   :  { %5235 = vmatprep.subr.bf16.mxu1 %v9856_v46  ;;  %5852 = vmatprep.subr.bf16.mxu0 %v9859_v62  ;;  %v9925_v9 = vld [vmem:[#allocation15 + $0xf4c] ss:$16 sps:$4 sm:$0xff]   ;;  %v9923_v46 = vld [vmem:[#allocation15 + $0xf48] ss:$16 sps:$4 sm:$0xff]  }
 0x5ae   :  { %v9931_v62 = vld [vmem:[#allocation15 + $0xf6c] ss:$16 sps:$4 sm:$0xff]  }
 0x5b0   :  { %5236 = vmatpush1.bf16.msra.mxu1 %v9854_v32  ;;  %5853 = vmatpush1.bf16.msra.mxu0 %v9857_v48  ;;  %v9926_v32 = vld [vmem:[#allocation15 + $0xd60] ss:$16 sps:$4 sm:$0xff]   ;;  %v9929_v48 = vld [vmem:[#allocation15 + $0xf68] ss:$16 sps:$4 sm:$0xff]  }
 0x5b1   :  { %5509 = vmatprep.subr.bf16.mxu1 %v9862_v7  ;;  %6126 = vmatprep.subr.bf16.mxu0 %v9865_v60  ;;  %v9934_v7 = vld [vmem:[#allocation15 + $0xd84] ss:$16 sps:$4 sm:$0xff]   ;;  %v9937_v60 = vld [vmem:[#allocation15 + $0xf8c] ss:$16 sps:$4 sm:$0xff]  }
 0x5b3   :  { %5254 = vmatmul.mubr.bf16.vlgmr.msra.gmra.mrb[64].mxu1 %v11473_v10  ;;  %5871 = vmatmul.mubr.bf16.vlgmr.msra.gmra.mrb[64].mxu0 %v11513_v40  ;;  %v9880_v10 = vld [vmem:[#allocation15 + $0xc64] ss:$16 sps:$4 sm:$0xff]  }
 0x5b4   :  { %5510 = vmatpush1.bf16.msra.mxu1 %v9860_v37  ;;  %6127 = vmatpush1.bf16.msra.mxu0 %v9863_v39  ;;  %v9932_v37 = vld [vmem:[#allocation15 + $0xd80] ss:$16 sps:$4 sm:$0xff]   ;;  %v9935_v39 = vld [vmem:[#allocation15 + $0xf88] ss:$16 sps:$4 sm:$0xff]  }
 0x5b5   :  { %5511 = vmatprep.subr.bf16.mxu1 %v9868_v4  ;;  %6128 = vmatprep.subr.bf16.mxu0 %v9871_v41  ;;  %v9940_v4 = vld [vmem:[#allocation15 + $0xda4] ss:$16 sps:$4 sm:$0xff]   ;;  %v9943_v41 = vld [vmem:[#allocation15 + $0xfac] ss:$16 sps:$4 sm:$0xff]  }
 0x5b6   :  { %5541 = vmatprep.mubr.bf16.mxu1 %v10572_v20  ;;  %6158 = vmatprep.mubr.bf16.mxu0 %v10572_v20 }
 0x5b8   :  { %5512 = vmatpush1.bf16.msra.mxu1 %v9866_v57  ;;  %6129 = vmatpush1.bf16.msra.mxu0 %v9869_v43  ;;  %v9938_v57 = vld [vmem:[#allocation15 + $0xda0] ss:$16 sps:$4 sm:$0xff]   ;;  %v9941_v43 = vld [vmem:[#allocation15 + $0xfa8] ss:$16 sps:$4 sm:$0xff]  }
 0x5b9   :  { %5513 = vmatprep.subr.bf16.mxu1 %v9874_v18  ;;  %6130 = vmatprep.subr.bf16.mxu0 %v9877_v47  ;;  %v9946_v18 = vld [vmem:[#allocation15 + $0xdc4] ss:$16 sps:$4 sm:$0xff]   ;;  %v9949_v47 = vld [vmem:[#allocation15 + $0xfcc] ss:$16 sps:$4 sm:$0xff]  }
 0x5bc   :  { %5514 = vmatpush1.bf16.msra.mxu1 %v9872_v17  ;;  %6131 = vmatpush1.bf16.msra.mxu0 %v9875_v31 }
 0x5bd   :  { %5515 = vmatprep.subr.bf16.mxu1 %v9880_v10  ;;  %6132 = vmatprep.subr.bf16.mxu0 %v9883_v8 }
 0x5c0   :  { %5516 = vmatpush1.bf16.msra.mxu1 %v9878_v36  ;;  %6133 = vmatpush1.bf16.msra.mxu0 %v9881_v34 }
 0x5c1   :  { %5517 = vmatprep.subr.bf16.mxu1 %v9886_v2  ;;  %6134 = vmatprep.subr.bf16.mxu0 %v9889_v19 }
 0x5c4   :  { %5518 = vmatpush1.bf16.msra.mxu1 %v9884_v63  ;;  %6135 = vmatpush1.bf16.msra.mxu0 %v9887_v44 }
 0x5c5   :  { %5519 = vmatprep.subr.bf16.mxu1 %v9892_v54  ;;  %6136 = vmatprep.subr.bf16.mxu0 %v9895_v53  ;;  %v9944_v54 = vld [vmem:[#allocation15 + $0xdc0] ss:$16 sps:$4 sm:$0xff]   ;;  %v9947_v53 = vld [vmem:[#allocation15 + $0xfc8] ss:$16 sps:$4 sm:$0xff]  }
 0x5c6   :  { %v3527_v0 = vpop.f32.mrb[40].mxu1  ;;  %v4144_v42 = vpop.f32.mrb[40].mxu0 }
 0x5c7   :  { %v11520_v6 = vadd.f32 %v3527_v0, %v11500_v45  ;;  %v11523_v51 = vadd.f32 %v4144_v42, %v11503_v56  ;;  %v3529_v29 = vpop.f32.mrb[41].mxu1  ;;  %v4146_v59 = vpop.f32.mrb[41].mxu0  ;;  %v9905_v45 = vld [vmem:[#allocation15 + $0xee8] ss:$16 sps:$4 sm:$0xff]   ;;  %v9910_v56 = vld [vmem:[#allocation15 + $0xd04] ss:$16 sps:$4 sm:$0xff]  }
 0x5c8   :  { %v11526_v28 = vadd.f32 %v3529_v29, %v11506_v22  ;;  %v11529_v49 = vadd.f32 %v4146_v59, %v11509_v24  ;;  %v3531_v3 = vpop.f32.mrb[42].mxu1  ;;  %v4148_v16 = vpop.f32.mrb[42].mxu0  ;;  %5520 = vmatpush1.bf16.msra.mxu1 %v9890_v38  ;;  %6137 = vmatpush1.bf16.msra.mxu0 %v9893_v55  ;;  %v9911_v22 = vld [vmem:[#allocation15 + $0xf08] ss:$16 sps:$4 sm:$0xff]   ;;  %v11533_v24 = vpack.c.b16 %v11355_v58, %v11355_v58  ;;  %v9920_v58 = vld [vmem:[#allocation15 + $0xd40] ss:$16 sps:$4 sm:$0xff]  }
 0x5c9   :  { %v3532_v1 = vpop.f32.mrb[43].mxu1  ;;  %v4149_v27 = vpop.f32.mrb[43].mxu0  ;;  %5521 = vmatprep.subr.bf16.mxu1 %v9898_v61  ;;  %6138 = vmatprep.subr.bf16.mxu0 %v9901_v11  ;;  %v9952_v61 = vld [vmem:[#allocation15 + $0xde4] ss:$16 sps:$4 sm:$0xff]   ;;  %v9955_v11 = vld [vmem:[#allocation15 + $0xfec] ss:$16 sps:$4 sm:$0xff]   ;;  %v11545_v29 = vpack.c.b16 %v11359_v33, %v11359_v33 }
 0x5ca   :  { %v9950_v0 = vld [vmem:[#allocation15 + $0xde0] ss:$16 sps:$4 sm:$0xff]   ;;  %v9953_v42 = vld [vmem:[#allocation15 + $0xfe8] ss:$16 sps:$4 sm:$0xff]   ;;  %v9961_v59 = vld [vmem:[#allocation15 + $0xe24] ss:$16 sps:$4 sm:$0xff]  }
 0x5cb   :  { %v9962_v3 = vld [vmem:[#allocation15 + $0xe40] ss:$16 sps:$4 sm:$0xff]   ;;  %v9967_v16 = vld [vmem:[#allocation15 + $0xe64] ss:$16 sps:$4 sm:$0xff]  }
 0x5cc   :  { %5522 = vmatpush1.bf16.msra.mxu1 %v9896_v12  ;;  %6139 = vmatpush1.bf16.msra.mxu0 %v9899_v13  ;;  %v9965_v12 = vld [vmem:[#allocation15 + $0xe60] ss:$16 sps:$4 sm:$0xff]   ;;  %v9970_v33 = vld [vmem:[#allocation15 + $0xe84] ss:$16 sps:$4 sm:$0xff]  }
 0x5cd   :  { %5523 = vmatprep.subr.bf16.mxu1 %v9904_v25  ;;  %6140 = vmatprep.subr.bf16.mxu0 %v9907_v23  ;;  %v9968_v13 = vld [vmem:[#allocation15 + $0xe80] ss:$16 sps:$4 sm:$0xff]   ;;  %v9976_v27 = vld [vmem:[#allocation15 + $0xec4] ss:$16 sps:$4 sm:$0xff]  }
 0x5ce   :  { %v9971_v1 = vld [vmem:[#allocation15 + $0xea0] ss:$16 sps:$4 sm:$0xff]  }
 0x5d0   :  { %5524 = vmatpush1.bf16.msra.mxu1 %v9902_v14  ;;  %6141 = vmatpush1.bf16.msra.mxu0 %v9905_v45 }
 0x5d1   :  { %5797 = vmatprep.subr.bf16.mxu1 %v9910_v56  ;;  %6414 = vmatprep.subr.bf16.mxu0 %v9913_v15 }
 0x5d3   :  { %5542 = vmatmul.mubr.bf16.vlgmr.msra.gmra.mrb[68].mxu1 %v11493_v26  ;;  %6159 = vmatmul.mubr.bf16.vlgmr.msra.gmra.mrb[68].mxu0 %v11533_v24  ;;  %v9928_v26 = vld [vmem:[#allocation15 + $0xd64] ss:$16 sps:$4 sm:$0xff]  }
 0x5d4   :  { %5798 = vmatpush1.bf16.msra.mxu1 %v9908_v5  ;;  %6415 = vmatpush1.bf16.msra.mxu0 %v9911_v22 }
 0x5d5   :  { %5799 = vmatprep.subr.bf16.mxu1 %v9916_v50  ;;  %6416 = vmatprep.subr.bf16.mxu0 %v9919_v52 }
 0x5d6   :  { %5829 = vmatprep.mubr.bf16.mxu1 %v10572_v20  ;;  %6446 = vmatprep.mubr.bf16.mxu0 %v10572_v20 }
 0x5d8   :  { %5800 = vmatpush1.bf16.msra.mxu1 %v9914_v35  ;;  %6417 = vmatpush1.bf16.msra.mxu0 %v9917_v21  ;;  %v9974_v35 = vld [vmem:[#allocation15 + $0xec0] ss:$16 sps:$4 sm:$0xff]  }
 0x5d9   :  { %5801 = vmatprep.subr.bf16.mxu1 %v9922_v30  ;;  %6418 = vmatprep.subr.bf16.mxu0 %v9925_v9  ;;  %v9979_v9 = vld [vmem:[#allocation15 + $0xee4] ss:$16 sps:$4 sm:$0xff]  }
 0x5dc   :  { %5802 = vmatpush1.bf16.msra.mxu1 %v9920_v58  ;;  %6419 = vmatpush1.bf16.msra.mxu0 %v9923_v46  ;;  %v9977_v58 = vld [vmem:[#allocation15 + $0xee0] ss:$16 sps:$4 sm:$0xff]   ;;  %v9982_v46 = vld [vmem:[#allocation15 + $0xf04] ss:$16 sps:$4 sm:$0xff]  }
 0x5dd   :  { %5803 = vmatprep.subr.bf16.mxu1 %v9928_v26  ;;  %6420 = vmatprep.subr.bf16.mxu0 %v9931_v62  ;;  %v9980_v26 = vld [vmem:[#allocation15 + $0xf00] ss:$16 sps:$4 sm:$0xff]   ;;  %v9985_v62 = vld [vmem:[#allocation15 + $0xf24] ss:$16 sps:$4 sm:$0xff]  }
 0x5e0   :  { %5804 = vmatpush1.bf16.msra.mxu1 %v9926_v32  ;;  %6421 = vmatpush1.bf16.msra.mxu0 %v9929_v48  ;;  %v9983_v32 = vld [vmem:[#allocation15 + $0xf20] ss:$16 sps:$4 sm:$0xff]   ;;  %v9988_v48 = vld [vmem:[#allocation15 + $0xf44] ss:$16 sps:$4 sm:$0xff]  }
 0x5e1   :  { %5805 = vmatprep.subr.bf16.mxu1 %v9934_v7  ;;  %6422 = vmatprep.subr.bf16.mxu0 %v9937_v60  ;;  %v9986_v7 = vld [vmem:[#allocation15 + $0xf40] ss:$16 sps:$4 sm:$0xff]   ;;  %v9991_v60 = vld [vmem:[#allocation15 + $0xf64] ss:$16 sps:$4 sm:$0xff]  }
 0x5e4   :  { %5806 = vmatpush1.bf16.msra.mxu1 %v9932_v37  ;;  %6423 = vmatpush1.bf16.msra.mxu0 %v9935_v39  ;;  %v9989_v37 = vld [vmem:[#allocation15 + $0xf60] ss:$16 sps:$4 sm:$0xff]   ;;  %v9994_v39 = vld [vmem:[#allocation15 + $0xf84] ss:$16 sps:$4 sm:$0xff]  }
 0x5e5   :  { %5807 = vmatprep.subr.bf16.mxu1 %v9940_v4  ;;  %6424 = vmatprep.subr.bf16.mxu0 %v9943_v41  ;;  %v9992_v4 = vld [vmem:[#allocation15 + $0xf80] ss:$16 sps:$4 sm:$0xff]   ;;  %v9997_v41 = vld [vmem:[#allocation15 + $0xfa4] ss:$16 sps:$4 sm:$0xff]  }
 0x5e6   :  { %v3815_v17 = vpop.f32.mrb[44].mxu1  ;;  %v4435_v31 = vpop.f32.mrb[44].mxu0 }
 0x5e7   :  { %v3863_v10 = vadd.f32 %v3815_v17, %v11520_v6  ;;  %v4444_v8 = vadd.f32 %v4435_v31, %v11523_v51  ;;  %v3817_v36 = vpop.f32.mrb[45].mxu1  ;;  %v4437_v34 = vpop.f32.mrb[45].mxu0  ;;  %v9958_v6 = vld [vmem:[#allocation15 + $0xe04] ss:$16 sps:$4 sm:$0xff]   ;;  %v9956_v51 = vld [vmem:[#allocation15 + $0xe00] ss:$16 sps:$4 sm:$0xff]  }
 0x5e8   :  { %v3864_v2 = vadd.f32 %v3817_v36, %v11526_v28  ;;  %v4445_v19 = vadd.f32 %v4437_v34, %v11529_v49  ;;  %v3819_v63 = vpop.f32.mrb[46].mxu1  ;;  %v4439_v44 = vpop.f32.mrb[46].mxu0  ;;  %5808 = vmatpush1.bf16.msra.mxu1 %v9938_v57  ;;  %6425 = vmatpush1.bf16.msra.mxu0 %v9941_v43  ;;  %v9959_v28 = vld [vmem:[#allocation15 + $0xe20] ss:$16 sps:$4 sm:$0xff]   ;;  %v9964_v49 = vld [vmem:[#allocation15 + $0xe44] ss:$16 sps:$4 sm:$0xff]  }
 0x5e9   :  { %v3820_v38 = vpop.f32.mrb[47].mxu1  ;;  %v4440_v55 = vpop.f32.mrb[47].mxu0  ;;  %5809 = vmatprep.subr.bf16.mxu1 %v9946_v18  ;;  %6426 = vmatprep.subr.bf16.mxu0 %v9949_v47  ;;  %v10000_v57 = vld [vmem:[#allocation15 + $0xfc4] ss:$16 sps:$4 sm:$0xff]  }
 0x5ea   :  { %v10003_v44 = vld [vmem:[#allocation15 + $0xfe4] ss:$16 sps:$4 sm:$0xff]  }
 0x5ec   :  { %5810 = vmatpush1.bf16.msra.mxu1 %v9944_v54  ;;  %6427 = vmatpush1.bf16.msra.mxu0 %v9947_v53  ;;  %v10001_v54 = vld [vmem:[#allocation15 + $0xfe0] ss:$16 sps:$4 sm:$0xff]  }
 0x5ed   :  { %5811 = vmatprep.subr.bf16.mxu1 %v9952_v61  ;;  %6428 = vmatprep.subr.bf16.mxu0 %v9955_v11 }
 0x5f0   :  { %5812 = vmatpush1.bf16.msra.mxu1 %v9950_v0  ;;  %6429 = vmatpush1.bf16.msra.mxu0 %v9953_v42 }
 0x5f1   :  { %6085 = vmatprep.subr.bf16.mxu1 %v9958_v6 }
 0x5f3   :  { %5830 = vmatmul.mubr.bf16.vlgmr.msra.gmra.mrb[72].mxu1 %v11513_v40  ;;  %6447 = vmatmul.mubr.bf16.vlgmr.msra.gmra.mrb[72].mxu0 %v11545_v29  ;;  %v9973_v40 = vld [vmem:[#allocation15 + $0xea4] ss:$16 sps:$4 sm:$0xff]  }
 0x5f4   :  { %6086 = vmatpush1.bf16.msra.mxu1 %v9956_v51  ;;  %6117 = vmatprep.mubr.bf16.mxu1 %v10572_v20 }
 0x5f5   :  { %6087 = vmatprep.subr.bf16.mxu1 %v9961_v59 }
 0x5f8   :  { %6088 = vmatpush1.bf16.msra.mxu1 %v9959_v28 }
 0x5f9   :  { %6089 = vmatprep.subr.bf16.mxu1 %v9964_v49 }
 0x5fc   :  { %6090 = vmatpush1.bf16.msra.mxu1 %v9962_v3  ;;  %v10004_v3 = vld [vmem:[#allocation18] ss:$16 sps:$4 sm:$0xff]  }
 0x5fd   :  { %6091 = vmatprep.subr.bf16.mxu1 %v9967_v16  ;;  %v10006_v16 = vld [vmem:[#allocation18 + $0x4] ss:$16 sps:$4 sm:$0xff]  }
 0x600   :  { %6092 = vmatpush1.bf16.msra.mxu1 %v9965_v12  ;;  %v10007_v12 = vld [vmem:[#allocation18 + $0x8] ss:$16 sps:$4 sm:$0xff]  }
 0x601   :  { %6093 = vmatprep.subr.bf16.mxu1 %v9970_v33  ;;  %v10009_v33 = vld [vmem:[#allocation18 + $0xc] ss:$16 sps:$4 sm:$0xff]  }
 0x602   :  { %7365 = vmatprep.subr.bf16.mxu0 %v10009_v33  ;;  %v10085_v33 = vld [vmem:[#allocation18 + $0x1a8] ss:$16 sps:$4 sm:$0xff]  }
 0x603   :  { %7366 = vmatpush1.bf16.msra.mxu0 %v10007_v12  ;;  %v10082_v12 = vld [vmem:[#allocation18 + $0x1a0] ss:$16 sps:$4 sm:$0xff]  }
 0x604   :  { %6094 = vmatpush1.bf16.msra.mxu1 %v9968_v13  ;;  %v10012_v13 = vld [vmem:[#allocation18 + $0x24] ss:$16 sps:$4 sm:$0xff]  }
 0x605   :  { %6095 = vmatprep.subr.bf16.mxu1 %v9973_v40  ;;  %v10015_v40 = vld [vmem:[#allocation18 + $0x2c] ss:$16 sps:$4 sm:$0xff]  }
 0x606   :  { %v4103_v25 = vpop.f32.mrb[48].mxu1  ;;  %v4722_v23 = vpop.f32.mrb[48].mxu0  ;;  %7367 = vmatprep.subr.bf16.mxu0 %v10015_v40 }
 0x607   :  { %v4151_v14 = vadd.f32 %v4103_v25, %v3863_v10  ;;  %v4731_v45 = vadd.f32 %v4722_v23, %v4444_v8  ;;  %v4105_v56 = vpop.f32.mrb[49].mxu1  ;;  %v4724_v15 = vpop.f32.mrb[49].mxu0  ;;  %v10021_v25 = vld [vmem:[#allocation18 + $0x4c] ss:$16 sps:$4 sm:$0xff]   ;;  %v10016_v23 = vld [vmem:[#allocation18 + $0x40] ss:$16 sps:$4 sm:$0xff]  }
 0x608   :  { %v4152_v5 = vadd.f32 %v4105_v56, %v3864_v2  ;;  %v4732_v22 = vadd.f32 %v4724_v15, %v4445_v19  ;;  %v4107_v50 = vpop.f32.mrb[50].mxu1  ;;  %v4726_v52 = vpop.f32.mrb[50].mxu0  ;;  %6096 = vmatpush1.bf16.msra.mxu1 %v9971_v1  ;;  %v9998_v2 = vld [vmem:[#allocation15 + $0xfc0] ss:$16 sps:$4 sm:$0xff]   ;;  %v10013_v1 = vld [vmem:[#allocation18 + $0x28] ss:$16 sps:$4 sm:$0xff]  }
 0x609   :  { %v4108_v21 = vpop.f32.mrb[51].mxu1  ;;  %v4727_v30 = vpop.f32.mrb[51].mxu0  ;;  %6097 = vmatprep.subr.bf16.mxu1 %v9976_v27  ;;  %v10018_v27 = vld [vmem:[#allocation18 + $0x44] ss:$16 sps:$4 sm:$0xff]   ;;  %7368 = vmatpush1.bf16.msra.mxu0 %v10013_v1  ;;  %v10027_v56 = vld [vmem:[#allocation18 + $0x6c] ss:$16 sps:$4 sm:$0xff]  }
 0x60a   :  { %7369 = vmatprep.subr.bf16.mxu0 %v10021_v25  ;;  %v10022_v15 = vld [vmem:[#allocation18 + $0x60] ss:$16 sps:$4 sm:$0xff]   ;;  %v10033_v50 = vld [vmem:[#allocation18 + $0x8c] ss:$16 sps:$4 sm:$0xff]   ;;  %v10036_v21 = vld [vmem:[#allocation18 + $0xa4] ss:$16 sps:$4 sm:$0xff]  }
 0x60b   :  { %v10028_v52 = vld [vmem:[#allocation18 + $0x80] ss:$16 sps:$4 sm:$0xff]   ;;  %v10039_v30 = vld [vmem:[#allocation18 + $0xac] ss:$16 sps:$4 sm:$0xff]  }
 0x60c   :  { %6098 = vmatpush1.bf16.msra.mxu1 %v9974_v35  ;;  %v10031_v35 = vld [vmem:[#allocation18 + $0x88] ss:$16 sps:$4 sm:$0xff]  }
 0x60d   :  { %6099 = vmatprep.subr.bf16.mxu1 %v9979_v9  ;;  %v10034_v9 = vld [vmem:[#allocation18 + $0xa0] ss:$16 sps:$4 sm:$0xff]  }
 0x610   :  { %6100 = vmatpush1.bf16.msra.mxu1 %v9977_v58  ;;  %v10037_v58 = vld [vmem:[#allocation18 + $0xa8] ss:$16 sps:$4 sm:$0xff]  }
 0x611   :  { %6373 = vmatprep.subr.bf16.mxu1 %v9982_v46 }
 0x613   :  { %6118 = vmatmul.mubr.bf16.vlgmr.msra.gmra.mrb[76].mxu1 %v11533_v24  ;;  %v9995_v24 = vld [vmem:[#allocation15 + $0xfa0] ss:$16 sps:$4 sm:$0xff]  }
 0x614   :  { %6374 = vmatpush1.bf16.msra.mxu1 %v9980_v26  ;;  %6405 = vmatprep.mubr.bf16.mxu1 %v10572_v20 }
 0x615   :  { %6375 = vmatprep.subr.bf16.mxu1 %v9985_v62 }
 0x618   :  { %6376 = vmatpush1.bf16.msra.mxu1 %v9983_v32 }
 0x619   :  { %6377 = vmatprep.subr.bf16.mxu1 %v9988_v48 }
 0x61c   :  { %6378 = vmatpush1.bf16.msra.mxu1 %v9986_v7 }
 0x61d   :  { %6379 = vmatprep.subr.bf16.mxu1 %v9991_v60 }
 0x620   :  { %6380 = vmatpush1.bf16.msra.mxu1 %v9989_v37 }
 0x621   :  { %6381 = vmatprep.subr.bf16.mxu1 %v9994_v39 }
 0x624   :  { %6382 = vmatpush1.bf16.msra.mxu1 %v9992_v4 }
 0x625   :  { %6383 = vmatprep.subr.bf16.mxu1 %v9997_v41  ;;  %v10040_v41 = vld [vmem:[#allocation18 + $0xc0] ss:$16 sps:$4 sm:$0xff]  }
 0x626   :  { %v4394_v43 = vpop.f32.mrb[52].mxu1  ;;  %v5009_v20 = vpop.f32.mrb[52].mxu0 }
 0x627   :  { %v4442_v18 = vadd.f32 %v4394_v43, %v4151_v14  ;;  %v5018_v47 = vadd.f32 %v5009_v20, %v4731_v45  ;;  %v4396_v17 = vpop.f32.mrb[53].mxu1  ;;  %v5011_v31 = vpop.f32.mrb[53].mxu0  ;;  %v10019_v14 = vld [vmem:[#allocation18 + $0x48] ss:$16 sps:$4 sm:$0xff]   ;;  %v10024_v45 = vld [vmem:[#allocation18 + $0x64] ss:$16 sps:$4 sm:$0xff]  }
 0x628   :  { %v4443_v10 = vadd.f32 %v4396_v17, %v4152_v5  ;;  %v5019_v8 = vadd.f32 %v5011_v31, %v4732_v22  ;;  %v4398_v36 = vpop.f32.mrb[54].mxu1  ;;  %v5013_v34 = vpop.f32.mrb[54].mxu0  ;;  %6384 = vmatpush1.bf16.msra.mxu1 %v9995_v24  ;;  %7370 = vmatpush1.bf16.msra.mxu0 %v10019_v14  ;;  %v10025_v5 = vld [vmem:[#allocation18 + $0x68] ss:$16 sps:$4 sm:$0xff]   ;;  %v10030_v22 = vld [vmem:[#allocation18 + $0x84] ss:$16 sps:$4 sm:$0xff]  }
 0x629   :  { %v4399_v19 = vpop.f32.mrb[55].mxu1  ;;  %v5014_v63 = vpop.f32.mrb[55].mxu0  ;;  %6385 = vmatprep.subr.bf16.mxu1 %v10000_v57  ;;  %7371 = vmatprep.subr.bf16.mxu0 %v10027_v56  ;;  %v10042_v24 = vld [vmem:[#allocation18 + $0xc4] ss:$16 sps:$4 sm:$0xff]   ;;  %v10043_v20 = vld [vmem:[#allocation18 + $0xc8] ss:$16 sps:$4 sm:$0xff]  }
 0x62a   :  { %v10046_v17 = vld [vmem:[#allocation18 + $0xe0] ss:$16 sps:$4 sm:$0xff]   ;;  %v10051_v31 = vld [vmem:[#allocation18 + $0xec] ss:$16 sps:$4 sm:$0xff]   ;;  %v10060_v19 = vld [vmem:[#allocation18 + $0x124] ss:$16 sps:$4 sm:$0xff]  }
 0x62b   :  { %v10057_v36 = vld [vmem:[#allocation18 + $0x10c] ss:$16 sps:$4 sm:$0xff]   ;;  %v10052_v34 = vld [vmem:[#allocation18 + $0x100] ss:$16 sps:$4 sm:$0xff]  }
 0x62c   :  { %6386 = vmatpush1.bf16.msra.mxu1 %v9998_v2  ;;  %7372 = vmatpush1.bf16.msra.mxu0 %v10025_v5  ;;  %v10055_v2 = vld [vmem:[#allocation18 + $0x108] ss:$16 sps:$4 sm:$0xff]   ;;  %v10063_v63 = vld [vmem:[#allocation18 + $0x12c] ss:$16 sps:$4 sm:$0xff]  }
 0x62d   :  { %6387 = vmatprep.subr.bf16.mxu1 %v10003_v44  ;;  %7373 = vmatprep.subr.bf16.mxu0 %v10033_v50  ;;  %v10058_v44 = vld [vmem:[#allocation18 + $0x120] ss:$16 sps:$4 sm:$0xff]   ;;  %v10090_v50 = vld [vmem:[#allocation18 + $0x1c4] ss:$16 sps:$4 sm:$0xff]  }
 0x630   :  { %6388 = vmatpush1.bf16.msra.mxu1 %v10001_v54  ;;  %7374 = vmatpush1.bf16.msra.mxu0 %v10031_v35  ;;  %v10061_v54 = vld [vmem:[#allocation18 + $0x128] ss:$16 sps:$4 sm:$0xff]   ;;  %v10093_v35 = vld [vmem:[#allocation18 + $0x1cc] ss:$16 sps:$4 sm:$0xff]  }
 0x631   :  { %7283 = vmatprep.subr.bf16.mxu1 %v10006_v16  ;;  %7375 = vmatprep.subr.bf16.mxu0 %v10039_v30  ;;  %v10087_v16 = vld [vmem:[#allocation18 + $0x1ac] ss:$16 sps:$4 sm:$0xff]  }
 0x632   :  { %v10099_v30 = vld [vmem:[#allocation18 + $0x1ec] ss:$16 sps:$4 sm:$0xff]  }
 0x633   :  { %6406 = vmatmul.mubr.bf16.vlgmr.msra.gmra.mrb[80].mxu1 %v11545_v29  ;;  %v10010_v29 = vld [vmem:[#allocation18 + $0x20] ss:$16 sps:$4 sm:$0xff]  }
 0x634   :  { %7284 = vmatpush1.bf16.msra.mxu1 %v10004_v3  ;;  %7376 = vmatpush1.bf16.msra.mxu0 %v10037_v58  ;;  %v10084_v3 = vld [vmem:[#allocation18 + $0x1a4] ss:$16 sps:$4 sm:$0xff]   ;;  %v10097_v58 = vld [vmem:[#allocation18 + $0x1e8] ss:$16 sps:$4 sm:$0xff]  }
 0x635   :  { %7285 = vmatprep.subr.bf16.mxu1 %v10012_v13 }
 0x638   :  { %7286 = vmatpush1.bf16.msra.mxu1 %v10010_v29 }
 0x639   :  { %7287 = vmatprep.subr.bf16.mxu1 %v10018_v27 }
 0x63c   :  { %7288 = vmatpush1.bf16.msra.mxu1 %v10016_v23 }
 0x63d   :  { %7289 = vmatprep.subr.bf16.mxu1 %v10024_v45 }
 0x640   :  { %7290 = vmatpush1.bf16.msra.mxu1 %v10022_v15 }
 0x641   :  { %7291 = vmatprep.subr.bf16.mxu1 %v10030_v22  ;;  %v10088_v22 = vld [vmem:[#allocation18 + $0x1c0] ss:$16 sps:$4 sm:$0xff]  }
 0x644   :  { %7292 = vmatpush1.bf16.msra.mxu1 %v10028_v52  ;;  %v10091_v52 = vld [vmem:[#allocation18 + $0x1c8] ss:$16 sps:$4 sm:$0xff]  }
 0x645   :  { %7293 = vmatprep.subr.bf16.mxu1 %v10036_v21  ;;  %v10096_v21 = vld [vmem:[#allocation18 + $0x1e4] ss:$16 sps:$4 sm:$0xff]  }
 0x646   :  { %v4681_v53 = vpop.f32.mrb[56].mxu1  ;;  %v5296_v38 = vpop.f32.mrb[56].mxu0 }
 0x647   :  { %v4729_v55 = vadd.f32 %v4681_v53, %v4442_v18  ;;  %v5305_v61 = vadd.f32 %v5296_v38, %v5018_v47  ;;  %v4683_v11 = vpop.f32.mrb[57].mxu1  ;;  %v5298_v0 = vpop.f32.mrb[57].mxu0  ;;  %v10045_v18 = vld [vmem:[#allocation18 + $0xcc] ss:$16 sps:$4 sm:$0xff]   ;;  %v10048_v47 = vld [vmem:[#allocation18 + $0xe4] ss:$16 sps:$4 sm:$0xff]  }
 0x648   :  { %v4730_v42 = vadd.f32 %v4683_v11, %v4443_v10  ;;  %v5306_v6 = vadd.f32 %v5298_v0, %v5019_v8  ;;  %v4685_v51 = vpop.f32.mrb[58].mxu1  ;;  %v5300_v59 = vpop.f32.mrb[58].mxu0  ;;  %7294 = vmatpush1.bf16.msra.mxu1 %v10034_v9  ;;  %7377 = vmatprep.subr.bf16.mxu0 %v10045_v18  ;;  %v10049_v10 = vld [vmem:[#allocation18 + $0xe8] ss:$16 sps:$4 sm:$0xff]   ;;  %v10054_v8 = vld [vmem:[#allocation18 + $0x104] ss:$16 sps:$4 sm:$0xff]  }
 0x649   :  { %v4686_v28 = vpop.f32.mrb[59].mxu1  ;;  %v5301_v49 = vpop.f32.mrb[59].mxu0  ;;  %7295 = vmatprep.subr.bf16.mxu1 %v10042_v24  ;;  %7378 = vmatpush1.bf16.msra.mxu0 %v10043_v20  ;;  %v10066_v53 = vld [vmem:[#allocation18 + $0x144] ss:$16 sps:$4 sm:$0xff]   ;;  %v10069_v38 = vld [vmem:[#allocation18 + $0x14c] ss:$16 sps:$4 sm:$0xff]  }
 0x64a   :  { %7379 = vmatprep.subr.bf16.mxu0 %v10051_v31  ;;  %v10072_v11 = vld [vmem:[#allocation18 + $0x164] ss:$16 sps:$4 sm:$0xff]   ;;  %v10075_v0 = vld [vmem:[#allocation18 + $0x16c] ss:$16 sps:$4 sm:$0xff]   ;;  %v10076_v28 = vld [vmem:[#allocation18 + $0x180] ss:$16 sps:$4 sm:$0xff]  }
 0x64b   :  { %v10078_v51 = vld [vmem:[#allocation18 + $0x184] ss:$16 sps:$4 sm:$0xff]   ;;  %v10081_v59 = vld [vmem:[#allocation18 + $0x18c] ss:$16 sps:$4 sm:$0xff]   ;;  %v10079_v49 = vld [vmem:[#allocation18 + $0x188] ss:$16 sps:$4 sm:$0xff]  }
 0x64c   :  { %7296 = vmatpush1.bf16.msra.mxu1 %v10040_v41  ;;  %v10094_v9 = vld [vmem:[#allocation18 + $0x1e0] ss:$16 sps:$4 sm:$0xff]  }
 0x64d   :  { %7297 = vmatprep.subr.bf16.mxu1 %v10048_v47  ;;  %7380 = vmatpush1.bf16.msra.mxu0 %v10049_v10 }
 0x64e   :  { %7381 = vmatprep.subr.bf16.mxu0 %v10057_v36 }
 0x650   :  { %7298 = vmatpush1.bf16.msra.mxu1 %v10046_v17 }
 0x651   :  { %7299 = vmatprep.subr.bf16.mxu1 %v10054_v8  ;;  %7382 = vmatpush1.bf16.msra.mxu0 %v10055_v2 }
 0x652   :  { %7383 = vmatprep.subr.bf16.mxu0 %v10063_v63 }
 0x654   :  { %7300 = vmatpush1.bf16.msra.mxu1 %v10052_v34 }
 0x655   :  { %7301 = vmatprep.subr.bf16.mxu1 %v10060_v19  ;;  %7384 = vmatpush1.bf16.msra.mxu0 %v10061_v54 }
 0x656   :  { %7385 = vmatprep.subr.bf16.mxu0 %v10069_v38 }
 0x658   :  { %7302 = vmatpush1.bf16.msra.mxu1 %v10058_v44 }
 0x659   :  { %7303 = vmatprep.subr.bf16.mxu1 %v10066_v53 }
 0x666   :  { %v4968_v46 = vpop.f32.mrb[60].mxu1  ;;  %v5584_v26 = vpop.f32.mrb[60].mxu0 }
 0x667   :  { %v11553_v62 = vadd.f32 %v4968_v46, %v4729_v55  ;;  %v11555_v32 = vadd.f32 %v5584_v26, %v5305_v61  ;;  %v4970_v48 = vpop.f32.mrb[61].mxu1  ;;  %v5586_v7 = vpop.f32.mrb[61].mxu0  ;;  %v10064_v55 = vld [vmem:[#allocation18 + $0x140] ss:$16 sps:$4 sm:$0xff]   ;;  %v10067_v61 = vld [vmem:[#allocation18 + $0x148] ss:$16 sps:$4 sm:$0xff]  }
 0x668   :  { %v11557_v60 = vadd.f32 %v4970_v48, %v4730_v42  ;;  %v11559_v37 = vadd.f32 %v5586_v7, %v5306_v6  ;;  %v4972_v39 = vpop.f32.mrb[62].mxu1  ;;  %v5588_v4 = vpop.f32.mrb[62].mxu0  ;;  %7304 = vmatpush1.bf16.msra.mxu1 %v10064_v55  ;;  %v10070_v42 = vld [vmem:[#allocation18 + $0x160] ss:$16 sps:$4 sm:$0xff]   ;;  %7386 = vmatpush1.bf16.msra.mxu0 %v10067_v61  ;;  %v10073_v6 = vld [vmem:[#allocation18 + $0x168] ss:$16 sps:$4 sm:$0xff]  }
 0x669   :  { %v4973_v57 = vpop.f32.mrb[63].mxu1  ;;  %v5589_v43 = vpop.f32.mrb[63].mxu0  ;;  %7305 = vmatprep.subr.bf16.mxu1 %v10072_v11  ;;  %7387 = vmatprep.subr.bf16.mxu0 %v10075_v0  ;;  %v10102_v46 = vld [vmem:[#allocation18 + $0x204] ss:$16 sps:$4 sm:$0xff]   ;;  %v10105_v26 = vld [vmem:[#allocation18 + $0x20c] ss:$16 sps:$4 sm:$0xff]   ;;  %v6461_v11 = vlaneseq }
 0x66b   :  { %v11567_v0 = vshrl.u32 %v6461_v11, 7  ;;  %v10165_v11 = vld [vmem:[#allocation18 + $0x34c] ss:$16 sps:$4 sm:$0xff]  }
 0x66c   :  { %7306 = vmatpush1.bf16.msra.mxu1 %v10070_v42  ;;  %7388 = vmatpush1.bf16.msra.mxu0 %v10073_v6 }
 0x66d   :  { %7307 = vmatprep.subr.bf16.mxu1 %v10078_v51  ;;  %7389 = vmatprep.subr.bf16.mxu0 %v10081_v59  ;;  %v6475_v42 = vsub.s32 3, %v11567_v0  ;;  %v6463_v6 = vsub.s32 0, %v11567_v0  ;;  %v11571_v51 = vld [vmem:[#allocation16] sm:$0xf]  ;;  %v6467_v59 = vsub.s32 1, %v11567_v0 }
 0x670   :  { %7308 = vmatpush1.bf16.msra.mxu1 %v10076_v28  ;;  %7390 = vmatpush1.bf16.msra.mxu0 %v10079_v49  ;;  %v6476_v28 = vrot.slane %v11571_v51, %v6475_v42  ;;  %v6464_v49 = vrot.slane %v11571_v51, %v6463_v6 }
 0x671   :  { %7309 = vmatprep.subr.bf16.mxu1 %v10084_v3  ;;  %7391 = vmatprep.subr.bf16.mxu0 %v10087_v16  ;;  %v6468_v16 = vrot.slane %v11571_v51, %v6467_v59 }
 0x674   :  { %7310 = vmatpush1.bf16.msra.mxu1 %v10082_v12  ;;  %7392 = vmatpush1.bf16.msra.mxu0 %v10085_v33 }
 0x675   :  { %7311 = vmatprep.subr.bf16.mxu1 %v10090_v50  ;;  %7393 = vmatprep.subr.bf16.mxu0 %v10093_v35  ;;  %v10108_v50 = vld [vmem:[#allocation18 + $0x224] ss:$16 sps:$4 sm:$0xff]  }
 0x678   :  { %7312 = vmatpush1.bf16.msra.mxu1 %v10088_v22  ;;  %7394 = vmatpush1.bf16.msra.mxu0 %v10091_v52  ;;  %v10111_v52 = vld [vmem:[#allocation18 + $0x22c] ss:$16 sps:$4 sm:$0xff]  }
 0x679   :  { %7313 = vmatprep.subr.bf16.mxu1 %v10096_v21  ;;  %7395 = vmatprep.subr.bf16.mxu0 %v10099_v30  ;;  %v10106_v21 = vld [vmem:[#allocation18 + $0x220] ss:$16 sps:$4 sm:$0xff]   ;;  %v10109_v30 = vld [vmem:[#allocation18 + $0x228] ss:$16 sps:$4 sm:$0xff]  }
 0x67c   :  { %7314 = vmatpush1.bf16.msra.mxu1 %v10094_v9  ;;  %7396 = vmatpush1.bf16.msra.mxu0 %v10097_v58  ;;  %v10114_v9 = vld [vmem:[#allocation18 + $0x244] ss:$16 sps:$4 sm:$0xff]   ;;  %v10117_v58 = vld [vmem:[#allocation18 + $0x24c] ss:$16 sps:$4 sm:$0xff]  }
 0x67d   :  { %7324 = vmatprep.subr.bf16.mxu1 %v10102_v46  ;;  %7406 = vmatprep.subr.bf16.mxu0 %v10105_v26  ;;  %v10112_v46 = vld [vmem:[#allocation18 + $0x240] ss:$16 sps:$4 sm:$0xff]   ;;  %v10115_v26 = vld [vmem:[#allocation18 + $0x248] ss:$16 sps:$4 sm:$0xff]  }
 0x686   :  { %v5255_v13 = vpop.f32.mrb[64].mxu1  ;;  %v5872_v40 = vpop.f32.mrb[64].mxu0 }
 0x687   :  { %v5303_v29 = vadd.f32 %v5255_v13, %v11553_v62  ;;  %v5881_v1 = vadd.f32 %v5872_v40, %v11555_v32  ;;  %v5257_v27 = vpop.f32.mrb[65].mxu1  ;;  %v5874_v25 = vpop.f32.mrb[65].mxu0 }
 0x688   :  { %v5304_v23 = vadd.f32 %v5257_v27, %v11557_v60  ;;  %v5882_v14 = vadd.f32 %v5874_v25, %v11559_v37  ;;  %v5259_v45 = vpop.f32.mrb[66].mxu1  ;;  %v5876_v56 = vpop.f32.mrb[66].mxu0 }
 0x689   :  { %v5260_v15 = vpop.f32.mrb[67].mxu1  ;;  %v5877_v5 = vpop.f32.mrb[67].mxu0 }
 0x68a   :  { %v10100_v15 = vld [vmem:[#allocation18 + $0x200] ss:$16 sps:$4 sm:$0xff]   ;;  %v10103_v5 = vld [vmem:[#allocation18 + $0x208] ss:$16 sps:$4 sm:$0xff]  }
 0x6a6   :  { %v5543_v62 = vpop.f32.mrb[68].mxu1  ;;  %v6160_v32 = vpop.f32.mrb[68].mxu0 }
 0x6a7   :  { %v5591_v48 = vadd.f32 %v5543_v62, %v5303_v29  ;;  %v6169_v7 = vadd.f32 %v6160_v32, %v5881_v1  ;;  %v5545_v60 = vpop.f32.mrb[69].mxu1  ;;  %v6162_v37 = vpop.f32.mrb[69].mxu0  ;;  %v10120_v62 = vld [vmem:[#allocation18 + $0x264] ss:$16 sps:$4 sm:$0xff]   ;;  %v10123_v32 = vld [vmem:[#allocation18 + $0x26c] ss:$16 sps:$4 sm:$0xff]  }
 0x6a8   :  { %v5592_v39 = vadd.f32 %v5545_v60, %v5304_v23  ;;  %v6170_v4 = vadd.f32 %v6162_v37, %v5882_v14  ;;  %v5547_v41 = vpop.f32.mrb[70].mxu1  ;;  %v6164_v24 = vpop.f32.mrb[70].mxu0  ;;  %v10126_v60 = vld [vmem:[#allocation18 + $0x284] ss:$16 sps:$4 sm:$0xff]   ;;  %v10129_v37 = vld [vmem:[#allocation18 + $0x28c] ss:$16 sps:$4 sm:$0xff]  }
 0x6a9   :  { %v5548_v57 = vpop.f32.mrb[71].mxu1  ;;  %v6165_v43 = vpop.f32.mrb[71].mxu0  ;;  %v10132_v41 = vld [vmem:[#allocation18 + $0x2a4] ss:$16 sps:$4 sm:$0xff]   ;;  %v10135_v24 = vld [vmem:[#allocation18 + $0x2ac] ss:$16 sps:$4 sm:$0xff]  }
 0x6aa   :  { %v10130_v57 = vld [vmem:[#allocation18 + $0x2a0] ss:$16 sps:$4 sm:$0xff]   ;;  %v10133_v43 = vld [vmem:[#allocation18 + $0x2a8] ss:$16 sps:$4 sm:$0xff]  }
 0x6c6   :  { %v5831_v20 = vpop.f32.mrb[72].mxu1  ;;  %v6448_v18 = vpop.f32.mrb[72].mxu0 }
 0x6c7   :  { %v5879_v47 = vadd.f32 %v5831_v20, %v5591_v48  ;;  %v11565_v17 = vadd.f32 %v6448_v18, %v6169_v7  ;;  %v5833_v31 = vpop.f32.mrb[73].mxu1  ;;  %v6450_v10 = vpop.f32.mrb[73].mxu0  ;;  %v10118_v48 = vld [vmem:[#allocation18 + $0x260] ss:$16 sps:$4 sm:$0xff]   ;;  %v10121_v7 = vld [vmem:[#allocation18 + $0x268] ss:$16 sps:$4 sm:$0xff]  }
 0x6c8   :  { %v5880_v8 = vadd.f32 %v5833_v31, %v5592_v39  ;;  %v6458_v36 = vadd.f32 %v6450_v10, %v6170_v4  ;;  %v5835_v34 = vpop.f32.mrb[74].mxu1  ;;  %v6452_v2 = vpop.f32.mrb[74].mxu0  ;;  %v10124_v39 = vld [vmem:[#allocation18 + $0x280] ss:$16 sps:$4 sm:$0xff]   ;;  %v10127_v4 = vld [vmem:[#allocation18 + $0x288] ss:$16 sps:$4 sm:$0xff]  }
 0x6c9   :  { %v5836_v19 = vpop.f32.mrb[75].mxu1  ;;  %v6453_v63 = vpop.f32.mrb[75].mxu0  ;;  %v10138_v20 = vld [vmem:[#allocation18 + $0x2c4] ss:$16 sps:$4 sm:$0xff]   ;;  %v10141_v18 = vld [vmem:[#allocation18 + $0x2cc] ss:$16 sps:$4 sm:$0xff]  }
 0x6ca   :  { %v6484_v29 = vadd.f32 %v6476_v28, %v6458_v36  ;;  %v10139_v31 = vld [vmem:[#allocation18 + $0x2c8] ss:$16 sps:$4 sm:$0xff]   ;;  %v10144_v10 = vld [vmem:[#allocation18 + $0x2e4] ss:$16 sps:$4 sm:$0xff]   ;;  %v10142_v36 = vld [vmem:[#allocation18 + $0x2e0] ss:$16 sps:$4 sm:$0xff]  }
 0x6cb   :  { %v10145_v34 = vld [vmem:[#allocation18 + $0x2e8] ss:$16 sps:$4 sm:$0xff]   ;;  %v10150_v2 = vld [vmem:[#allocation18 + $0x304] ss:$16 sps:$4 sm:$0xff]   ;;  %v10153_v19 = vld [vmem:[#allocation18 + $0x30c] ss:$16 sps:$4 sm:$0xff]  }
 0x6cc   :  { %v6488_v45 = vmax.f32 %v6484_v29, 0.0  ;;  %v10148_v63 = vld [vmem:[#allocation18 + $0x300] ss:$16 sps:$4 sm:$0xff]  }
 0x6cd   :  { %v10160_v28 = vld [vmem:[#allocation18 + $0x340] ss:$16 sps:$4 sm:$0xff]  }
 0x6ce   :  { %v6492_v35 = vpack.c.bf16 %v6488_v45, %v6488_v45  ;;  %v10172_v29 = vld [vmem:[#allocation18 + $0x380] ss:$16 sps:$4 sm:$0xff]   ;;  %v10181_v45 = vld [vmem:[#allocation18 + $0x3a8] ss:$16 sps:$4 sm:$0xff]  }
 0x6e6   :  { %v6119_v44 = vpop.f32.mrb[76].mxu1 }
 0x6e7   :  { %v6167_v54 = vadd.f32 %v6119_v44, %v5879_v47  ;;  %v6121_v53 = vpop.f32.mrb[77].mxu1  ;;  %v10136_v47 = vld [vmem:[#allocation18 + $0x2c0] ss:$16 sps:$4 sm:$0xff]   ;;  %v10151_v44 = vld [vmem:[#allocation18 + $0x308] ss:$16 sps:$4 sm:$0xff]  }
 0x6e8   :  { %v6168_v38 = vadd.f32 %v6121_v53, %v5880_v8  ;;  %v6123_v55 = vpop.f32.mrb[78].mxu1  ;;  %v10147_v8 = vld [vmem:[#allocation18 + $0x2ec] ss:$16 sps:$4 sm:$0xff]  }
 0x6e9   :  { %v6124_v61 = vpop.f32.mrb[79].mxu1  ;;  %v10159_v53 = vld [vmem:[#allocation18 + $0x32c] ss:$16 sps:$4 sm:$0xff]   ;;  %v10157_v55 = vld [vmem:[#allocation18 + $0x328] ss:$16 sps:$4 sm:$0xff]  }
 0x6ea   :  { %v10162_v61 = vld [vmem:[#allocation18 + $0x344] ss:$16 sps:$4 sm:$0xff]  }
 0x706   :  { %v6407_v3 = vpop.f32.mrb[80].mxu1 }
 0x707   :  { %v6455_v12 = vadd.f32 %v6407_v3, %v6167_v54  ;;  %v6409_v33 = vpop.f32.mrb[81].mxu1  ;;  %v10156_v54 = vld [vmem:[#allocation18 + $0x324] ss:$16 sps:$4 sm:$0xff]  }
 0x708   :  { %v6456_v13 = vadd.f32 %v6409_v33, %v6168_v38  ;;  %v6411_v40 = vpop.f32.mrb[82].mxu1  ;;  %v10154_v38 = vld [vmem:[#allocation18 + $0x320] ss:$16 sps:$4 sm:$0xff]   ;;  %v10168_v3 = vld [vmem:[#allocation18 + $0x364] ss:$16 sps:$4 sm:$0xff]  }
 0x709   :  { %v6481_v1 = vadd.f32 %v6464_v49, %v6455_v12  ;;  %v6412_v27 = vpop.f32.mrb[83].mxu1  ;;  %v10163_v49 = vld [vmem:[#allocation18 + $0x348] ss:$16 sps:$4 sm:$0xff]   ;;  %v10166_v12 = vld [vmem:[#allocation18 + $0x360] ss:$16 sps:$4 sm:$0xff]  }
 0x70a   :  { %v6482_v25 = vadd.f32 %v6468_v16, %v6456_v13  ;;  %v10171_v16 = vld [vmem:[#allocation18 + $0x36c] ss:$16 sps:$4 sm:$0xff]   ;;  %v10169_v33 = vld [vmem:[#allocation18 + $0x368] ss:$16 sps:$4 sm:$0xff]   ;;  %v10174_v13 = vld [vmem:[#allocation18 + $0x384] ss:$16 sps:$4 sm:$0xff]  }
 0x70b   :  { %v6485_v23 = vmax.f32 %v6481_v1, 0.0  ;;  %v10177_v40 = vld [vmem:[#allocation18 + $0x38c] ss:$16 sps:$4 sm:$0xff]   ;;  %v10175_v1 = vld [vmem:[#allocation18 + $0x388] ss:$16 sps:$4 sm:$0xff]   ;;  %v6471_v27 = vsub.s32 2, %v11567_v0 }
 0x70c   :  { %v6486_v14 = vmax.f32 %v6482_v25, 0.0  ;;  %v10180_v25 = vld [vmem:[#allocation18 + $0x3a4] ss:$16 sps:$4 sm:$0xff]  }
 0x70d   :  { %v6489_v22 = vpack.c.bf16 %v6485_v23, %v6485_v23  ;;  %v10183_v23 = vld [vmem:[#allocation18 + $0x3ac] ss:$16 sps:$4 sm:$0xff]  }
 0x70e   :  { %v6490_v56 = vpack.c.bf16 %v6486_v14, %v6486_v14  ;;  %v10178_v14 = vld [vmem:[#allocation18 + $0x3a0] ss:$16 sps:$4 sm:$0xff]  }
 0x710   :  { %7315 = vmatprep.mubr.bf16.mxu1 %v6490_v56  ;;  %7397 = vmatprep.mubr.bf16.mxu0 %v6490_v56  ;;  %v6472_v56 = vrot.slane %v11571_v51, %v6471_v27  ;;  %v10196_v51 = vld [vmem:[#allocation21 + $0x40] sm:$0xff]  }
 0x711   :  { %7316 = vmatmul.mubr.bf16.vlgmr.msra.gmra.mrb[84].mxu1 %v6489_v22  ;;  %7398 = vmatmul.mubr.bf16.vlgmr.msra.gmra.mrb[76].mxu0 %v6489_v22  ;;  %v10184_v22 = vld [vmem:[#allocation18 + $0x3c0] ss:$16 sps:$4 sm:$0xff]  }
 0x712   :  { %7325 = vmatpush1.bf16.msra.mxu1 %v10100_v15  ;;  %7407 = vmatpush1.bf16.msra.mxu0 %v10103_v5  ;;  %v10186_v15 = vld [vmem:[#allocation18 + $0x3c4] ss:$16 sps:$4 sm:$0xff]   ;;  %v10189_v5 = vld [vmem:[#allocation18 + $0x3cc] ss:$16 sps:$4 sm:$0xff]  }
 0x713   :  { %7356 = vmatprep.mubr.bf16.mxu1 %v6492_v35  ;;  %7438 = vmatprep.mubr.bf16.mxu0 %v6492_v35  ;;  %v10192_v35 = vld [vmem:[#allocation18 + $0x3e4] ss:$16 sps:$4 sm:$0xff]  }
 0x714   :  { %7326 = vmatprep.subr.bf16.mxu1 %v10108_v50  ;;  %7408 = vmatprep.subr.bf16.mxu0 %v10111_v52  ;;  %v10187_v50 = vld [vmem:[#allocation18 + $0x3c8] ss:$16 sps:$4 sm:$0xff]   ;;  %v6483_v52 = vadd.f32 %v6472_v56, %v11565_v17  ;;  %v10200_v17 = vld [vmem:[#allocation21 + $0x48] sm:$0xff]  }
 0x716   :  { %7327 = vmatpush1.bf16.msra.mxu1 %v10106_v21  ;;  %7409 = vmatpush1.bf16.msra.mxu0 %v10109_v30  ;;  %v10195_v21 = vld [vmem:[#allocation18 + $0x3ec] ss:$16 sps:$4 sm:$0xff]   ;;  %v10190_v30 = vld [vmem:[#allocation18 + $0x3e0] ss:$16 sps:$4 sm:$0xff]  }
 0x717   :  { %7328 = vmatprep.subr.bf16.mxu1 %v10114_v9  ;;  %7410 = vmatprep.subr.bf16.mxu0 %v10117_v58  ;;  %v10193_v9 = vld [vmem:[#allocation18 + $0x3e8] ss:$16 sps:$4 sm:$0xff]   ;;  %v6487_v58 = vmax.f32 %v6483_v52, 0.0 }
 0x71a   :  { %7329 = vmatpush1.bf16.msra.mxu1 %v10112_v46  ;;  %7411 = vmatpush1.bf16.msra.mxu0 %v10115_v26  ;;  %v10197_v46 = vld [vmem:[#allocation21 + $0xc0] sm:$0xff]  }
 0x71b   :  { %7330 = vmatprep.subr.bf16.mxu1 %v10120_v62  ;;  %7412 = vmatprep.subr.bf16.mxu0 %v10123_v32  ;;  %v10198_v26 = vld [vmem:[#allocation21] sm:$0xff]   ;;  %v6491_v32 = vpack.c.bf16 %v6487_v58, %v6487_v58 }
 0x71c   :  { %v10199_v62 = vld [vmem:[#allocation21 + $0x80] sm:$0xff]  }
 0x71e   :  { %7331 = vmatpush1.bf16.msra.mxu1 %v10118_v48  ;;  %7413 = vmatpush1.bf16.msra.mxu0 %v10121_v7  ;;  %v10201_v48 = vld [vmem:[#allocation21 + $0xc8] sm:$0xff]  }
 0x71f   :  { %7332 = vmatprep.subr.bf16.mxu1 %v10126_v60  ;;  %7414 = vmatprep.subr.bf16.mxu0 %v10129_v37  ;;  %v10202_v7 = vld [vmem:[#allocation21 + $0x8] sm:$0xff]   ;;  %v10204_v37 = vld [vmem:[#allocation21 + $0x50] sm:$0xff]  }
 0x720   :  { %v10203_v60 = vld [vmem:[#allocation21 + $0x88] sm:$0xff]  }
 0x722   :  { %7333 = vmatpush1.bf16.msra.mxu1 %v10124_v39  ;;  %7415 = vmatpush1.bf16.msra.mxu0 %v10127_v4  ;;  %v10205_v39 = vld [vmem:[#allocation21 + $0xd0] sm:$0xff]  }
 0x723   :  { %7334 = vmatprep.subr.bf16.mxu1 %v10132_v41  ;;  %7416 = vmatprep.subr.bf16.mxu0 %v10135_v24  ;;  %v10206_v4 = vld [vmem:[#allocation21 + $0x10] sm:$0xff]   ;;  %v10208_v24 = vld [vmem:[#allocation21 + $0x58] sm:$0xff]  }
 0x724   :  { %v10207_v41 = vld [vmem:[#allocation21 + $0x90] sm:$0xff]  }
 0x726   :  { %7335 = vmatpush1.bf16.msra.mxu1 %v10130_v57  ;;  %7417 = vmatpush1.bf16.msra.mxu0 %v10133_v43  ;;  %v10209_v57 = vld [vmem:[#allocation21 + $0xd8] sm:$0xff]  }
 0x727   :  { %7336 = vmatprep.subr.bf16.mxu1 %v10138_v20  ;;  %7418 = vmatprep.subr.bf16.mxu0 %v10141_v18  ;;  %v10210_v43 = vld [vmem:[#allocation21 + $0x18] sm:$0xff]   ;;  %v10212_v18 = vld [vmem:[#allocation21 + $0x60] sm:$0xff]  }
 0x728   :  { %v10211_v20 = vld [vmem:[#allocation21 + $0x98] sm:$0xff]  }
 0x72a   :  { %7337 = vmatpush1.bf16.msra.mxu1 %v10136_v47  ;;  %7419 = vmatpush1.bf16.msra.mxu0 %v10139_v31  ;;  %v10213_v47 = vld [vmem:[#allocation21 + $0xe0] sm:$0xff]  }
 0x72b   :  { %7338 = vmatprep.subr.bf16.mxu1 %v10144_v10  ;;  %7420 = vmatprep.subr.bf16.mxu0 %v10147_v8  ;;  %v10214_v31 = vld [vmem:[#allocation21 + $0x20] sm:$0xff]   ;;  %v10216_v8 = vld [vmem:[#allocation21 + $0x68] sm:$0xff]  }
 0x72c   :  { %v10215_v10 = vld [vmem:[#allocation21 + $0xa0] sm:$0xff]  }
 0x72e   :  { %7339 = vmatpush1.bf16.msra.mxu1 %v10142_v36  ;;  %7421 = vmatpush1.bf16.msra.mxu0 %v10145_v34  ;;  %v10217_v36 = vld [vmem:[#allocation21 + $0xe8] sm:$0xff]  }
 0x72f   :  { %7340 = vmatprep.subr.bf16.mxu1 %v10150_v2  ;;  %7422 = vmatprep.subr.bf16.mxu0 %v10153_v19  ;;  %v10218_v34 = vld [vmem:[#allocation21 + $0x28] sm:$0xff]   ;;  %v10220_v19 = vld [vmem:[#allocation21 + $0x70] sm:$0xff]  }
 0x730   :  { %v10219_v2 = vld [vmem:[#allocation21 + $0xa8] sm:$0xff]  }
 0x732   :  { %7341 = vmatpush1.bf16.msra.mxu1 %v10148_v63  ;;  %7423 = vmatpush1.bf16.msra.mxu0 %v10151_v44  ;;  %v10221_v63 = vld [vmem:[#allocation21 + $0xf0] sm:$0xff]  }
 0x733   :  { %7342 = vmatprep.subr.bf16.mxu1 %v10156_v54  ;;  %7424 = vmatprep.subr.bf16.mxu0 %v10159_v53  ;;  %v10222_v44 = vld [vmem:[#allocation21 + $0x30] sm:$0xff]   ;;  %v10224_v53 = vld [vmem:[#allocation21 + $0x78] sm:$0xff]  }
 0x734   :  { %v10223_v54 = vld [vmem:[#allocation21 + $0xb0] sm:$0xff]  }
 0x736   :  { %7343 = vmatpush1.bf16.msra.mxu1 %v10154_v38  ;;  %7425 = vmatpush1.bf16.msra.mxu0 %v10157_v55  ;;  %v10225_v38 = vld [vmem:[#allocation21 + $0xf8] sm:$0xff]  }
 0x737   :  { %7344 = vmatprep.subr.bf16.mxu1 %v10162_v61  ;;  %7426 = vmatprep.subr.bf16.mxu0 %v10165_v11  ;;  %v10226_v55 = vld [vmem:[#allocation21 + $0x38] sm:$0xff]  }
 0x738   :  { %v10227_v61 = vld [vmem:[#allocation21 + $0xb8] sm:$0xff]  }
 0x739   :  { %v6621_v11 = vld [vmem:[#allocation19] sm:$0xf] }
 0x73a   :  { %7345 = vmatpush1.bf16.msra.mxu1 %v10160_v28  ;;  %7427 = vmatpush1.bf16.msra.mxu0 %v10163_v49  ;;  %v6626_v28 = vrot.slane %v6621_v11, %v6463_v6  ;;  %v6634_v49 = vrot.slane %v6621_v11, %v6471_v27 }
 0x73b   :  { %7346 = vmatprep.subr.bf16.mxu1 %v10168_v3  ;;  %7428 = vmatprep.subr.bf16.mxu0 %v10171_v16  ;;  %v6630_v3 = vrot.slane %v6621_v11, %v6467_v59  ;;  %v6638_v16 = vrot.slane %v6621_v11, %v6475_v42 }
 0x73e   :  { %7347 = vmatpush1.bf16.msra.mxu1 %v10166_v12  ;;  %7429 = vmatpush1.bf16.msra.mxu0 %v10169_v33 }
 0x73f   :  { %7348 = vmatprep.subr.bf16.mxu1 %v10174_v13  ;;  %7430 = vmatprep.subr.bf16.mxu0 %v10177_v40 }
 0x742   :  { %7349 = vmatpush1.bf16.msra.mxu1 %v10172_v29  ;;  %7431 = vmatpush1.bf16.msra.mxu0 %v10175_v1 }
 0x743   :  { %7350 = vmatprep.subr.bf16.mxu1 %v10180_v25  ;;  %7432 = vmatprep.subr.bf16.mxu0 %v10183_v23 }
 0x746   :  { %7351 = vmatpush1.bf16.msra.mxu1 %v10178_v14  ;;  %7433 = vmatpush1.bf16.msra.mxu0 %v10181_v45 }
 0x747   :  { %7352 = vmatprep.subr.bf16.mxu1 %v10186_v15  ;;  %7434 = vmatprep.subr.bf16.mxu0 %v10189_v5 }
 0x74a   :  { %7353 = vmatpush1.bf16.msra.mxu1 %v10184_v22  ;;  %7435 = vmatpush1.bf16.msra.mxu0 %v10187_v50 }
 0x74b   :  { %7354 = vmatprep.subr.bf16.mxu1 %v10192_v35  ;;  %7436 = vmatprep.subr.bf16.mxu0 %v10195_v21  ;;  %v8508_v21 = vld [vmem:[#allocation22] ss:$0 sm:$0xff] }
 0x74e   :  { %7355 = vmatpush1.bf16.msra.mxu1 %v10190_v30  ;;  %7437 = vmatpush1.bf16.msra.mxu0 %v10193_v9 }
 0x74f   :  { %8691 = vmatprep.subr.bf16.mxu1 %v10196_v51  ;;  %8713 = vmatprep.subr.bf16.mxu0 %v10197_v46 }
 0x751   :  { %7357 = vmatmul.mubr.bf16.vlgmr.msra.gmra.mrb[84].mxu1 %v6491_v32  ;;  %7439 = vmatmul.mubr.bf16.vlgmr.msra.gmra.mrb[76].mxu0 %v6491_v32 }
 0x752   :  { %8692 = vmatpush3.bf16.msra.mxu1 %v10198_v26  ;;  %8714 = vmatpush3.bf16.msra.mxu0 %v10199_v62 }
 0x753   :  { %8693 = vmatprep.subr.bf16.mxu1 %v10200_v17  ;;  %8715 = vmatprep.subr.bf16.mxu0 %v10201_v48 }
 0x756   :  { %8694 = vmatpush3.bf16.msra.mxu1 %v10202_v7  ;;  %8716 = vmatpush3.bf16.msra.mxu0 %v10203_v60 }
 0x757   :  { %8695 = vmatprep.subr.bf16.mxu1 %v10204_v37  ;;  %8717 = vmatprep.subr.bf16.mxu0 %v10205_v39 }
 0x75a   :  { %8696 = vmatpush3.bf16.msra.mxu1 %v10206_v4  ;;  %8718 = vmatpush3.bf16.msra.mxu0 %v10207_v41 }
 0x75b   :  { %8697 = vmatprep.subr.bf16.mxu1 %v10208_v24  ;;  %8719 = vmatprep.subr.bf16.mxu0 %v10209_v57 }
 0x75e   :  { %8698 = vmatpush3.bf16.msra.mxu1 %v10210_v43  ;;  %8720 = vmatpush3.bf16.msra.mxu0 %v10211_v20 }
 0x75f   :  { %8699 = vmatprep.subr.bf16.mxu1 %v10212_v18  ;;  %8721 = vmatprep.subr.bf16.mxu0 %v10213_v47 }
 0x762   :  { %8700 = vmatpush3.bf16.msra.mxu1 %v10214_v31  ;;  %8722 = vmatpush3.bf16.msra.mxu0 %v10215_v10 }
 0x763   :  { %8701 = vmatprep.subr.bf16.mxu1 %v10216_v8  ;;  %8723 = vmatprep.subr.bf16.mxu0 %v10217_v36 }
 0x766   :  { %8702 = vmatpush3.bf16.msra.mxu1 %v10218_v34  ;;  %8724 = vmatpush3.bf16.msra.mxu0 %v10219_v2 }
 0x767   :  { %8703 = vmatprep.subr.bf16.mxu1 %v10220_v19  ;;  %8725 = vmatprep.subr.bf16.mxu0 %v10221_v63 }
 0x76a   :  { %8704 = vmatpush3.bf16.msra.mxu1 %v10222_v44  ;;  %8726 = vmatpush3.bf16.msra.mxu0 %v10223_v54 }
 0x76b   :  { %8705 = vmatprep.subr.bf16.mxu1 %v10224_v53  ;;  %8727 = vmatprep.subr.bf16.mxu0 %v10225_v38 }
 0x76e   :  { %8706 = vmatpush3.bf16.msra.mxu1 %v10226_v55  ;;  %8728 = vmatpush3.bf16.msra.mxu0 %v10227_v61 }
 0x824   :  { %v7358_v12 = vpop.f32.mrb[84].mxu1  ;;  %v7440_v33 = vpop.f32.mrb[76].mxu0 }
 0x825   :  { %v9163_v13 = vadd.f32 %v7358_v12, %v6626_v28  ;;  %v9165_v40 = vadd.f32 %v7440_v33, %v6634_v49  ;;  %v7360_v29 = vpop.f32.mrb[85].mxu1  ;;  %v7442_v1 = vpop.f32.mrb[77].mxu0 }
 0x826   :  { %v9164_v25 = vadd.f32 %v7360_v29, %v6630_v3  ;;  %v9166_v23 = vadd.f32 %v7442_v1, %v6638_v16  ;;  %v7362_v14 = vpop.f32.mrb[86].mxu1  ;;  %v7444_v45 = vpop.f32.mrb[78].mxu0 }
 0x827   :  { %v7447_v6 = vmax.f32 %v9163_v13, 0.0  ;;  %v7449_v56 = vmax.f32 %v9165_v40, 0.0  ;;  %v7363_v15 = vpop.f32.mrb[87].mxu1  ;;  %v7445_v27 = vpop.f32.mrb[79].mxu0 }
 0x828   :  { %v7448_v5 = vmax.f32 %v9164_v25, 0.0  ;;  %v7450_v22 = vmax.f32 %v9166_v23, 0.0 }
 0x829   :  { %v7451_v0 = vpack.c.bf16 %v7447_v6, %v7447_v6  ;;  %v7453_v42 = vpack.c.bf16 %v7449_v56, %v7449_v56 }
 0x82a   :  { %v7452_v59 = vpack.c.bf16 %v7448_v5, %v7448_v5  ;;  %v7454_v50 = vpack.c.bf16 %v7450_v22, %v7450_v22 }
 0x82c   :  { %7750 = vmatprep.mubr.bf16.mxu1 %v7452_v59  ;;  %7790 = vmatprep.mubr.bf16.mxu0 %v7454_v50 }
 0x82d   :  { %7751 = vmatmul.mubr.bf16.vlgmr.msra.gmra.mrb[88].mxu1 %v7451_v0  ;;  %7791 = vmatmul.mubr.bf16.vlgmr.msra.gmra.mrb[80].mxu0 %v7453_v42 }
 0x900   :  { %v8707_v52 = vpop.f32.mrb[88].mxu1  ;;  %v8729_v35 = vpop.f32.mrb[80].mxu0 }
 0x901   :  { %v8708_v30 = vpop.f32.mrb[89].mxu1  ;;  %v8730_v9 = vpop.f32.mrb[81].mxu0 }
 0x902   :  { %v8709_v58 = vadd.f32 %v8708_v30, %v8707_v52  ;;  %v8731_v51 = vadd.f32 %v8730_v9, %v8729_v35  ;;  %v8710_v46 = vpop.f32.mrb[90].mxu1  ;;  %v8732_v26 = vpop.f32.mrb[82].mxu0 }
 0x903   :  { %v8711_v62 = vpop.f32.mrb[91].mxu1  ;;  %v8733_v32 = vpop.f32.mrb[83].mxu0 }
 0x904   :  { %v7753_v17 = vadd.f32 %v8709_v58, %v8508_v21 }
 0x906   :  { %v7793_v48 = vadd.f32 %v8731_v51, %v7753_v17 }
 0x908   :  { %7798 = vst [vmem:[%s11613_s14] sm:$0xf] %v7793_v48 }
 0x909   :  { %7803 = vsyncpa [#allocation3], 1 }
 0x90a   :  { %7804 = vsyncpa [#allocation5], 1 }
 0x90b   :  { %7805 = vsyncpa [#allocation8], 1 }
 0x90c   :  { %7806 = vsyncpa [#allocation11], 1 }
 0x90d   :  { %7807 = vsyncpa [#allocation14], 1 }
 0x90e   :  { %7808 = vsyncpa [#allocation17], 1 }
 0x90f   :  { %7809 = vsyncpa [#allocation20], 1 }
 0x910   :  { %7810 = vsyncpa [#allocation23], 1 }

</bundles_post_ra>
